<compile_context>
chip_gen: v7x
topology: tpu7x:2x2x1
jax: 0.10.0
libtpu: 0.0.40
codegen_flags: <defaults>
</compile_context>

<pallas_src>
import functools

import jax
import jax.numpy as jnp
import numpy as np
from jax.experimental import pallas as pl
from jax.experimental.pallas import tpu as pltpu


# ----------------------------- fused Pallas kernel ------------------------------

def fused_textcnn_kernel(ids_ref, wfold_ref, cbias_ref, fcw_ref, fcb_ref,
                         out_ref, *, filter_sizes, seq_len, f_pad):
    """one_hot(ids) @ (table@W_cat) + shift-add + bias + ReLU + max-pool + FC.

    ids_ref:   (TB*L, 1) int32 (row-major flat (batch, position))
    wfold_ref: (V, n_cat)      n_cat = sum_k k * f_pad
    cbias_ref: (num_sizes, f_pad)
    fcw_ref:   (num_sizes*f_pad, C_pad)
    fcb_ref:   (1, C_pad)
    out_ref:   (TB, C_pad)
    """
    m_rows = ids_ref.shape[0]
    L = seq_len
    tb = m_rows // L
    V = wfold_ref.shape[0]

    # --- embedding gather + all conv taps of all filter sizes: ONE MXU matmul ---
    # 2-D one-hot, built directly in the matmul input dtype.
    # NOTE: out-of-range ids give an all-zero row (i.e. a zero embedding) rather
    # than an error, unlike nn.Embedding; harmless for valid / padded ids.
    vocab_iota = jax.lax.broadcasted_iota(jnp.int32, (m_rows, V), 1)
    one_hot = (ids_ref[...] == vocab_iota).astype(wfold_ref.dtype)
    y = jnp.dot(one_hot, wfold_ref[...],
                preferred_element_type=jnp.float32)             # (M, n_cat) f32

    # --- shift-add + bias + ReLU + global max-pool epilogue (VPU/XLU work) ------
    # Tap j needs row t+j; bring it to row t with an XLU roll (shift M-j == -j
    # mod M) instead of an unaligned sublane slice.  Rows contaminated by the
    # wrap across a batch-row boundary all lie at t >= T and are masked to 0
    # after ReLU, which cannot win the max (valid post-ReLU values are >= 0).
    t_idx = jax.lax.broadcasted_iota(jnp.int32, (tb, L, f_pad), 1)   # hoisted once
    pooled = []
    col = 0
    for s, k in enumerate(filter_sizes):
        T = L - k + 1                                   # valid conv positions
        acc = y[:, col:col + f_pad]                     # lane slices are 128-aligned
        col += f_pad
        for j in range(1, k):
            acc = acc + pltpu.roll(y[:, col:col + f_pad], m_rows - j, 0)
            col += f_pad
        acc = acc.reshape(tb, L, f_pad)                 # leading-dim split only
        acc = jnp.maximum(acc + cbias_ref[s][None, None, :], 0.0)   # bias + ReLU
        acc = jnp.where(t_idx < T, acc, 0.0)            # drop invalid positions
        pooled.append(jnp.max(acc, axis=1))             # (TB, f_pad)
    feats = jnp.concatenate(pooled, axis=1)             # (TB, ns*f_pad)

    # --- classifier head (padded classes carry zero weights/bias) ---------------
    logits = jnp.dot(feats.astype(fcw_ref.dtype), fcw_ref[...],
                     preferred_element_type=jnp.float32) + fcb_ref[0][None, :]
    out_ref[...] = logits.astype(out_ref.dtype)


# ------------------------------ param packing ---------------------------------

def pack_params(params, *, f_pad=128, c_pad=128, dtype=jnp.float32):
    """Pack PyTorch-layout params into lane-aligned kernel operands."""
    fs = tuple(params["filter_sizes"])
    table = params["embedding"].astype(jnp.float32)
    F = params["conv_w"][0].shape[2]
    C = params["fc_w"].shape[1]
    V, E = table.shape
    ns = len(fs)

    # W_cat: one column block per (filter_size s, tap j): F real lanes + zero pad.
    w_cat = jnp.zeros((E, sum(fs) * f_pad), jnp.float32)
    col = 0
    for w in params["conv_w"]:                      # w: (k, E, F)
        for j in range(w.shape[0]):
            w_cat = w_cat.at[:, col:col + F].set(w[j])
            col += f_pad

    # Fold the embedding table into the conv weights (drops one MXU matmul
    # per tile and the (M, E) f32 intermediate in the kernel).
    w_fold = jnp.dot(table, w_cat)                  # (V, n_cat), f32

    cbias = jnp.zeros((ns, f_pad), jnp.float32)
    for s, b in enumerate(params["conv_b"]):        # b: (1, F)
        cbias = cbias.at[s, :F].set(b[0])

    # FC weight rows re-indexed to the padded feature layout, classes padded.
    fc_w_pad = jnp.zeros((ns * f_pad, c_pad), jnp.float32)
    for s in range(ns):
        fc_w_pad = fc_w_pad.at[s * f_pad:s * f_pad + F, :C].set(
            params["fc_w"][s * F:(s + 1) * F, :])
    fc_b_pad = jnp.zeros((1, c_pad), jnp.float32).at[:, :C].set(params["fc_b"])

    return {
        "filter_sizes": fs, "num_classes": C, "f_pad": f_pad, "c_pad": c_pad,
        "vocab_size": V,
        "w_fold": w_fold.astype(dtype),
        "cbias": cbias.astype(jnp.float32),
        "fc_w": fc_w_pad.astype(dtype),
        "fc_b": fc_b_pad.astype(jnp.float32),
    }


# ------------------------------ JAX wrapper ------------------------------------

def textcnn_forward(packed, batch, *, tile_b=None):
    """Mirrors TextCNN.forward (eval mode)."""
    ids = batch["input_ids"].astype(jnp.int32)                 # (B, L)
    B, L = ids.shape
    fs = packed["filter_sizes"]
    f_pad, c_pad, ns = packed["f_pad"], packed["c_pad"], len(fs)
    w_fold, cbias = packed["w_fold"], packed["cbias"]
    fc_w, fc_b = packed["fc_w"], packed["fc_b"]
    V, n_cat = w_fold.shape

    if tile_b is None:
        # ~512 matmul rows per grid step amortizes per-step pipeline overhead;
        # cap at ceil(B/2) so the grid has >= 2 steps and v7x's two TensorCores
        # both get work.  (For v7x 64 MiB VMEM / v5e 16 MiB scoped default keep
        # tile_b*L*n_cat*4 B — the in-kernel f32 y buffer — well inside budget.)
        tile_b = min(pl.cdiv(512, L), pl.cdiv(B, 2))
    tile_b = max(8, ((tile_b + 7) // 8) * 8)                   # sublane multiple

    bp = pl.cdiv(B, tile_b) * tile_b
    if bp != B:
        ids = jnp.pad(ids, ((0, bp - B), (0, 0)))
    ids_flat = ids.reshape(bp * L, 1)          # flat column -> 2-D one-hot in kernel

    m_rows = tile_b * L
    flops = 2 * bp * L * V * n_cat + 2 * bp * ns * f_pad * c_pad
    bytes_accessed = int(ids_flat.size * 4
                         + w_fold.size * w_fold.dtype.itemsize
                         + cbias.size * 4
                         + fc_w.size * fc_w.dtype.itemsize
                         + fc_b.size * 4
                         + bp * c_pad * 4)

    out_pad = pl.pallas_call(
        functools.partial(fused_textcnn_kernel, filter_sizes=fs,
                          seq_len=L, f_pad=f_pad),
        out_shape=jax.ShapeDtypeStruct((bp, c_pad), jnp.float32),
        grid=(bp // tile_b,),
        in_specs=[
            pl.BlockSpec((m_rows, 1), lambda i: (i, 0)),          # flat token ids
            pl.BlockSpec((V, n_cat), lambda i: (0, 0)),           # folded emb+conv weights
            pl.BlockSpec((ns, f_pad), lambda i: (0, 0)),          # conv biases
            pl.BlockSpec((ns * f_pad, c_pad), lambda i: (0, 0)),  # fc weight
            pl.BlockSpec((1, c_pad), lambda i: (0, 0)),           # fc bias
        ],
        out_specs=pl.BlockSpec((tile_b, c_pad), lambda i: (i, 0)),
        compiler_params=pltpu.CompilerParams(dimension_semantics=("parallel",)),
        cost_estimate=pl.CostEstimate(flops=flops, transcendentals=0,
                                      bytes_accessed=bytes_accessed),
    )(ids_flat, w_fold, cbias, fc_w, fc_b)

    # TODO(synk): nn.Dropout(0.5) is identity at inference; train-mode dropout not implemented.
    # (Weight operands could also be single-buffered via pipeline_mode; skipped —
    # sub-MiB win at these weight sizes.)
    return out_pad[:B, :packed["num_classes"]]                  # strip lane padding


# --------------------------- pure-JAX reference ---------------------------------

def textcnn_reference(params, batch):
    emb = params["embedding"][batch["input_ids"]]
    feats = []
    for k, w, b in zip(params["filter_sizes"], params["conv_w"], params["conv_b"]):
        B, L, E = emb.shape
        T = L - k + 1
        acc = jnp.zeros((B, T, w.shape[2]), jnp.float32)
        for j in range(k):
            acc = acc + jnp.einsum("bte,ef->btf", emb[:, j:j + T, :], w[j])
        acc = jnp.maximum(acc + b[0][None, None, :], 0.0)
        feats.append(jnp.max(acc, axis=1))
    out = jnp.concatenate(feats, axis=1)
    return out @ params["fc_w"] + params["fc_b"][0][None, :]


# --------------------------------- main ------------------------------------------

if __name__ == "__main__":
    vocab_size = 64
    embed_dim = 128
    num_filters = 96
    filter_sizes = (2, 3, 4)
    num_classes = 10
    B, L = 32, 16

    key = jax.random.PRNGKey(0)
    k_emb, k_ids, k_fc_w, k_fc_b, *k_convs = jax.random.split(key, 4 + 2 * len(filter_sizes))

    params = {
        "filter_sizes": filter_sizes,
        "embedding": jax.random.normal(k_emb, (vocab_size, embed_dim), jnp.float32) * 0.1,
        # PyTorch conv weight (F, 1, k, E) stored as (k, E, F) for the matmul layout.
        "conv_w": [
            jax.random.normal(k_convs[2 * i], (k, embed_dim, num_filters), jnp.float32) * 0.05
            for i, k in enumerate(filter_sizes)
        ],
        "conv_b": [
            jax.random.normal(k_convs[2 * i + 1], (1, num_filters), jnp.float32) * 0.05
            for i, _ in enumerate(filter_sizes)
        ],
        # PyTorch fc weight (C, 3F) stored transposed as (3F, C).
        "fc_w": jax.random.normal(k_fc_w, (num_filters * len(filter_sizes), num_classes),
                                  jnp.float32) * 0.05,
        "fc_b": jax.random.normal(k_fc_b, (1, num_classes), jnp.float32) * 0.05,
    }

    batch = {"input_ids": jax.random.randint(k_ids, (B, L), 0, vocab_size, dtype=jnp.int32)}

    # dtype=jnp.bfloat16 enables the bf16-weights / f32-accumulate path on
    # v6e/v7x (loosen the check tolerance to ~1e-2 if you do).
    packed = pack_params(params, dtype=jnp.float32)

    out = jax.block_until_ready(textcnn_forward(packed, batch))
    ref = jax.block_until_ready(textcnn_reference(params, batch))

    assert out.shape == (B, num_classes), out.shape
    np.testing.assert_allclose(np.asarray(out), np.asarray(ref), rtol=1e-3, atol=1e-3)

    print("KERNEL_OK")
</pallas_src>

<mosaic_0001>
module attributes {stable_mosaic.version = 11 : i64} {
  func.func @fused_textcnn_kernel(%arg0: i32, %arg1: memref<256x1xi32, #tpu.memory_space<vmem>>, %arg2: memref<64x1152xf32, #tpu.memory_space<vmem>>, %arg3: memref<3x128xf32, #tpu.memory_space<vmem>>, %arg4: memref<384x128xf32, #tpu.memory_space<vmem>>, %arg5: memref<1x128xf32, #tpu.memory_space<vmem>>, %arg6: memref<16x128xf32, #tpu.memory_space<vmem>>) attributes {dimension_semantics = [#tpu.dimension_semantics<parallel>], iteration_bounds = array<i64: 2>, scalar_prefetch = 0 : i64, scratch_operands = 0 : i64, tpu.core_type = #tpu.core_type<tc>, window_params = [{transform_indices = @transform_0, window_bounds = array<i64: 256, 1>}, {pipeline_mode = #tpu.pipeline_mode<synchronous>, transform_indices = @transform_1, window_bounds = array<i64: 64, 1152>}, {pipeline_mode = #tpu.pipeline_mode<synchronous>, transform_indices = @transform_2, window_bounds = array<i64: 3, 128>}, {pipeline_mode = #tpu.pipeline_mode<synchronous>, transform_indices = @transform_3, window_bounds = array<i64: 384, 128>}, {pipeline_mode = #tpu.pipeline_mode<synchronous>, transform_indices = @transform_4, window_bounds = array<i64: 1, 128>}, {transform_indices = @transform_5, window_bounds = array<i64: 16, 128>}]} {
    %0 = tpu.iota {dimensions = array<i32: 1>} : vector<256x64xi32>
    %c0 = arith.constant 0 : index
    %c0_0 = arith.constant 0 : index
    %1 = vector.load %arg1[%c0, %c0_0] : memref<256x1xi32, #tpu.memory_space<vmem>>, vector<256x1xi32>
    %2 = vector.broadcast %1 : vector<256x1xi32> to vector<256x64xi32>
    %3 = arith.cmpi eq, %2, %0 : vector<256x64xi32>
    %4 = arith.extui %3 : vector<256x64xi1> to vector<256x64xi32>
    %5 = arith.sitofp %4 : vector<256x64xi32> to vector<256x64xf32>
    %c0_1 = arith.constant 0 : index
    %c0_2 = arith.constant 0 : index
    %6 = vector.load %arg2[%c0_1, %c0_2] : memref<64x1152xf32, #tpu.memory_space<vmem>>, vector<64x1152xf32>
    %cst = arith.constant dense<0.000000e+00> : vector<256x1152xf32>
    %7 = tpu.matmul %5, %6, %cst {dimension_numbers = #tpu.dot_dimension_numbers<[1], [0], [0], [1], [0, 0, 1, 1], [], []>} : vector<256x64xf32>, vector<64x1152xf32>, vector<256x1152xf32> -> vector<256x1152xf32>
    %8 = tpu.iota {dimensions = array<i32: 1>} : vector<16x16x128xi32>
    %9 = vector.extract_strided_slice %7 {offsets = [0, 0], sizes = [256, 128], strides = [1, 1]} : vector<256x1152xf32> to vector<256x128xf32>
    %10 = vector.extract_strided_slice %7 {offsets = [0, 128], sizes = [256, 128], strides = [1, 1]} : vector<256x1152xf32> to vector<256x128xf32>
    %c255_i32 = arith.constant 255 : i32
    %11 = tpu.dynamic_rotate %10 by %c255_i32 dim 0 : vector<256x128xf32>, i32 -> vector<256x128xf32>
    %12 = arith.addf %9, %11 : vector<256x128xf32>
    %13 = vector.shape_cast %12 : vector<256x128xf32> to vector<16x16x128xf32>
    %c0_3 = arith.constant 0 : index
    %c0_4 = arith.constant 0 : index
    %14 = vector.load %arg3[%c0_3, %c0_4] : memref<3x128xf32, #tpu.memory_space<vmem>>, vector<1x128xf32>
    %15 = vector.shape_cast %14 : vector<1x128xf32> to vector<128xf32>
    %16 = vector.shape_cast %15 : vector<128xf32> to vector<1x1x128xf32>
    %17 = vector.broadcast %16 : vector<1x1x128xf32> to vector<16x16x128xf32>
    %18 = arith.addf %13, %17 : vector<16x16x128xf32>
    %cst_5 = arith.constant 0.000000e+00 : f32
    %19 = vector.broadcast %cst_5 : f32 to vector<16x16x128xf32>
    %20 = arith.maximumf %18, %19 : vector<16x16x128xf32>
    %c15_i32 = arith.constant 15 : i32
    %21 = vector.broadcast %c15_i32 : i32 to vector<16x16x128xi32>
    %22 = arith.cmpi slt, %8, %21 : vector<16x16x128xi32>
    %cst_6 = arith.constant 0.000000e+00 : f32
    %23 = vector.broadcast %cst_6 : f32 to vector<16x16x128xf32>
    %24 = arith.select %22, %20, %23 : vector<16x16x128xi1>, vector<16x16x128xf32>
    %cst_7 = arith.constant dense<0xFF800000> : vector<16x128xf32>
    %25 = vector.multi_reduction <maximumf>, %24, %cst_7 [1] : vector<16x16x128xf32> to vector<16x128xf32>
    %26 = vector.extract_strided_slice %7 {offsets = [0, 256], sizes = [256, 128], strides = [1, 1]} : vector<256x1152xf32> to vector<256x128xf32>
    %27 = vector.extract_strided_slice %7 {offsets = [0, 384], sizes = [256, 128], strides = [1, 1]} : vector<256x1152xf32> to vector<256x128xf32>
    %c255_i32_8 = arith.constant 255 : i32
    %28 = tpu.dynamic_rotate %27 by %c255_i32_8 dim 0 : vector<256x128xf32>, i32 -> vector<256x128xf32>
    %29 = arith.addf %26, %28 : vector<256x128xf32>
    %30 = vector.extract_strided_slice %7 {offsets = [0, 512], sizes = [256, 128], strides = [1, 1]} : vector<256x1152xf32> to vector<256x128xf32>
    %c254_i32 = arith.constant 254 : i32
    %31 = tpu.dynamic_rotate %30 by %c254_i32 dim 0 : vector<256x128xf32>, i32 -> vector<256x128xf32>
    %32 = arith.addf %29, %31 : vector<256x128xf32>
    %33 = vector.shape_cast %32 : vector<256x128xf32> to vector<16x16x128xf32>
    %c1 = arith.constant 1 : index
    %c0_9 = arith.constant 0 : index
    %34 = vector.load %arg3[%c1, %c0_9] : memref<3x128xf32, #tpu.memory_space<vmem>>, vector<1x128xf32>
    %35 = vector.shape_cast %34 : vector<1x128xf32> to vector<128xf32>
    %36 = vector.shape_cast %35 : vector<128xf32> to vector<1x1x128xf32>
    %37 = vector.broadcast %36 : vector<1x1x128xf32> to vector<16x16x128xf32>
    %38 = arith.addf %33, %37 : vector<16x16x128xf32>
    %cst_10 = arith.constant 0.000000e+00 : f32
    %39 = vector.broadcast %cst_10 : f32 to vector<16x16x128xf32>
    %40 = arith.maximumf %38, %39 : vector<16x16x128xf32>
    %c14_i32 = arith.constant 14 : i32
    %41 = vector.broadcast %c14_i32 : i32 to vector<16x16x128xi32>
    %42 = arith.cmpi slt, %8, %41 : vector<16x16x128xi32>
    %cst_11 = arith.constant 0.000000e+00 : f32
    %43 = vector.broadcast %cst_11 : f32 to vector<16x16x128xf32>
    %44 = arith.select %42, %40, %43 : vector<16x16x128xi1>, vector<16x16x128xf32>
    %cst_12 = arith.constant dense<0xFF800000> : vector<16x128xf32>
    %45 = vector.multi_reduction <maximumf>, %44, %cst_12 [1] : vector<16x16x128xf32> to vector<16x128xf32>
    %46 = vector.extract_strided_slice %7 {offsets = [0, 640], sizes = [256, 128], strides = [1, 1]} : vector<256x1152xf32> to vector<256x128xf32>
    %47 = vector.extract_strided_slice %7 {offsets = [0, 768], sizes = [256, 128], strides = [1, 1]} : vector<256x1152xf32> to vector<256x128xf32>
    %c255_i32_13 = arith.constant 255 : i32
    %48 = tpu.dynamic_rotate %47 by %c255_i32_13 dim 0 : vector<256x128xf32>, i32 -> vector<256x128xf32>
    %49 = arith.addf %46, %48 : vector<256x128xf32>
    %50 = vector.extract_strided_slice %7 {offsets = [0, 896], sizes = [256, 128], strides = [1, 1]} : vector<256x1152xf32> to vector<256x128xf32>
    %c254_i32_14 = arith.constant 254 : i32
    %51 = tpu.dynamic_rotate %50 by %c254_i32_14 dim 0 : vector<256x128xf32>, i32 -> vector<256x128xf32>
    %52 = arith.addf %49, %51 : vector<256x128xf32>
    %53 = vector.extract_strided_slice %7 {offsets = [0, 1024], sizes = [256, 128], strides = [1, 1]} : vector<256x1152xf32> to vector<256x128xf32>
    %c253_i32 = arith.constant 253 : i32
    %54 = tpu.dynamic_rotate %53 by %c253_i32 dim 0 : vector<256x128xf32>, i32 -> vector<256x128xf32>
    %55 = arith.addf %52, %54 : vector<256x128xf32>
    %56 = vector.shape_cast %55 : vector<256x128xf32> to vector<16x16x128xf32>
    %c2 = arith.constant 2 : index
    %c0_15 = arith.constant 0 : index
    %57 = vector.load %arg3[%c2, %c0_15] : memref<3x128xf32, #tpu.memory_space<vmem>>, vector<1x128xf32>
    %58 = vector.shape_cast %57 : vector<1x128xf32> to vector<128xf32>
    %59 = vector.shape_cast %58 : vector<128xf32> to vector<1x1x128xf32>
    %60 = vector.broadcast %59 : vector<1x1x128xf32> to vector<16x16x128xf32>
    %61 = arith.addf %56, %60 : vector<16x16x128xf32>
    %cst_16 = arith.constant 0.000000e+00 : f32
    %62 = vector.broadcast %cst_16 : f32 to vector<16x16x128xf32>
    %63 = arith.maximumf %61, %62 : vector<16x16x128xf32>
    %c13_i32 = arith.constant 13 : i32
    %64 = vector.broadcast %c13_i32 : i32 to vector<16x16x128xi32>
    %65 = arith.cmpi slt, %8, %64 : vector<16x16x128xi32>
    %cst_17 = arith.constant 0.000000e+00 : f32
    %66 = vector.broadcast %cst_17 : f32 to vector<16x16x128xf32>
    %67 = arith.select %65, %63, %66 : vector<16x16x128xi1>, vector<16x16x128xf32>
    %cst_18 = arith.constant dense<0xFF800000> : vector<16x128xf32>
    %68 = vector.multi_reduction <maximumf>, %67, %cst_18 [1] : vector<16x16x128xf32> to vector<16x128xf32>
    %69 = tpu.concatenate %25, %45, %68 in 1 : vector<16x128xf32>, vector<16x128xf32>, vector<16x128xf32> -> vector<16x384xf32>
    %c0_19 = arith.constant 0 : index
    %c0_20 = arith.constant 0 : index
    %70 = vector.load %arg4[%c0_19, %c0_20] : memref<384x128xf32, #tpu.memory_space<vmem>>, vector<384x128xf32>
    %cst_21 = arith.constant dense<0.000000e+00> : vector<16x128xf32>
    %71 = tpu.matmul %69, %70, %cst_21 {dimension_numbers = #tpu.dot_dimension_numbers<[1], [0], [0], [1], [0, 0, 1, 1], [], []>} : vector<16x384xf32>, vector<384x128xf32>, vector<16x128xf32> -> vector<16x128xf32>
    %c0_22 = arith.constant 0 : index
    %c0_23 = arith.constant 0 : index
    %72 = vector.load %arg5[%c0_22, %c0_23] : memref<1x128xf32, #tpu.memory_space<vmem>>, vector<1x128xf32>
    %73 = vector.shape_cast %72 : vector<1x128xf32> to vector<128xf32>
    %74 = vector.shape_cast %73 : vector<128xf32> to vector<1x128xf32>
    %75 = vector.broadcast %74 : vector<1x128xf32> to vector<16x128xf32>
    %76 = arith.addf %71, %75 : vector<16x128xf32>
    %c0_24 = arith.constant 0 : index
    %c0_25 = arith.constant 0 : index
    %77 = vector.load %arg6[%c0_24, %c0_25] : memref<16x128xf32, #tpu.memory_space<vmem>>, vector<16x128xf32>
    tpu.vector_store %arg6[%c0_24, %c0_25], %76 {strides = array<i32>} : memref<16x128xf32, #tpu.memory_space<vmem>>, vector<16x128xf32>,
    return
  }
  func.func @transform_0(%arg0: i32) -> (i32, i32) {
    %c0_i32 = arith.constant 0 : i32
    %c0_i32_0 = arith.constant 0 : i32
    return %arg0, %c0_i32 : i32, i32
  }
  func.func @transform_1(%arg0: i32) -> (i32, i32) {
    %c0_i32 = arith.constant 0 : i32
    %c0_i32_0 = arith.constant 0 : i32
    %c0_i32_1 = arith.constant 0 : i32
    return %c0_i32, %c0_i32_0 : i32, i32
  }
  func.func @transform_2(%arg0: i32) -> (i32, i32) {
    %c0_i32 = arith.constant 0 : i32
    %c0_i32_0 = arith.constant 0 : i32
    %c0_i32_1 = arith.constant 0 : i32
    return %c0_i32, %c0_i32_0 : i32, i32
  }
  func.func @transform_3(%arg0: i32) -> (i32, i32) {
    %c0_i32 = arith.constant 0 : i32
    %c0_i32_0 = arith.constant 0 : i32
    %c0_i32_1 = arith.constant 0 : i32
    return %c0_i32, %c0_i32_0 : i32, i32
  }
  func.func @transform_4(%arg0: i32) -> (i32, i32) {
    %c0_i32 = arith.constant 0 : i32
    %c0_i32_0 = arith.constant 0 : i32
    %c0_i32_1 = arith.constant 0 : i32
    return %c0_i32, %c0_i32_0 : i32, i32
  }
  func.func @transform_5(%arg0: i32) -> (i32, i32) {
    %c0_i32 = arith.constant 0 : i32
    %c0_i32_0 = arith.constant 0 : i32
    return %arg0, %c0_i32 : i32, i32
  }
}

</mosaic_0001>

<bundles_post_ra>
// kernel: tpu_custom_call.1
= control target key start
LH: loop header
LB: loop body
LE: loop exit
PB: predicated region body
PF: predicated region fallthrough
CT: control target
= control target key end

     0   :  { %10 = vsyncpa [#allocation3], 0  ;;  %s6109_s0 = inlined_call_operand.vmem [shape: s32[512,1], index: 0, kind: input, shape index: {}]   ;;  %s6110_s1 = inlined_call_operand.hbm [shape: f32[64,1152], index: 1, kind: input, shape index: {}]   ;;  %s6111_s2 = inlined_call_operand.vmem [shape: f32[3,128], index: 2, kind: input, shape index: {}]   ;;  %s6112_s3 = inlined_call_operand.vmem [shape: f32[384,128], index: 3, kind: input, shape index: {}]   ;;  %s6113_s4 = inlined_call_operand.vmem [shape: f32[1,128], index: 4, kind: input, shape index: {}]   ;;  %s6114_s5 = inlined_call_operand.hbm [shape: f32[32,128], index: 5, kind: output, shape index: {}]  }
   0x1   :  { %11 = vsyncpa [#allocation4], 0 }
   0x2   :  { %13 = vsyncpa [#allocation4 + $0x1], 0  ;;  %s4258_s18 = smov 0   ;;  %s4260_s19 = smov 0  }
   0x3   :  { %s4262_s20 = smov 0   ;;  %s4264_s21 = smov 0  }
   0x4 LB: > { %s4279_s22 = sadd.s32 4294967295, %s4218_s21   ;;  %s3514_s23 = sadd.s32 4294967294, %s4218_s21   ;;  %s4218_s21 = sphi %s4264_s21, %s6179_s21   ;;  %s4214_s20 = sphi %s4262_s20, %s6178_s20   ;;  %s4210_s19 = sphi %s4260_s19, %s6177_s19   ;;  %s4206_s18 = sphi %s4258_s18, %s6176_s18  }
   0x5   : > { %s4283_s24 = sadd.s32 1, %s4218_s21   ;;  %s136_s25 = sadd.s32 1, %s4214_s20 }
   0x6   : > { %s133_s26 = ssub.s32 %s4218_s21, %s4283_s24  ;;  %p146_p0 = scmp.ne.s32.totalorder %s4214_s20, %s4210_s19 }
   0x7   : > { %p134_p1 = scmp.eq.s32.totalorder %s133_s26, 0  ;;  %p147_p2 = scmp.eq.s32.totalorder %s4279_s22, 1 }
   0x8   : > { %p152_p3 = scmp.ne.s32.totalorder %s4210_s19, %s4206_s18  ;;  %p153_p4 = scmp.eq.s32.totalorder %s3514_s23, 1 }
   0x9   : > { %s4294_s27 = scalar_select %p134_p1, %s4214_s20, %s136_s25  }
   0xa   : > { %p4296_p5 = por %p147_p2, %p146_p0  ;;  %p4300_p6 = por %p153_p4, %p152_p3 }
   0xb   : > { %p3515_p7 = scmp.ge.s32.totalorder %s4218_s21, 1  ;;  %p160_p8 = scmp.lt.s32.totalorder %s4218_s21, 3 }
   0xc   : > { %s6127_s28 = scalar_select %p4296_p5, 1, 0 }
   0xd   : > { %s6128_s29 = scalar_select %p4300_p6, 1, 0 }
   0xe   : > { %p6115_p9 = scmp.eq.s32.totalorder %s4279_s22, 0  ;;  %p4307_p10 = pnand %p3515_p7, %p160_p8 }
   0xf   : > { %s4220_s6 = smov [#allocation2]   ;;  %s4124_s11 = scalar_lea.hbm %s6110_s1, 9216 }
  0x10   : > { %s6129_s30 = scalar_select %p4307_p10, 1, 0 }
  0x11   : > { %s172_s7 = sshll.u32 %s4220_s6, 4  ;;  %p4070_p11 = pneg %p4307_p10  ;;  %s173_s7 = int_to_ptr.vmem [resolvable:$true] %s172_s7 }
  0x12   : > { %p4125_p13 = scmp.ne.s32.totalorder %s6110_s1, %s4124_s11  ;;  %p4131_p3 = scmp.lt.u32.totalorder %s4124_s11, %s6110_s1 }
  0x13   : > { %p4315_p12 = pnand %p6115_p9, %p4070_p11 }
  0x15   : > { %p4126_p0 = pneg %p4315_p12 }
  0x17   : > { %p4127_p1 = pnand %p4126_p0, %p4125_p13 }
  0x19   : > { %p4128_p2 = pneg %p4127_p1 }
  0x1b   : > { %p4133_p4 = pnand %p4131_p3, %p4128_p2 }
  0x1d   : > { %4136 = shalt.err (!%p4133_p4)
}
  0x1e   : > { %s4137_s16 = scalar_lea.vmem %s173_s7, 9216  ;;  %p4145_p9 = scmp.lt.s32.totalorder %s173_s7, %s173_s7 }
  0x1f   : > { %p4138_p7 = scmp.ne.s32.totalorder %s173_s7, %s4137_s16  ;;  %p4146_p6 = scmp.lt.s32.totalorder %s4137_s16, %s4137_s16 }
  0x21   : > { %p4140_p8 = pnand %p4138_p7, %p4126_p0  ;;  %p4147_p5 = por %p4146_p6, %p4145_p9 }
  0x23   : > { %p4141_p11 = pneg %p4140_p8 }
  0x25   : > { %p4148_p10 = pnand %p4147_p5, %p4141_p11 }
  0x27   : > { %4151 = shalt.err (!%p4148_p10)
}
  0x28   : > { %s4221_s17 = smov 1152   ;;  %s4222_s23 = smov 72  }
  0x29   : > { %4073 = dma.hbm_to_vmem [thread:$0]  (!%p4315_p12), %s6110_s1, 9216, %s173_s7, [#allocation3], %s4221_s17, %s4221_s17, %s4222_s23  }
  0x2a   : > { %p6131_p13 = scmp.ne.s32.totalorder %s6129_s30, 0 }
  0x2c   : > { %206 = sbr.rel (%p6131_p13) target bundleno = 988 (0x3dc), region = 40 }
  0x33   : > { %p6132_p1 = scmp.eq.s32.totalorder %s4279_s22, 0 }
  0x35   : > { %4197 = dma.done.wait (%p6132_p1), [#allocation3], 9216   ;;  %p6133_p0 = pmov %p6132_p1 }
  0x36   : > { %s3521_s6 = sshll.u32 %s4279_s22, 5  ;;  %v4223_v0 = vmov 0   ;;  %v6120_v1 = vmov 0.0   ;;  %v468_v10 = vld [vmem:[#allocation2 + $0x8] sm:$0xff]  ;;  %v477_v11 = vld [vmem:[#allocation2 + $0x50] sm:$0xff]  ;;  %v467_v12 = vld [vmem:[#allocation2] sm:$0xff] }
  0x37   : > { %4199 = vsyncadd (%p6133_p0), [#allocation3], 4294958080  ;;  %4121 = vset.pattern.permute.xlu1 %v4223_v0  ;;  %4120 = vset.pattern.permute.xlu0 %v4223_v0  ;;  %p235_p5 = scmp.lt.s32.totalorder %s3521_s6, 63  ;;  %v476_v13 = vld [vmem:[#allocation2 + $0x48] sm:$0xff]  ;;  %v3920_v16 = vpack.c.bf16 %v477_v11, %v468_v10  ;;  %v470_v18 = vld [vmem:[#allocation2 + $0x18] sm:$0xff]  ;;  %vm539_vm0 = vcmask 523264  }
  0x38   : > { %700 = vmatprep.mubr.f32.mxu0 %v6120_v1  ;;  %957 = vmatprep.mubr.f32.mxu1 %v6120_v1  ;;  %v3922_v17 = vpack.c.bf16 %v476_v13, %v467_v12  ;;  %v479_v19 = vld [vmem:[#allocation2 + $0x60] sm:$0xff]  ;;  %v469_v20 = vld [vmem:[#allocation2 + $0x10] sm:$0xff]  ;;  %v478_v22 = vld [vmem:[#allocation2 + $0x58] sm:$0xff]  ;;  %s231_s26 = sand.u32 1, %s4210_s19   ;;  %s3724_s10 = sshll.u32 %s4279_s22, 8 }
  0x39   : > { %s6181_s6 = smov (!%p235_p5, %s3521_s6), 63  ;;  %v3936_v21 = vpack.c.bf16 %v479_v19, %v470_v18  ;;  %v486_v23 = vld [vmem:[#allocation2 + $0x98] sm:$0xff]  ;;  %v495_v24 = vld [vmem:[#allocation2 + $0xe0] sm:$0xff]  ;;  %3921 = vmatprep.subr.bf16.mxu0 %v3920_v16  ;;  %v3938_v25 = vpack.c.bf16 %v478_v22, %v469_v20  ;;  %v485_v27 = vld [vmem:[#allocation2 + $0x90] sm:$0xff]  ;;  %s6066_s13 = scalar_lea.hbm %s6114_s5, %s3724_s10 }
  0x3a   : > { %s3522_s30 = sshll.u32 %s6181_s6, 3  ;;  %v3924_v26 = vpack.c.bf16 %v495_v24, %v486_v23  ;;  %v494_v28 = vld [vmem:[#allocation2 + $0xd8] sm:$0xff]  ;;  %v488_v29 = vld [vmem:[#allocation2 + $0xa8] sm:$0xff]  ;;  %3923 = vmatpush1.bf16.msra.mxu0 %v3922_v17  ;;  %v497_v31 = vld [vmem:[#allocation2 + $0xf0] sm:$0xff]  ;;  %s3520_s6 = sshll.u32 %s231_s26, 4 }
  0x3b   : > { %s4347_s9 = scalar_lea.vmem %s6109_s0, %s3522_s30  ;;  %3937 = vmatprep.subr.bf16.mxu1 %v3936_v21  ;;  %v3926_v30 = vpack.c.bf16 %v494_v28, %v485_v27  ;;  %v487_v32 = vld [vmem:[#allocation2 + $0xa0] sm:$0xff]  ;;  %v496_v33 = vld [vmem:[#allocation2 + $0xe8] sm:$0xff]  ;;  %v3940_v36 = vpack.c.bf16 %v497_v31, %v488_v29  ;;  %v513_v39 = vld [vmem:[#allocation2 + $0x170] sm:$0xff]  ;;  %s233_s8 = scalar_lea.vmem [#allocation5], %s3520_s6 }
  0x3c   : > { %v245_v2 = vld [vmem:[%s4347_s9 + $0x10] sm:$0xff]  ;;  %v243_v3 = vld [vmem:[%s4347_s9] sm:$0xff]  ;;  %v246_v4 = vld [vmem:[%s4347_s9 + $0x18] sm:$0xff]  ;;  %3939 = vmatpush1.bf16.msra.mxu1 %v3938_v25  ;;  %3925 = vmatprep.subr.bf16.mxu0 %v3924_v26  ;;  %v3942_v37 = vpack.c.bf16 %v496_v33, %v487_v32  ;;  %v241_v25 = vlaneseq  ;;  %s6068_s14 = scalar_lea.sflag [#allocation4], %s231_s26  ;;  %p6174_p9 = scmp.ne.s32.totalorder %s6127_s28, 0 }
  0x3d   : > { %282 = vperm.xlu1 %4121, %v245_v2   ;;  %276 = vperm.xlu0 %4120, %v243_v3   ;;  %v244_v5 = vld [vmem:[%s4347_s9 + $0x8] sm:$0xff]  ;;  %v247_v7 = vld [vmem:[%s4347_s9 + $0x20] sm:$0xff]  ;;  %v250_v8 = vld [vmem:[%s4347_s9 + $0x38] sm:$0xff]  ;;  %s4225_s15 = smov [#allocation5]  }
  0x3e   : > { %v248_v6 = vld [vmem:[%s4347_s9 + $0x28] sm:$0xff]  ;;  %v249_v9 = vld [vmem:[%s4347_s9 + $0x30] sm:$0xff]  ;;  %v251_v15 = vld [vmem:[%s4347_s9 + $0x40] sm:$0xff]  ;;  %3941 = vmatprep.subr.bf16.mxu1 %v3940_v36  ;;  %3927 = vmatpush1.bf16.msra.mxu0 %v3926_v30  ;;  %v4382_v26 = vand.u32 127, %v241_v25  ;;  %s4156_s16 = sshll.u32 %s4225_s15, 4  ;;  %s4157_s16 = int_to_ptr.vmem [resolvable:$false] %s4156_s16 }
  0x3f   : > { %v252_v14 = vld [vmem:[%s4347_s9 + $0x48] sm:$0xff]  ;;  %v254_v34 = vld [vmem:[%s4347_s9 + $0x58] sm:$0xff]  ;;  %v253_v35 = vld [vmem:[%s4347_s9 + $0x50] sm:$0xff]  ;;  %s4158_s17 = scalar_lea.vmem %s4157_s16, 512 }
  0x40   : > { %v504_v38 = vld [vmem:[#allocation2 + $0x128] sm:$0xff]  ;;  %v503_v40 = vld [vmem:[#allocation2 + $0x120] sm:$0xff]  ;;  %v506_v43 = vld [vmem:[#allocation2 + $0x138] sm:$0xff]  ;;  %3943 = vmatpush1.bf16.msra.mxu1 %v3942_v37 }
  0x41   : > { %285 = vperm.xlu1 %4121, %v246_v4   ;;  %279 = vperm.xlu0 %4120, %v244_v5   ;;  %v3928_v41 = vpack.c.bf16 %v513_v39, %v504_v38  ;;  %v512_v42 = vld [vmem:[#allocation2 + $0x168] sm:$0xff]  ;;  %v515_v44 = vld [vmem:[#allocation2 + $0x180] sm:$0xff]  ;;  %v505_v46 = vld [vmem:[#allocation2 + $0x130] sm:$0xff] }
  0x42   : > { %v3944_v45 = vpack.c.bf16 %v515_v44, %v506_v43  ;;  %v514_v47 = vld [vmem:[#allocation2 + $0x178] sm:$0xff]  ;;  %v3930_v49 = vpack.c.bf16 %v512_v42, %v503_v40  ;;  %v531_v50 = vld [vmem:[#allocation2 + $0x200] sm:$0xff]  ;;  %v521_v51 = vld [vmem:[#allocation2 + $0x1b0] sm:$0xff] }
  0x43   : > { %v522_v48 = vld [vmem:[#allocation2 + $0x1b8] sm:$0xff]  ;;  %3929 = vmatprep.subr.bf16.mxu0 %v3928_v41  ;;  %v3946_v53 = vpack.c.bf16 %v514_v47, %v505_v46  ;;  %v524_v55 = vld [vmem:[#allocation2 + $0x1c8] sm:$0xff]  ;;  %v533_v56 = vld [vmem:[#allocation2 + $0x210] sm:$0xff] }
  0x44   : > { %v530_v52 = vld [vmem:[#allocation2 + $0x1f8] sm:$0xff]  ;;  %v3932_v54 = vpack.c.bf16 %v531_v50, %v522_v48  ;;  %v523_v57 = vld [vmem:[#allocation2 + $0x1c0] sm:$0xff]  ;;  %v532_v58 = vld [vmem:[#allocation2 + $0x208] sm:$0xff]  ;;  %3945 = vmatprep.subr.bf16.mxu1 %v3944_v45  ;;  %v3948_v63 = vpack.c.bf16 %v533_v56, %v524_v55  ;;  %3931 = vmatpush1.bf16.msra.mxu0 %v3930_v49 }
  0x45   : > { %291 = vperm.xlu1 %4121, %v248_v6   ;;  %288 = vperm.xlu0 %4120, %v247_v7   ;;  %v472_v59 = vld [vmem:[#allocation2 + $0x28] sm:$0xff]  ;;  %v481_v60 = vld [vmem:[#allocation2 + $0x70] sm:$0xff]  ;;  %v255_v62 = vld [vmem:[%s4347_s9 + $0x60] sm:$0xff]  ;;  %v3934_v0 = vpack.c.bf16 %v530_v52, %v521_v51  ;;  %v3950_v2 = vpack.c.bf16 %v532_v58, %v523_v57 }
  0x46   : > { %v256_v61 = vld [vmem:[%s4347_s9 + $0x68] sm:$0xff]  ;;  %3947 = vmatpush1.bf16.msra.mxu1 %v3946_v53  ;;  %3933 = vmatprep.subr.bf16.mxu0 %v3932_v54  ;;  %v3952_v3 = vpack.c.bf16 %v481_v60, %v472_v59  ;;  %v258_v4 = vld [vmem:[%s4347_s9 + $0x78] sm:$0xff]  ;;  %v257_v5 = vld [vmem:[%s4347_s9 + $0x70] sm:$0xff] }
  0x47   : > { %3949 = vmatprep.subr.bf16.mxu1 %v3948_v63  ;;  %v260_v6 = vld [vmem:[%s4347_s9 + $0x88] sm:$0xff]  ;;  %v259_v7 = vld [vmem:[%s4347_s9 + $0x80] sm:$0xff]  ;;  %v266_v12 = vld [vmem:[%s4347_s9 + $0xb8] sm:$0xff] }
  0x48   : > { %3935 = vmatpush1.bf16.msra.mxu0 %v3934_v0  ;;  %v264_v10 = vld [vmem:[%s4347_s9 + $0xa8] sm:$0xff]  ;;  %v263_v11 = vld [vmem:[%s4347_s9 + $0xa0] sm:$0xff]  ;;  %v265_v13 = vld [vmem:[%s4347_s9 + $0xb0] sm:$0xff] }
  0x49   : > { %297 = vperm.xlu1 %4121, %v250_v8   ;;  %294 = vperm.xlu0 %4120, %v249_v9   ;;  %v262_v8 = vld [vmem:[%s4347_s9 + $0x98] sm:$0xff]  ;;  %v261_v9 = vld [vmem:[%s4347_s9 + $0x90] sm:$0xff]  ;;  %v272_v18 = vld [vmem:[%s4347_s9 + $0xe8] sm:$0xff] }
  0x4a   : > { %3951 = vmatpush1.bf16.msra.mxu1 %v3950_v2  ;;  %3953 = vmatprep.subr.bf16.mxu0 %v3952_v3  ;;  %v270_v16 = vld [vmem:[%s4347_s9 + $0xd8] sm:$0xff]  ;;  %v269_v17 = vld [vmem:[%s4347_s9 + $0xd0] sm:$0xff]  ;;  %v271_v19 = vld [vmem:[%s4347_s9 + $0xe0] sm:$0xff] }
  0x4b   : > { %v274_v20 = vld [vmem:[%s4347_s9 + $0xf8] sm:$0xff]  ;;  %v273_v21 = vld [vmem:[%s4347_s9 + $0xf0] sm:$0xff]  ;;  %v483_v23 = vld [vmem:[#allocation2 + $0x80] sm:$0xff] }
  0x4c   : > { %v474_v22 = vld [vmem:[#allocation2 + $0x38] sm:$0xff]  ;;  %v471_v27 = vld [vmem:[#allocation2 + $0x20] sm:$0xff]  ;;  %v480_v28 = vld [vmem:[#allocation2 + $0x68] sm:$0xff] }
  0x4d   : > { %303 = vperm.xlu1 %4121, %v252_v14   ;;  %300 = vperm.xlu0 %4120, %v251_v15   ;;  %v268_v14 = vld [vmem:[%s4347_s9 + $0xc8] sm:$0xff]  ;;  %v267_v15 = vld [vmem:[%s4347_s9 + $0xc0] sm:$0xff]  ;;  %v3968_v24 = vpack.c.bf16 %v483_v23, %v474_v22  ;;  %v490_v29 = vld [vmem:[#allocation2 + $0xb8] sm:$0xff]  ;;  %s3440_s9 = sshll.u32 %s233_s8, 4  ;;  %s6061_s9 = int_to_ptr.vmem [resolvable:$true] %s3440_s9 }
  0x4e   : > { %v499_v30 = vld [vmem:[#allocation2 + $0x100] sm:$0xff]  ;;  %v473_v31 = vld [vmem:[#allocation2 + $0x30] sm:$0xff]  ;;  %v482_v32 = vld [vmem:[#allocation2 + $0x78] sm:$0xff]  ;;  %s4152_s22 = scalar_lea.vmem %s6061_s9, 256  ;;  %p4159_p2 = scmp.lt.s32.totalorder %s6061_s9, %s4157_s16 }
  0x4f   : > { %3969 = vmatprep.subr.bf16.mxu1 %v3968_v24  ;;  %v489_v36 = vld [vmem:[#allocation2 + $0xb0] sm:$0xff]  ;;  %v498_v37 = vld [vmem:[#allocation2 + $0xf8] sm:$0xff]  ;;  %v3970_v39 = vpack.c.bf16 %v482_v32, %v473_v31  ;;  %v508_v40 = vld [vmem:[#allocation2 + $0x148] sm:$0xff]  ;;  %p4153_p6 = scmp.ne.s32.totalorder %s6061_s9, %s4152_s22  ;;  %p4160_p3 = scmp.lt.s32.totalorder %s4158_s17, %s4152_s22 }
  0x50   : > { %v492_v41 = vld [vmem:[#allocation2 + $0xc8] sm:$0xff]  ;;  %v501_v42 = vld [vmem:[#allocation2 + $0x110] sm:$0xff]  ;;  %v491_v44 = vld [vmem:[#allocation2 + $0xc0] sm:$0xff]  ;;  %v3958_v48 = vpack.c.bf16 %v498_v37, %v489_v36 }
  0x51   : > { %309 = vperm.xlu1 %4121, %v254_v34   ;;  %306 = vperm.xlu0 %4120, %v253_v35   ;;  %v3954_v34 = vpack.c.bf16 %v480_v28, %v471_v27  ;;  %v3956_v35 = vpack.c.bf16 %v499_v30, %v490_v29  ;;  %v517_v43 = vld [vmem:[#allocation2 + $0x190] sm:$0xff]  ;;  %v500_v45 = vld [vmem:[#allocation2 + $0x108] sm:$0xff]  ;;  %v507_v49 = vld [vmem:[#allocation2 + $0x140] sm:$0xff]  ;;  %v3972_v51 = vpack.c.bf16 %v501_v42, %v492_v41  ;;  %p4154_p10 = pnand %p4153_p6, %p6174_p9  ;;  %p4161_p4 = por %p4160_p3, %p4159_p2 }
  0x52   : > { %v516_v50 = vld [vmem:[#allocation2 + $0x188] sm:$0xff]  ;;  %v3960_v53 = vpack.c.bf16 %v517_v43, %v508_v40  ;;  %v3974_v54 = vpack.c.bf16 %v500_v45, %v491_v44  ;;  %v526_v55 = vld [vmem:[#allocation2 + $0x1d8] sm:$0xff]  ;;  %v519_v57 = vld [vmem:[#allocation2 + $0x1a0] sm:$0xff] }
  0x53   : > { %v510_v56 = vld [vmem:[#allocation2 + $0x158] sm:$0xff]  ;;  %v535_v58 = vld [vmem:[#allocation2 + $0x220] sm:$0xff]  ;;  %v509_v59 = vld [vmem:[#allocation2 + $0x150] sm:$0xff]  ;;  %p4155_p12 = pneg %p4154_p10 }
  0x54   : > { %v518_v60 = vld [vmem:[#allocation2 + $0x198] sm:$0xff]  ;;  %v525_v63 = vld [vmem:[#allocation2 + $0x1d0] sm:$0xff]  ;;  %v3976_v2 = vpack.c.bf16 %v519_v57, %v510_v56 }
  0x55   : > { %315 = vperm.xlu1 %4121, %v256_v61   ;;  %312 = vperm.xlu0 %4120, %v255_v62   ;;  %v3962_v62 = vpack.c.bf16 %v516_v50, %v507_v49  ;;  %v534_v0 = vld [vmem:[#allocation2 + $0x218] sm:$0xff]  ;;  %p4162_p7 = pnand %p4161_p4, %p4155_p12 }
  0x59   : > { %321 = vperm.xlu1 %4121, %v258_v4   ;;  %318 = vperm.xlu0 %4120, %v257_v5   ;;  %v3964_v4 = vpack.c.bf16 %v535_v58, %v526_v55  ;;  %v3978_v5 = vpack.c.bf16 %v518_v60, %v509_v59 }
  0x5d   : > { %327 = vperm.xlu1 %4121, %v260_v6   ;;  %324 = vperm.xlu0 %4120, %v259_v7   ;;  %v528_v6 = vld [vmem:[#allocation2 + $0x1e8] sm:$0xff]  ;;  %v537_v7 = vld [vmem:[#allocation2 + $0x230] sm:$0xff] }
  0x61   : > { %333 = vperm.xlu1 %4121, %v262_v8   ;;  %330 = vperm.xlu0 %4120, %v261_v9   ;;  %v527_v8 = vld [vmem:[#allocation2 + $0x1e0] sm:$0xff]  ;;  %v536_v9 = vld [vmem:[#allocation2 + $0x228] sm:$0xff] }
  0x65   : > { %339 = vperm.xlu1 %4121, %v264_v10   ;;  %336 = vperm.xlu0 %4120, %v263_v11   ;;  %v475_v10 = vld [vmem:[#allocation2 + $0x40] sm:$0xff]  ;;  %v484_v11 = vld [vmem:[#allocation2 + $0x88] sm:$0xff] }
  0x69   : > { %345 = vperm.xlu1 %4121, %v266_v12   ;;  %342 = vperm.xlu0 %4120, %v265_v13   ;;  %v3966_v13 = vpack.c.bf16 %v534_v0, %v525_v63 }
  0x6d   : > { %351 = vperm.xlu1 %4121, %v268_v14   ;;  %348 = vperm.xlu0 %4120, %v267_v15   ;;  %v3980_v14 = vpack.c.bf16 %v537_v7, %v528_v6 }
  0x71   : > { %357 = vperm.xlu1 %4121, %v270_v16   ;;  %354 = vperm.xlu0 %4120, %v269_v17   ;;  %v3982_v16 = vpack.c.bf16 %v536_v9, %v527_v8  ;;  %v4420_v17 = vpack.c.bf16 %v484_v11, %v475_v10 }
  0x75   : > { %363 = vperm.xlu1 %4121, %v272_v18   ;;  %360 = vperm.xlu0 %4120, %v271_v19  }
  0x79   : > { %369 = vperm.xlu1 %4121, %v274_v20   ;;  %366 = vperm.xlu0 %4120, %v273_v21  }
  0xbc   : > { %v277_v33 = vpop.permute.xlu0 %276  ;;  %v283_v46 = vpop.permute.xlu1 %282 }
  0xbd   : > { %vm371_vm1 = vcmp.eq.s32.totalorder %v277_v33, %v4382_v26  ;;  %vm373_vm2 = vcmp.eq.s32.totalorder %v283_v46, %v4382_v26 }
  0xbe   : > { %v4386_v38 = vsel %vm371_vm1, 1.0, %v6120_v1  ;;  %v4406_v61 = vsel %vm373_vm2, 1.0, %v6120_v1 }
  0xbf   : > { %3555 = vmatmul.mubr.msk.f32.vlgmr.msra.gmra.mrb[0].mxu0 %vm539_vm0, %v4386_v38  ;;  %3587 = vmatmul.mubr.msk.f32.vlgmr.msra.gmra.mrb[0].mxu1 %vm539_vm0, %v4386_v38 }
  0xc0   : > { %3955 = vmatpush1.bf16.msra.mxu0 %v3954_v34  ;;  %v280_v47 = vpop.permute.xlu0 %279  ;;  %706 = vmatprep.mubr.f32.mxu0 %v6120_v1  ;;  %v286_v3 = vpop.permute.xlu1 %285 }
  0xc1   : > { %vm372_vm3 = vcmp.eq.s32.totalorder %v280_v47, %v4382_v26  ;;  %963 = vmatprep.mubr.f32.mxu1 %v6120_v1  ;;  %3957 = vmatprep.subr.bf16.mxu0 %v3956_v35  ;;  %vm374_vm4 = vcmp.eq.s32.totalorder %v286_v3, %v4382_v26 }
  0xc2   : > { %v4397_v52 = vsel %vm372_vm3, 1.0, %v6120_v1  ;;  %3971 = vmatpush1.bf16.msra.mxu1 %v3970_v39  ;;  %v4418_v15 = vsel %vm374_vm4, 1.0, %v6120_v1 }
  0xc3   : > { %3556 = vmatmul.mubr.msk.f32.gmra.mrb[2].mxu0 %vm539_vm0, %v4397_v52  ;;  %3588 = vmatmul.mubr.msk.f32.gmra.mrb[2].mxu1 %vm539_vm0, %v4397_v52 }
  0xc4   : > { %712 = vmatprep.mubr.f32.mxu0 %v6120_v1  ;;  %969 = vmatprep.mubr.f32.mxu1 %v6120_v1  ;;  %v289_v12 = vpop.permute.xlu0 %288  ;;  %v292_v18 = vpop.permute.xlu1 %291 }
  0xc5   : > { %3959 = vmatpush1.bf16.msra.mxu0 %v3958_v48  ;;  %3973 = vmatprep.subr.bf16.mxu1 %v3972_v51  ;;  %vm375_vm5 = vcmp.eq.s32.totalorder %v289_v12, %v4382_v26  ;;  %vm376_vm6 = vcmp.eq.s32.totalorder %v292_v18, %v4382_v26  ;;  %v502_v18 = vld [vmem:[#allocation2 + $0x118] sm:$0xff] }
  0xc6   : > { %3961 = vmatprep.subr.bf16.mxu0 %v3960_v53  ;;  %3975 = vmatpush1.bf16.msra.mxu1 %v3974_v54  ;;  %v4430_v19 = vsel %vm375_vm5, 1.0, %v6120_v1  ;;  %v4441_v21 = vsel %vm376_vm6, 1.0, %v6120_v1 }
  0xc7   : > { %3557 = vmatmul.mubr.msk.f32.gmra.mrb[4].mxu0 %vm539_vm0, %v4406_v61  ;;  %3589 = vmatmul.mubr.msk.f32.gmra.mrb[4].mxu1 %vm539_vm0, %v4406_v61 }
  0xc8   : > { %718 = vmatprep.mubr.f32.mxu0 %v6120_v1  ;;  %975 = vmatprep.mubr.f32.mxu1 %v6120_v1  ;;  %v295_v20 = vpop.permute.xlu0 %294  ;;  %v298_v22 = vpop.permute.xlu1 %297 }
  0xc9   : > { %3963 = vmatpush1.bf16.msra.mxu0 %v3962_v62  ;;  %3977 = vmatprep.subr.bf16.mxu1 %v3976_v2  ;;  %vm377_vm7 = vcmp.eq.s32.totalorder %v295_v20, %v4382_v26  ;;  %vm378_vm8 = vcmp.eq.s32.totalorder %v298_v22, %v4382_v26  ;;  %v511_v20 = vld [vmem:[#allocation2 + $0x160] sm:$0xff]  ;;  %v520_v22 = vld [vmem:[#allocation2 + $0x1a8] sm:$0xff] }
  0xca   : > { %3965 = vmatprep.subr.bf16.mxu0 %v3964_v4  ;;  %3979 = vmatpush1.bf16.msra.mxu1 %v3978_v5  ;;  %v4451_v23 = vsel %vm377_vm7, 1.0, %v6120_v1  ;;  %v4461_v27 = vsel %vm378_vm8, 1.0, %v6120_v1 }
  0xcb   : > { %3558 = vmatmul.mubr.msk.f32.gmra.mrb[6].mxu0 %vm539_vm0, %v4418_v15  ;;  %3590 = vmatmul.mubr.msk.f32.gmra.mrb[6].mxu1 %vm539_vm0, %v4418_v15 }
  0xcc   : > { %724 = vmatprep.mubr.f32.mxu0 %v6120_v1  ;;  %981 = vmatprep.mubr.f32.mxu1 %v6120_v1  ;;  %v301_v24 = vpop.permute.xlu0 %300  ;;  %v304_v28 = vpop.permute.xlu1 %303 }
  0xcd   : > { %3967 = vmatpush1.bf16.msra.mxu0 %v3966_v13  ;;  %3981 = vmatprep.subr.bf16.mxu1 %v3980_v14  ;;  %vm379_vm9 = vcmp.eq.s32.totalorder %v301_v24, %v4382_v26  ;;  %vm380_vm10 = vcmp.eq.s32.totalorder %v304_v28, %v4382_v26  ;;  %v3992_v24 = vpack.c.bf16 %v520_v22, %v511_v20  ;;  %v529_v28 = vld [vmem:[#allocation2 + $0x1f0] sm:$0xff] }
  0xce   : > { %3983 = vmatpush1.bf16.msra.mxu1 %v3982_v16  ;;  %3985 = vmatprep.subr.bf16.mxu0 %v4420_v17  ;;  %v4471_v29 = vsel %vm379_vm9, 1.0, %v6120_v1  ;;  %v4481_v31 = vsel %vm380_vm10, 1.0, %v6120_v1  ;;  %v493_v16 = vld [vmem:[#allocation2 + $0xd0] sm:$0xff] }
  0xcf   : > { %3559 = vmatmul.mubr.msk.f32.gmra.mrb[8].mxu0 %vm539_vm0, %v4430_v19  ;;  %3591 = vmatmul.mubr.msk.f32.gmra.mrb[8].mxu1 %vm539_vm0, %v4430_v19 }
  0xd0   : > { %730 = vmatprep.mubr.f32.mxu0 %v6120_v1  ;;  %987 = vmatprep.mubr.f32.mxu1 %v6120_v1  ;;  %v307_v30 = vpop.permute.xlu0 %306  ;;  %v310_v32 = vpop.permute.xlu1 %309 }
  0xd1   : > { %vm381_vm11 = vcmp.eq.s32.totalorder %v307_v30, %v4382_v26  ;;  %vm382_vm12 = vcmp.eq.s32.totalorder %v310_v32, %v4382_v26  ;;  %v538_v30 = vld [vmem:[#allocation2 + $0x238] sm:$0xff] }
  0xd2   : > { %v4491_v33 = vsel %vm381_vm11, 1.0, %v6120_v1  ;;  %v4501_v35 = vsel %vm382_vm12, 1.0, %v6120_v1 }
  0xd3   : > { %3560 = vmatmul.mubr.msk.f32.gmra.mrb[10].mxu0 %vm539_vm0, %v4441_v21  ;;  %3592 = vmatmul.mubr.msk.f32.gmra.mrb[10].mxu1 %vm539_vm0, %v4441_v21 }
  0xd4   : > { %736 = vmatprep.mubr.f32.mxu0 %v6120_v1  ;;  %993 = vmatprep.mubr.f32.mxu1 %v6120_v1  ;;  %v313_v34 = vpop.permute.xlu0 %312  ;;  %v316_v36 = vpop.permute.xlu1 %315 }
  0xd5   : > { %vm383_vm13 = vcmp.eq.s32.totalorder %v313_v34, %v4382_v26  ;;  %vm384_vm14 = vcmp.eq.s32.totalorder %v316_v36, %v4382_v26 }
  0xd6   : > { %v4511_v37 = vsel %vm383_vm13, 1.0, %v6120_v1  ;;  %v4521_v40 = vsel %vm384_vm14, 1.0, %v6120_v1 }
  0xd7   : > { %3561 = vmatmul.mubr.msk.f32.gmra.mrb[12].mxu0 %vm539_vm0, %v4451_v23  ;;  %3593 = vmatmul.mubr.msk.f32.gmra.mrb[12].mxu1 %vm539_vm0, %v4451_v23 }
  0xd8   : > { %742 = vmatprep.mubr.f32.mxu0 %v6120_v1  ;;  %999 = vmatprep.mubr.f32.mxu1 %v6120_v1  ;;  %v319_v39 = vpop.permute.xlu0 %318  ;;  %v322_v41 = vpop.permute.xlu1 %321 }
  0xd9   : > { %vm385_vm15 = vcmp.eq.s32.totalorder %v319_v39, %v4382_v26  ;;  %vm386_vm1 = vcmp.eq.s32.totalorder %v322_v41, %v4382_v26  ;;  %v4845_v41 = vshrl.u32 %v241_v25, 7 }
  0xda   : > { %v4531_v42 = vsel %vm385_vm15, 1.0, %v6120_v1  ;;  %v4541_v44 = vsel %vm386_vm1, 1.0, %v6120_v1 }
  0xdb   : > { %3562 = vmatmul.mubr.msk.f32.gmra.mrb[14].mxu0 %vm539_vm0, %v4461_v27  ;;  %3594 = vmatmul.mubr.msk.f32.gmra.mrb[14].mxu1 %vm539_vm0, %v4461_v27 }
  0xdc   : > { %748 = vmatprep.mubr.f32.mxu0 %v6120_v1  ;;  %1005 = vmatprep.mubr.f32.mxu1 %v6120_v1  ;;  %v325_v43 = vpop.permute.xlu0 %324  ;;  %v328_v45 = vpop.permute.xlu1 %327 }
  0xdd   : > { %vm387_vm2 = vcmp.eq.s32.totalorder %v325_v43, %v4382_v26  ;;  %vm388_vm3 = vcmp.eq.s32.totalorder %v328_v45, %v4382_v26 }
  0xde   : > { %v4551_v46 = vsel %vm387_vm2, 1.0, %v6120_v1  ;;  %v4561_v48 = vsel %vm388_vm3, 1.0, %v6120_v1  ;;  %vm1924_vm3 = vcmp.lt.s32.totalorder %v4845_v41, 7 }
  0xdf   : > { %3563 = vmatmul.mubr.msk.f32.gmra.mrb[16].mxu0 %vm539_vm0, %v4471_v29  ;;  %3595 = vmatmul.mubr.msk.f32.gmra.mrb[16].mxu1 %vm539_vm0, %v4471_v29 }
  0xe0   : > { %754 = vmatprep.mubr.f32.mxu0 %v6120_v1  ;;  %1011 = vmatprep.mubr.f32.mxu1 %v6120_v1  ;;  %v331_v47 = vpop.permute.xlu0 %330  ;;  %v334_v49 = vpop.permute.xlu1 %333 }
  0xe1   : > { %vm389_vm4 = vcmp.eq.s32.totalorder %v331_v47, %v4382_v26  ;;  %vm390_vm5 = vcmp.eq.s32.totalorder %v334_v49, %v4382_v26 }
  0xe2   : > { %v4571_v50 = vsel %vm389_vm4, 1.0, %v6120_v1  ;;  %v4581_v53 = vsel %vm390_vm5, 1.0, %v6120_v1  ;;  %vm3132_vm5 = vcmask 1041409  }
  0xe3   : > { %3564 = vmatmul.mubr.msk.f32.gmra.mrb[18].mxu0 %vm539_vm0, %v4481_v31  ;;  %3596 = vmatmul.mubr.msk.f32.gmra.mrb[18].mxu1 %vm539_vm0, %v4481_v31 }
  0xe4   : > { %760 = vmatprep.mubr.f32.mxu0 %v6120_v1  ;;  %1017 = vmatprep.mubr.f32.mxu1 %v6120_v1  ;;  %v337_v51 = vpop.permute.xlu0 %336  ;;  %v340_v54 = vpop.permute.xlu1 %339 }
  0xe5   : > { %vm391_vm6 = vcmp.eq.s32.totalorder %v337_v51, %v4382_v26  ;;  %vm392_vm7 = vcmp.eq.s32.totalorder %v340_v54, %v4382_v26 }
  0xe6   : > { %v4591_v55 = vsel %vm391_vm6, 1.0, %v6120_v1  ;;  %v4601_v57 = vsel %vm392_vm7, 1.0, %v6120_v1  ;;  %vm3134_vm6 = vcmask 1042434   ;;  %vm3136_vm7 = vcmask 1043459  }
  0xe7   : > { %3565 = vmatmul.mubr.msk.f32.gmra.mrb[20].mxu0 %vm539_vm0, %v4491_v33  ;;  %3597 = vmatmul.mubr.msk.f32.gmra.mrb[20].mxu1 %vm539_vm0, %v4491_v33 }
  0xe8   : > { %766 = vmatprep.mubr.f32.mxu0 %v6120_v1  ;;  %1023 = vmatprep.mubr.f32.mxu1 %v6120_v1  ;;  %v343_v56 = vpop.permute.xlu0 %342  ;;  %v346_v58 = vpop.permute.xlu1 %345 }
  0xe9   : > { %vm393_vm8 = vcmp.eq.s32.totalorder %v343_v56, %v4382_v26  ;;  %vm394_vm9 = vcmp.eq.s32.totalorder %v346_v58, %v4382_v26 }
  0xea   : > { %v4611_v59 = vsel %vm393_vm8, 1.0, %v6120_v1  ;;  %v4621_v62 = vsel %vm394_vm9, 1.0, %v6120_v1  ;;  %vm3138_vm8 = vcmask 1044484   ;;  %vm3140_vm9 = vcmask 1045509  }
  0xeb   : > { %3566 = vmatmul.mubr.msk.f32.gmra.mrb[22].mxu0 %vm539_vm0, %v4501_v35  ;;  %3598 = vmatmul.mubr.msk.f32.gmra.mrb[22].mxu1 %vm539_vm0, %v4501_v35 }
  0xec   : > { %772 = vmatprep.mubr.f32.mxu0 %v6120_v1  ;;  %1029 = vmatprep.mubr.f32.mxu1 %v6120_v1  ;;  %v349_v60 = vpop.permute.xlu0 %348  ;;  %v352_v63 = vpop.permute.xlu1 %351 }
  0xed   : > { %vm395_vm10 = vcmp.eq.s32.totalorder %v349_v60, %v4382_v26  ;;  %vm396_vm11 = vcmp.eq.s32.totalorder %v352_v63, %v4382_v26 }
  0xee   : > { %v4631_v0 = vsel %vm395_vm10, 1.0, %v6120_v1  ;;  %v4641_v3 = vsel %vm396_vm11, 1.0, %v6120_v1  ;;  %vm3142_vm10 = vcmask 1046534   ;;  %vm3144_vm11 = vcmask 1047559  }
  0xef   : > { %3567 = vmatmul.mubr.msk.f32.gmra.mrb[24].mxu0 %vm539_vm0, %v4511_v37  ;;  %3599 = vmatmul.mubr.msk.f32.gmra.mrb[24].mxu1 %vm539_vm0, %v4511_v37 }
  0xf0   : > { %778 = vmatprep.mubr.f32.mxu0 %v6120_v1  ;;  %1035 = vmatprep.mubr.f32.mxu1 %v6120_v1  ;;  %v355_v2 = vpop.permute.xlu0 %354  ;;  %v358_v4 = vpop.permute.xlu1 %357 }
  0xf1   : > { %vm397_vm12 = vcmp.eq.s32.totalorder %v355_v2, %v4382_v26  ;;  %vm398_vm13 = vcmp.eq.s32.totalorder %v358_v4, %v4382_v26 }
  0xf2   : > { %v4651_v5 = vsel %vm397_vm12, 1.0, %v6120_v1  ;;  %v4661_v7 = vsel %vm398_vm13, 1.0, %v6120_v1  ;;  %vm2836_vm13 = vcmp.lt.s32.totalorder %v4845_v41, 5 }
  0xf3   : > { %3568 = vmatmul.mubr.msk.f32.gmra.mrb[26].mxu0 %vm539_vm0, %v4521_v40  ;;  %3600 = vmatmul.mubr.msk.f32.gmra.mrb[26].mxu1 %vm539_vm0, %v4521_v40 }
  0xf4   : > { %784 = vmatprep.mubr.f32.mxu0 %v6120_v1  ;;  %1041 = vmatprep.mubr.f32.mxu1 %v6120_v1  ;;  %v361_v6 = vpop.permute.xlu0 %360  ;;  %v364_v8 = vpop.permute.xlu1 %363 }
  0xf5   : > { %vm399_vm14 = vcmp.eq.s32.totalorder %v361_v6, %v4382_v26  ;;  %vm400_vm15 = vcmp.eq.s32.totalorder %v364_v8, %v4382_v26 }
  0xf6   : > { %v4671_v9 = vsel %vm399_vm14, 1.0, %v6120_v1  ;;  %v4681_v11 = vsel %vm400_vm15, 1.0, %v6120_v1 }
  0xf7   : > { %3569 = vmatmul.mubr.msk.f32.gmra.mrb[28].mxu0 %vm539_vm0, %v4531_v42  ;;  %3601 = vmatmul.mubr.msk.f32.gmra.mrb[28].mxu1 %vm539_vm0, %v4531_v42 }
  0xf8   : > { %790 = vmatprep.mubr.f32.mxu0 %v6120_v1  ;;  %1047 = vmatprep.mubr.f32.mxu1 %v6120_v1  ;;  %v367_v10 = vpop.permute.xlu0 %366  ;;  %v370_v12 = vpop.permute.xlu1 %369 }
  0xf9   : > { %vm401_vm1 = vcmp.eq.s32.totalorder %v367_v10, %v4382_v26  ;;  %vm402_vm2 = vcmp.eq.s32.totalorder %v370_v12, %v4382_v26  ;;  %v3988_v26 = vpack.c.bf16 %v502_v18, %v493_v16  ;;  %v4877_v18 = vld [vmem:[%s6111_s2] ss:$0 sm:$0xff] }
  0xfa   : > { %v4691_v13 = vsel %vm401_vm1, 1.0, %v6120_v1  ;;  %v4701_v14 = vsel %vm402_vm2, 1.0, %v6120_v1 }
  0xfb   : > { %3570 = vmatmul.mubr.msk.f32.gmra.mrb[30].mxu0 %vm539_vm0, %v4541_v44  ;;  %3602 = vmatmul.mubr.msk.f32.gmra.mrb[30].mxu1 %vm539_vm0, %v4541_v44 }
  0xfc   : > { %796 = vmatprep.mubr.f32.mxu0 %v6120_v1  ;;  %1053 = vmatprep.mubr.f32.mxu1 %v6120_v1 }
  0xff   : > { %3571 = vmatmul.mubr.msk.f32.gmra.mrb[32].mxu0 %vm539_vm0, %v4551_v46  ;;  %3603 = vmatmul.mubr.msk.f32.gmra.mrb[32].mxu1 %vm539_vm0, %v4551_v46 }
 0x100   : > { %802 = vmatprep.mubr.f32.mxu0 %v6120_v1  ;;  %1059 = vmatprep.mubr.f32.mxu1 %v6120_v1 }
 0x103   : > { %3572 = vmatmul.mubr.msk.f32.gmra.mrb[34].mxu0 %vm539_vm0, %v4561_v48  ;;  %3604 = vmatmul.mubr.msk.f32.gmra.mrb[34].mxu1 %vm539_vm0, %v4561_v48 }
 0x104   : > { %808 = vmatprep.mubr.f32.mxu0 %v6120_v1  ;;  %1065 = vmatprep.mubr.f32.mxu1 %v6120_v1 }
 0x107   : > { %3573 = vmatmul.mubr.msk.f32.gmra.mrb[36].mxu0 %vm539_vm0, %v4571_v50  ;;  %3605 = vmatmul.mubr.msk.f32.gmra.mrb[36].mxu1 %vm539_vm0, %v4571_v50 }
 0x108   : > { %814 = vmatprep.mubr.f32.mxu0 %v6120_v1  ;;  %1071 = vmatprep.mubr.f32.mxu1 %v6120_v1 }
 0x10b   : > { %3574 = vmatmul.mubr.msk.f32.gmra.mrb[38].mxu0 %vm539_vm0, %v4581_v53  ;;  %3606 = vmatmul.mubr.msk.f32.gmra.mrb[38].mxu1 %vm539_vm0, %v4581_v53 }
 0x10c   : > { %820 = vmatprep.mubr.f32.mxu0 %v6120_v1  ;;  %1077 = vmatprep.mubr.f32.mxu1 %v6120_v1 }
 0x10f   : > { %3575 = vmatmul.mubr.msk.f32.gmra.mrb[40].mxu0 %vm539_vm0, %v4591_v55  ;;  %3607 = vmatmul.mubr.msk.f32.gmra.mrb[40].mxu1 %vm539_vm0, %v4591_v55 }
 0x110   : > { %826 = vmatprep.mubr.f32.mxu0 %v6120_v1  ;;  %1083 = vmatprep.mubr.f32.mxu1 %v6120_v1 }
 0x113   : > { %3576 = vmatmul.mubr.msk.f32.gmra.mrb[42].mxu0 %vm539_vm0, %v4601_v57  ;;  %3608 = vmatmul.mubr.msk.f32.gmra.mrb[42].mxu1 %vm539_vm0, %v4601_v57 }
 0x114   : > { %832 = vmatprep.mubr.f32.mxu0 %v6120_v1  ;;  %1089 = vmatprep.mubr.f32.mxu1 %v6120_v1 }
 0x117   : > { %3577 = vmatmul.mubr.msk.f32.gmra.mrb[44].mxu0 %vm539_vm0, %v4611_v59  ;;  %3609 = vmatmul.mubr.msk.f32.gmra.mrb[44].mxu1 %vm539_vm0, %v4611_v59 }
 0x118   : > { %838 = vmatprep.mubr.f32.mxu0 %v6120_v1  ;;  %1095 = vmatprep.mubr.f32.mxu1 %v6120_v1 }
 0x11b   : > { %3578 = vmatmul.mubr.msk.f32.gmra.mrb[46].mxu0 %vm539_vm0, %v4621_v62  ;;  %3610 = vmatmul.mubr.msk.f32.gmra.mrb[46].mxu1 %vm539_vm0, %v4621_v62 }
 0x11c   : > { %844 = vmatprep.mubr.f32.mxu0 %v6120_v1  ;;  %1101 = vmatprep.mubr.f32.mxu1 %v6120_v1 }
 0x11f   : > { %3579 = vmatmul.mubr.msk.f32.gmra.mrb[48].mxu0 %vm539_vm0, %v4631_v0  ;;  %3611 = vmatmul.mubr.msk.f32.gmra.mrb[48].mxu1 %vm539_vm0, %v4631_v0 }
 0x120   : > { %850 = vmatprep.mubr.f32.mxu0 %v6120_v1  ;;  %1107 = vmatprep.mubr.f32.mxu1 %v6120_v1 }
 0x123   : > { %3580 = vmatmul.mubr.msk.f32.gmra.mrb[50].mxu0 %vm539_vm0, %v4641_v3  ;;  %3612 = vmatmul.mubr.msk.f32.gmra.mrb[50].mxu1 %vm539_vm0, %v4641_v3 }
 0x124   : > { %856 = vmatprep.mubr.f32.mxu0 %v6120_v1  ;;  %1113 = vmatprep.mubr.f32.mxu1 %v6120_v1 }
 0x127   : > { %3581 = vmatmul.mubr.msk.f32.gmra.mrb[52].mxu0 %vm539_vm0, %v4651_v5  ;;  %3613 = vmatmul.mubr.msk.f32.gmra.mrb[52].mxu1 %vm539_vm0, %v4651_v5 }
 0x128   : > { %862 = vmatprep.mubr.f32.mxu0 %v6120_v1  ;;  %1119 = vmatprep.mubr.f32.mxu1 %v6120_v1 }
 0x12b   : > { %3582 = vmatmul.mubr.msk.f32.gmra.mrb[54].mxu0 %vm539_vm0, %v4661_v7  ;;  %3614 = vmatmul.mubr.msk.f32.gmra.mrb[54].mxu1 %vm539_vm0, %v4661_v7 }
 0x12c   : > { %868 = vmatprep.mubr.f32.mxu0 %v6120_v1  ;;  %1125 = vmatprep.mubr.f32.mxu1 %v6120_v1 }
 0x12f   : > { %3583 = vmatmul.mubr.msk.f32.gmra.mrb[56].mxu0 %vm539_vm0, %v4671_v9  ;;  %3615 = vmatmul.mubr.msk.f32.gmra.mrb[56].mxu1 %vm539_vm0, %v4671_v9 }
 0x130   : > { %874 = vmatprep.mubr.f32.mxu0 %v6120_v1  ;;  %1131 = vmatprep.mubr.f32.mxu1 %v6120_v1 }
 0x133   : > { %3584 = vmatmul.mubr.msk.f32.gmra.mrb[58].mxu0 %vm539_vm0, %v4681_v11  ;;  %3616 = vmatmul.mubr.msk.f32.gmra.mrb[58].mxu1 %vm539_vm0, %v4681_v11 }
 0x134   : > { %880 = vmatprep.mubr.f32.mxu0 %v6120_v1  ;;  %1137 = vmatprep.mubr.f32.mxu1 %v6120_v1 }
 0x137   : > { %3585 = vmatmul.mubr.msk.f32.gmra.mrb[60].mxu0 %vm539_vm0, %v4691_v13  ;;  %3617 = vmatmul.mubr.msk.f32.gmra.mrb[60].mxu1 %vm539_vm0, %v4691_v13 }
 0x138   : > { %886 = vmatprep.mubr.f32.mxu0 %v6120_v1  ;;  %1143 = vmatprep.mubr.f32.mxu1 %v6120_v1 }
 0x13b   : > { %3586 = vmatmul.mubr.msk.f32.gmra.mrb[62].mxu0 %vm539_vm0, %v4701_v14  ;;  %3618 = vmatmul.mubr.msk.f32.gmra.mrb[62].mxu1 %vm539_vm0, %v4701_v14 }
 0x13c   : > { %1214 = vmatprep.mubr.f32.mxu0 %v6120_v1  ;;  %1471 = vmatprep.mubr.f32.mxu1 %v6120_v1 }
 0x13f   : > { %3619 = vmatmul.mubr.msk.f32.vlgmr.msra.gmra.mrb[64].mxu0 %vm539_vm0, %v4386_v38  ;;  %3651 = vmatmul.mubr.msk.f32.vlgmr.msra.gmra.mrb[64].mxu1 %vm539_vm0, %v4386_v38 }
 0x140   : > { %3987 = vmatpush3.bf16.msra.mxu0 %v4420_v17  ;;  %1220 = vmatprep.mubr.f32.mxu0 %v6120_v1  ;;  %v3996_v17 = vpack.c.bf16 %v538_v30, %v529_v28 }
 0x141   : > { %1477 = vmatprep.mubr.f32.mxu1 %v6120_v1  ;;  %3989 = vmatprep.subr.bf16.mxu0 %v3988_v26 }
 0x143   : > { %3620 = vmatmul.mubr.msk.f32.gmra.mrb[66].mxu0 %vm539_vm0, %v4397_v52  ;;  %3652 = vmatmul.mubr.msk.f32.gmra.mrb[66].mxu1 %vm539_vm0, %v4397_v52 }
 0x144   : > { %1226 = vmatprep.mubr.f32.mxu0 %v6120_v1  ;;  %1483 = vmatprep.mubr.f32.mxu1 %v6120_v1 }
 0x145   : > { %3991 = vmatpush3.bf16.msra.mxu0 %v3988_v26  ;;  %v4880_v26 = vadd.s32 8, %v4845_v41 }
 0x146   : > { %3993 = vmatprep.subr.bf16.mxu0 %v3992_v24 }
 0x147   : > { %3621 = vmatmul.mubr.msk.f32.gmra.mrb[68].mxu0 %vm539_vm0, %v4406_v61  ;;  %3653 = vmatmul.mubr.msk.f32.gmra.mrb[68].mxu1 %vm539_vm0, %v4406_v61  ;;  %vm2059_vm4 = vcmp.lt.s32.totalorder %v4880_v26, 15  ;;  %vm2467_vm12 = vcmp.lt.s32.totalorder %v4880_v26, 14  ;;  %vm2971_vm14 = vcmp.lt.s32.totalorder %v4880_v26, 13 }
 0x148   : > { %1232 = vmatprep.mubr.f32.mxu0 %v6120_v1  ;;  %1489 = vmatprep.mubr.f32.mxu1 %v6120_v1 }
 0x149   : > { %3995 = vmatpush3.bf16.msra.mxu0 %v3992_v24 }
 0x14a   : > { %3997 = vmatprep.subr.bf16.mxu0 %v3996_v17 }
 0x14b   : > { %3622 = vmatmul.mubr.msk.f32.gmra.mrb[70].mxu0 %vm539_vm0, %v4418_v15  ;;  %3654 = vmatmul.mubr.msk.f32.gmra.mrb[70].mxu1 %vm539_vm0, %v4418_v15 }
 0x14c   : > { %1238 = vmatprep.mubr.f32.mxu0 %v6120_v1  ;;  %1495 = vmatprep.mubr.f32.mxu1 %v6120_v1 }
 0x14d   : > { %3999 = vmatpush3.bf16.msra.mxu0 %v3996_v17 }
 0x14f   : > { %3623 = vmatmul.mubr.msk.f32.gmra.mrb[72].mxu0 %vm539_vm0, %v4430_v19  ;;  %3655 = vmatmul.mubr.msk.f32.gmra.mrb[72].mxu1 %vm539_vm0, %v4430_v19 }
 0x150   : > { %1244 = vmatprep.mubr.f32.mxu0 %v6120_v1  ;;  %1501 = vmatprep.mubr.f32.mxu1 %v6120_v1 }
 0x153   : > { %3624 = vmatmul.mubr.msk.f32.gmra.mrb[74].mxu0 %vm539_vm0, %v4441_v21  ;;  %3656 = vmatmul.mubr.msk.f32.gmra.mrb[74].mxu1 %vm539_vm0, %v4441_v21 }
 0x154   : > { %1250 = vmatprep.mubr.f32.mxu0 %v6120_v1  ;;  %1507 = vmatprep.mubr.f32.mxu1 %v6120_v1 }
 0x157   : > { %3625 = vmatmul.mubr.msk.f32.gmra.mrb[76].mxu0 %vm539_vm0, %v4451_v23  ;;  %3657 = vmatmul.mubr.msk.f32.gmra.mrb[76].mxu1 %vm539_vm0, %v4451_v23 }
 0x158   : > { %1256 = vmatprep.mubr.f32.mxu0 %v6120_v1  ;;  %1513 = vmatprep.mubr.f32.mxu1 %v6120_v1 }
 0x15b   : > { %3626 = vmatmul.mubr.msk.f32.gmra.mrb[78].mxu0 %vm539_vm0, %v4461_v27  ;;  %3658 = vmatmul.mubr.msk.f32.gmra.mrb[78].mxu1 %vm539_vm0, %v4461_v27 }
 0x15c   : > { %1262 = vmatprep.mubr.f32.mxu0 %v6120_v1  ;;  %1519 = vmatprep.mubr.f32.mxu1 %v6120_v1 }
 0x15f   : > { %3627 = vmatmul.mubr.msk.f32.gmra.mrb[80].mxu0 %vm539_vm0, %v4471_v29  ;;  %3659 = vmatmul.mubr.msk.f32.gmra.mrb[80].mxu1 %vm539_vm0, %v4471_v29 }
 0x160   : > { %1268 = vmatprep.mubr.f32.mxu0 %v6120_v1  ;;  %1525 = vmatprep.mubr.f32.mxu1 %v6120_v1 }
 0x163   : > { %3628 = vmatmul.mubr.msk.f32.gmra.mrb[82].mxu0 %vm539_vm0, %v4481_v31  ;;  %3660 = vmatmul.mubr.msk.f32.gmra.mrb[82].mxu1 %vm539_vm0, %v4481_v31 }
 0x164   : > { %1274 = vmatprep.mubr.f32.mxu0 %v6120_v1  ;;  %1531 = vmatprep.mubr.f32.mxu1 %v6120_v1 }
 0x167   : > { %3629 = vmatmul.mubr.msk.f32.gmra.mrb[84].mxu0 %vm539_vm0, %v4491_v33  ;;  %3661 = vmatmul.mubr.msk.f32.gmra.mrb[84].mxu1 %vm539_vm0, %v4491_v33 }
 0x168   : > { %1280 = vmatprep.mubr.f32.mxu0 %v6120_v1  ;;  %1537 = vmatprep.mubr.f32.mxu1 %v6120_v1 }
 0x16b   : > { %3630 = vmatmul.mubr.msk.f32.gmra.mrb[86].mxu0 %vm539_vm0, %v4501_v35  ;;  %3662 = vmatmul.mubr.msk.f32.gmra.mrb[86].mxu1 %vm539_vm0, %v4501_v35 }
 0x16c   : > { %1286 = vmatprep.mubr.f32.mxu0 %v6120_v1  ;;  %1543 = vmatprep.mubr.f32.mxu1 %v6120_v1 }
 0x16f   : > { %3631 = vmatmul.mubr.msk.f32.gmra.mrb[88].mxu0 %vm539_vm0, %v4511_v37  ;;  %3663 = vmatmul.mubr.msk.f32.gmra.mrb[88].mxu1 %vm539_vm0, %v4511_v37 }
 0x170   : > { %1292 = vmatprep.mubr.f32.mxu0 %v6120_v1  ;;  %1549 = vmatprep.mubr.f32.mxu1 %v6120_v1 }
 0x173   : > { %3632 = vmatmul.mubr.msk.f32.gmra.mrb[90].mxu0 %vm539_vm0, %v4521_v40  ;;  %3664 = vmatmul.mubr.msk.f32.gmra.mrb[90].mxu1 %vm539_vm0, %v4521_v40 }
 0x174   : > { %1298 = vmatprep.mubr.f32.mxu0 %v6120_v1  ;;  %1555 = vmatprep.mubr.f32.mxu1 %v6120_v1 }
 0x177   : > { %3633 = vmatmul.mubr.msk.f32.gmra.mrb[92].mxu0 %vm539_vm0, %v4531_v42  ;;  %3665 = vmatmul.mubr.msk.f32.gmra.mrb[92].mxu1 %vm539_vm0, %v4531_v42 }
 0x178   : > { %1304 = vmatprep.mubr.f32.mxu0 %v6120_v1  ;;  %1561 = vmatprep.mubr.f32.mxu1 %v6120_v1 }
 0x17b   : > { %3634 = vmatmul.mubr.msk.f32.gmra.mrb[94].mxu0 %vm539_vm0, %v4541_v44  ;;  %3666 = vmatmul.mubr.msk.f32.gmra.mrb[94].mxu1 %vm539_vm0, %v4541_v44 }
 0x17c   : > { %1310 = vmatprep.mubr.f32.mxu0 %v6120_v1  ;;  %1567 = vmatprep.mubr.f32.mxu1 %v6120_v1 }
 0x17f   : > { %3635 = vmatmul.mubr.msk.f32.gmra.mrb[96].mxu0 %vm539_vm0, %v4551_v46  ;;  %3667 = vmatmul.mubr.msk.f32.gmra.mrb[96].mxu1 %vm539_vm0, %v4551_v46 }
 0x180   : > { %1316 = vmatprep.mubr.f32.mxu0 %v6120_v1  ;;  %1573 = vmatprep.mubr.f32.mxu1 %v6120_v1 }
 0x183   : > { %3636 = vmatmul.mubr.msk.f32.gmra.mrb[98].mxu0 %vm539_vm0, %v4561_v48  ;;  %3668 = vmatmul.mubr.msk.f32.gmra.mrb[98].mxu1 %vm539_vm0, %v4561_v48 }
 0x184   : > { %1322 = vmatprep.mubr.f32.mxu0 %v6120_v1  ;;  %1579 = vmatprep.mubr.f32.mxu1 %v6120_v1 }
 0x187   : > { %3637 = vmatmul.mubr.msk.f32.gmra.mrb[100].mxu0 %vm539_vm0, %v4571_v50  ;;  %3669 = vmatmul.mubr.msk.f32.gmra.mrb[100].mxu1 %vm539_vm0, %v4571_v50 }
 0x188   : > { %1328 = vmatprep.mubr.f32.mxu0 %v6120_v1  ;;  %1585 = vmatprep.mubr.f32.mxu1 %v6120_v1 }
 0x18b   : > { %3638 = vmatmul.mubr.msk.f32.gmra.mrb[102].mxu0 %vm539_vm0, %v4581_v53  ;;  %3670 = vmatmul.mubr.msk.f32.gmra.mrb[102].mxu1 %vm539_vm0, %v4581_v53 }
 0x18c   : > { %1334 = vmatprep.mubr.f32.mxu0 %v6120_v1  ;;  %1591 = vmatprep.mubr.f32.mxu1 %v6120_v1 }
 0x18f   : > { %3639 = vmatmul.mubr.msk.f32.gmra.mrb[104].mxu0 %vm539_vm0, %v4591_v55  ;;  %3671 = vmatmul.mubr.msk.f32.gmra.mrb[104].mxu1 %vm539_vm0, %v4591_v55 }
 0x190   : > { %1340 = vmatprep.mubr.f32.mxu0 %v6120_v1  ;;  %1597 = vmatprep.mubr.f32.mxu1 %v6120_v1 }
 0x192   : > { %v702_v32 = vpop.f32.mrb[0].mxu0  ;;  %v959_v34 = vpop.f32.mrb[0].mxu1 }
 0x193   : > { %v4836_v36 = vpop.f32.mrb[1].mxu0  ;;  %v4838_v39 = vpop.f32.mrb[1].mxu1  ;;  %3640 = vmatmul.mubr.msk.f32.gmra.mrb[106].mxu0 %vm539_vm0, %v4601_v57  ;;  %3672 = vmatmul.mubr.msk.f32.gmra.mrb[106].mxu1 %vm539_vm0, %v4601_v57 }
 0x194   : > { %6134 = vst [vmem:[#allocation8_spill] sm:$0xff] %v4836_v36  ;;  %6135 = vst [vmem:[#allocation9_spill] sm:$0xff] %v4838_v39  ;;  %1346 = vmatprep.mubr.f32.mxu0 %v6120_v1  ;;  %1603 = vmatprep.mubr.f32.mxu1 %v6120_v1  ;;  %v6119_v51 = vrot.slane %v4836_v36, 1  ;;  %v6118_v25 = vrot.slane %v4838_v39, 1 }
 0x196   : > { %v708_v43 = vpop.f32.mrb[2].mxu0  ;;  %v965_v45 = vpop.f32.mrb[2].mxu1 }
 0x197   : > { %v710_v47 = vpop.f32.mrb[3].mxu0  ;;  %v967_v49 = vpop.f32.mrb[3].mxu1  ;;  %3641 = vmatmul.mubr.msk.f32.gmra.mrb[108].mxu0 %vm539_vm0, %v4611_v59  ;;  %3673 = vmatmul.mubr.msk.f32.gmra.mrb[108].mxu1 %vm539_vm0, %v4611_v59 }
 0x198   : > { %v1893_v54 = vrot.slane %v710_v47, 1  ;;  %v2205_v56 = vrot.slane %v967_v49, 1  ;;  %1352 = vmatprep.mubr.f32.mxu0 %v6120_v1  ;;  %1609 = vmatprep.mubr.f32.mxu1 %v6120_v1 }
 0x19a   : > { %v1955_v58 = vsel %vm1924_vm3, %v6119_v51, %v1893_v54  ;;  %v2266_v60 = vsel %vm1924_vm3, %v6118_v25, %v2205_v56  ;;  %v714_v63 = vpop.f32.mrb[4].mxu0  ;;  %v971_v2 = vpop.f32.mrb[4].mxu1 }
 0x19b   : > { %v1957_v4 = vadd.f32 %v1955_v58, %v702_v32  ;;  %v4866_v6 = vadd.f32 %v2266_v60, %v959_v34  ;;  %v716_v8 = vpop.f32.mrb[5].mxu0  ;;  %v973_v10 = vpop.f32.mrb[5].mxu1  ;;  %3642 = vmatmul.mubr.msk.f32.gmra.mrb[110].mxu0 %vm539_vm0, %v4621_v62  ;;  %3674 = vmatmul.mubr.msk.f32.gmra.mrb[110].mxu1 %vm539_vm0, %v4621_v62 }
 0x19c   : > { %v1894_v12 = vrot.slane %v716_v8, 1  ;;  %v2206_v16 = vrot.slane %v973_v10, 1  ;;  %1358 = vmatprep.mubr.f32.mxu0 %v6120_v1  ;;  %1615 = vmatprep.mubr.f32.mxu1 %v6120_v1 }
 0x19d   : > { %6136 = vst [vmem:[#allocation10_spill] sm:$0xff] %v4866_v6  ;;  %v1994_v47 = vadd.f32 %v4877_v18, %v1957_v4 }
 0x19e   : > { %v1954_v20 = vsel %vm1924_vm3, %v1893_v54, %v1894_v12  ;;  %v2265_v22 = vsel %vm1924_vm3, %v2205_v56, %v2206_v16  ;;  %v720_v24 = vpop.f32.mrb[6].mxu0  ;;  %v977_v28 = vpop.f32.mrb[6].mxu1 }
 0x19f   : > { %v1958_v30 = vadd.f32 %v1954_v20, %v708_v43  ;;  %v4886_v17 = vadd.f32 %v2265_v22, %v965_v45  ;;  %v722_v32 = vpop.f32.mrb[7].mxu0  ;;  %v979_v34 = vpop.f32.mrb[7].mxu1  ;;  %3643 = vmatmul.mubr.msk.f32.gmra.mrb[112].mxu0 %vm539_vm0, %v4631_v0  ;;  %3675 = vmatmul.mubr.msk.f32.gmra.mrb[112].mxu1 %vm539_vm0, %v4631_v0 }
 0x1a0   : > { %v1895_v49 = vrot.slane %v722_v32, 1  ;;  %v2207_v54 = vrot.slane %v979_v34, 1  ;;  %1364 = vmatprep.mubr.f32.mxu0 %v6120_v1  ;;  %1621 = vmatprep.mubr.f32.mxu1 %v6120_v1 }
 0x1a1   : > { %6137 = vst [vmem:[#allocation11_spill] sm:$0xff] %v4886_v17  ;;  %v1995_v43 = vadd.f32 %v4877_v18, %v1958_v30  ;;  %v2026_v30 = vmax.f32 %v1994_v47, 0.0 }
 0x1a2   : > { %v1953_v45 = vsel %vm1924_vm3, %v1894_v12, %v1895_v49  ;;  %v2264_v56 = vsel %vm1924_vm3, %v2206_v16, %v2207_v54  ;;  %v726_v58 = vpop.f32.mrb[8].mxu0  ;;  %v983_v60 = vpop.f32.mrb[8].mxu1 }
 0x1a3   : > { %v2027_v8 = vmax.f32 %v1995_v43, 0.0  ;;  %v1959_v4 = vadd.f32 %v1953_v45, %v714_v63  ;;  %v4901_v10 = vadd.f32 %v2264_v56, %v971_v2  ;;  %v728_v20 = vpop.f32.mrb[9].mxu0  ;;  %v985_v22 = vpop.f32.mrb[9].mxu1  ;;  %3644 = vmatmul.mubr.msk.f32.gmra.mrb[114].mxu0 %vm539_vm0, %v4641_v3  ;;  %3676 = vmatmul.mubr.msk.f32.gmra.mrb[114].mxu1 %vm539_vm0, %v4641_v3 }
 0x1a4   : > { %v1896_v32 = vrot.slane %v728_v20, 1  ;;  %v2208_v12 = vrot.slane %v985_v22, 1  ;;  %1370 = vmatprep.mubr.f32.mxu0 %v6120_v1  ;;  %1627 = vmatprep.mubr.f32.mxu1 %v6120_v1 }
 0x1a5   : > { %6138 = vst [vmem:[#allocation12_spill] sm:$0xff] %v4901_v10  ;;  %v2061_v63 = vsel %vm2059_vm4, %v2027_v8, 0.0 }
 0x1a6   : > { %v2092_v2 = vmax.f32 %v2026_v30, %v2061_v63  ;;  %v1952_v16 = vsel %vm1924_vm3, %v1895_v49, %v1896_v32  ;;  %v2263_v34 = vsel %vm1924_vm3, %v2207_v54, %v2208_v12  ;;  %v732_v43 = vpop.f32.mrb[10].mxu0  ;;  %v989_v45 = vpop.f32.mrb[10].mxu1  ;;  %v1996_v30 = vadd.f32 %v4877_v18, %v1959_v4 }
 0x1a7   : > { %v1960_v56 = vadd.f32 %v1952_v16, %v720_v24  ;;  %v4915_v47 = vadd.f32 %v2263_v34, %v977_v28  ;;  %v734_v20 = vpop.f32.mrb[11].mxu0  ;;  %v991_v22 = vpop.f32.mrb[11].mxu1  ;;  %3645 = vmatmul.mubr.msk.f32.gmra.mrb[116].mxu0 %vm539_vm0, %v4651_v5  ;;  %3677 = vmatmul.mubr.msk.f32.gmra.mrb[116].mxu1 %vm539_vm0, %v4651_v5 }
 0x1a8   : > { %v2093_v8 = vrot.slane %v2092_v2, 4  ;;  %v1897_v49 = vrot.slane %v734_v20, 1  ;;  %v2209_v63 = vrot.slane %v991_v22, 1  ;;  %1376 = vmatprep.mubr.f32.mxu0 %v6120_v1  ;;  %1633 = vmatprep.mubr.f32.mxu1 %v6120_v1 }
 0x1a9   : > { %6139 = vst [vmem:[#allocation13_spill] sm:$0xff] %v4915_v47  ;;  %v1997_v24 = vadd.f32 %v4877_v18, %v1960_v56 }
 0x1aa   : > { %v2094_v28 = vmax.f32 %v2092_v2, %v2093_v8  ;;  %v1951_v54 = vsel %vm1924_vm3, %v1896_v32, %v1897_v49  ;;  %v2262_v16 = vsel %vm1924_vm3, %v2208_v12, %v2209_v63  ;;  %v738_v34 = vpop.f32.mrb[12].mxu0  ;;  %v995_v25 = vpop.f32.mrb[12].mxu1  ;;  %v2028_v2 = vmax.f32 %v1996_v30, 0.0 }
 0x1ab   : > { %v2029_v51 = vmax.f32 %v1997_v24, 0.0  ;;  %v1961_v47 = vadd.f32 %v1951_v54, %v726_v58  ;;  %v4929_v4 = vadd.f32 %v2262_v16, %v983_v60  ;;  %v740_v20 = vpop.f32.mrb[13].mxu0  ;;  %v997_v22 = vpop.f32.mrb[13].mxu1  ;;  %3646 = vmatmul.mubr.msk.f32.gmra.mrb[118].mxu0 %vm539_vm0, %v4661_v7  ;;  %3678 = vmatmul.mubr.msk.f32.gmra.mrb[118].mxu1 %vm539_vm0, %v4661_v7 }
 0x1ac   : > { %v1898_v56 = vrot.slane %v740_v20, 1  ;;  %v2210_v32 = vrot.slane %v997_v22, 1  ;;  %1382 = vmatprep.mubr.f32.mxu0 %v6120_v1  ;;  %1639 = vmatprep.mubr.f32.mxu1 %v6120_v1  ;;  %v2095_v12 = vrot.slane %v2094_v28, 2 }
 0x1ad   : > { %6140 = vst [vmem:[#allocation14_spill] sm:$0xff] %v4929_v4  ;;  %v2063_v58 = vsel %vm2059_vm4, %v2029_v51, 0.0 }
 0x1ae   : > { %v2099_v60 = vmax.f32 %v2028_v2, %v2063_v58  ;;  %v1950_v8 = vsel %vm1924_vm3, %v1897_v49, %v1898_v56  ;;  %v2261_v24 = vsel %vm1924_vm3, %v2209_v63, %v2210_v32  ;;  %v744_v54 = vpop.f32.mrb[14].mxu0  ;;  %v1001_v16 = vpop.f32.mrb[14].mxu1  ;;  %v1998_v2 = vadd.f32 %v4877_v18, %v1961_v47 }
 0x1af   : > { %v1962_v30 = vadd.f32 %v1950_v8, %v732_v43  ;;  %v4943_v20 = vadd.f32 %v2261_v24, %v989_v45  ;;  %v746_v22 = vpop.f32.mrb[15].mxu0  ;;  %v1003_v4 = vpop.f32.mrb[15].mxu1  ;;  %3647 = vmatmul.mubr.msk.f32.gmra.mrb[120].mxu0 %vm539_vm0, %v4671_v9  ;;  %3679 = vmatmul.mubr.msk.f32.gmra.mrb[120].mxu1 %vm539_vm0, %v4671_v9  ;;  %v2096_v43 = vmax.f32 %v2094_v28, %v2095_v12 }
 0x1b0   : > { %v2100_v51 = vrot.slane %v2099_v60, 4  ;;  %v1899_v49 = vrot.slane %v746_v22, 1  ;;  %v2211_v58 = vrot.slane %v1003_v4, 1  ;;  %1388 = vmatprep.mubr.f32.mxu0 %v6120_v1  ;;  %1645 = vmatprep.mubr.f32.mxu1 %v6120_v1  ;;  %v2030_v12 = vmax.f32 %v1998_v2, 0.0 }
 0x1b1   : > { %6141 = vst [vmem:[#allocation15_spill] sm:$0xff] %v4943_v20  ;;  %v1999_v45 = vadd.f32 %v4877_v18, %v1962_v30 }
 0x1b2   : > { %v2101_v63 = vmax.f32 %v2099_v60, %v2100_v51  ;;  %v1949_v8 = vsel %vm1924_vm3, %v1898_v56, %v1899_v49  ;;  %v2260_v24 = vsel %vm1924_vm3, %v2210_v32, %v2211_v58  ;;  %v750_v20 = vpop.f32.mrb[16].mxu0  ;;  %v1007_v10 = vpop.f32.mrb[16].mxu1  ;;  %v2097_v32 = vrot.slane %v2096_v43, 1 }
 0x1b3   : > { %v2031_v17 = vmax.f32 %v1999_v45, 0.0  ;;  %v1963_v47 = vadd.f32 %v1949_v8, %v738_v34  ;;  %v4957_v22 = vadd.f32 %v2260_v24, %v995_v25  ;;  %v752_v4 = vpop.f32.mrb[17].mxu0  ;;  %v1009_v6 = vpop.f32.mrb[17].mxu1  ;;  %3648 = vmatmul.mubr.msk.f32.gmra.mrb[122].mxu0 %vm539_vm0, %v4681_v11  ;;  %3680 = vmatmul.mubr.msk.f32.gmra.mrb[122].mxu1 %vm539_vm0, %v4681_v11 }
 0x1b4   : > { %v2102_v28 = vrot.slane %v2101_v63, 2  ;;  %v1900_v56 = vrot.slane %v752_v4, 1  ;;  %v2212_v60 = vrot.slane %v1009_v6, 1  ;;  %1394 = vmatprep.mubr.f32.mxu0 %v6120_v1  ;;  %1651 = vmatprep.mubr.f32.mxu1 %v6120_v1 }
 0x1b5   : > { %6142 = vst [vmem:[#allocation16_spill] sm:$0xff] %v4957_v22  ;;  %v2065_v25 = vsel %vm2059_vm4, %v2031_v17, 0.0  ;;  %v2000_v6 = vadd.f32 %v4877_v18, %v1963_v47  ;;  %v2098_v47 = vmax.f32 %v2096_v43, %v2097_v32 }
 0x1b6   : > { %v2103_v34 = vmax.f32 %v2101_v63, %v2102_v28  ;;  %v2106_v30 = vmax.f32 %v2030_v12, %v2065_v25  ;;  %v1948_v51 = vsel %vm1924_vm3, %v1899_v49, %v1900_v56  ;;  %v2259_v45 = vsel %vm1924_vm3, %v2211_v58, %v2212_v60  ;;  %v756_v8 = vpop.f32.mrb[18].mxu0  ;;  %v1013_v2 = vpop.f32.mrb[18].mxu1 }
 0x1b7   : > { %v1964_v24 = vadd.f32 %v1948_v51, %v744_v54  ;;  %v4972_v4 = vadd.f32 %v2259_v45, %v1001_v16  ;;  %v758_v1 = vpop.f32.mrb[19].mxu0  ;;  %v1015_v22 = vpop.f32.mrb[19].mxu1  ;;  %3649 = vmatmul.mubr.msk.f32.gmra.mrb[124].mxu0 %vm539_vm0, %v4691_v13  ;;  %3681 = vmatmul.mubr.msk.f32.gmra.mrb[124].mxu1 %vm539_vm0, %v4691_v13  ;;  %v6144_v58 = vmov 0.0  }
 0x1b8   : > { %v2104_v17 = vrot.slane %v2103_v34, 1  ;;  %v2107_v49 = vrot.slane %v2106_v30, 4  ;;  %v1901_v63 = vrot.slane %v758_v1, 1  ;;  %v2213_v28 = vrot.slane %v1015_v22, 1  ;;  %1400 = vmatprep.mubr.f32.mxu0 %v6144_v58  ;;  %1657 = vmatprep.mubr.f32.mxu1 %v6144_v58 }
 0x1b9   : > { %6143 = vst [vmem:[#allocation17_spill] sm:$0xff] %v4972_v4  ;;  %v2001_v54 = vadd.f32 %v4877_v18, %v1964_v24  ;;  %v2032_v1 = vmax.f32 %v2000_v6, 0.0 }
 0x1ba   : > { %v2105_v16 = vmax.f32 %v2103_v34, %v2104_v17  ;;  %v2108_v12 = vmax.f32 %v2106_v30, %v2107_v49  ;;  %v1947_v25 = vsel %vm1924_vm3, %v1900_v56, %v1901_v63  ;;  %v2258_v51 = vsel %vm1924_vm3, %v2212_v60, %v2213_v28  ;;  %v762_v45 = vpop.f32.mrb[20].mxu0  ;;  %v1019_v4 = vpop.f32.mrb[20].mxu1 }
 0x1bb   : > { %v2033_v22 = vmax.f32 %v2001_v54, 0.0  ;;  %v1965_v39 = vadd.f32 %v1947_v25, %v750_v20  ;;  %v4985_v36 = vadd.f32 %v2258_v51, %v1007_v10  ;;  %v764_v58 = vpop.f32.mrb[21].mxu0  ;;  %v1021_v43 = vpop.f32.mrb[21].mxu1  ;;  %3650 = vmatmul.mubr.msk.f32.gmra.mrb[126].mxu0 %vm539_vm0, %v4701_v14  ;;  %3682 = vmatmul.mubr.msk.f32.gmra.mrb[126].mxu1 %vm539_vm0, %v4701_v14 }
 0x1bc   : > { %v2109_v32 = vrot.slane %v2108_v12, 2  ;;  %v1902_v56 = vrot.slane %v764_v58, 1  ;;  %v2214_v34 = vrot.slane %v1021_v43, 1  ;;  %3837 = vmatprep.mubr.msk.f32.mxu0 %vm539_vm0, %v4386_v38  ;;  %v3133_v60 = vsel %vm3132_vm5, %v2105_v16, %v2098_v47 }
 0x1bd   : > { %v2067_v10 = vsel %vm2059_vm4, %v2033_v22, 0.0  ;;  %v2002_v54 = vadd.f32 %v4877_v18, %v1965_v39 }
 0x1be   : > { %v2110_v20 = vmax.f32 %v2108_v12, %v2109_v32  ;;  %v2113_v30 = vmax.f32 %v2032_v1, %v2067_v10  ;;  %v1946_v6 = vsel %vm1924_vm3, %v1901_v63, %v1902_v56  ;;  %v2257_v24 = vsel %vm1924_vm3, %v2213_v28, %v2214_v34  ;;  %v768_v17 = vpop.f32.mrb[22].mxu0  ;;  %v1025_v49 = vpop.f32.mrb[22].mxu1 }
 0x1bf   : > { %v1966_v25 = vadd.f32 %v1946_v6, %v756_v8  ;;  %v5001_v51 = vadd.f32 %v2257_v24, %v1013_v2  ;;  %v770_v38 = vpop.f32.mrb[23].mxu0  ;;  %v1027_v47 = vpop.f32.mrb[23].mxu1  ;;  %3838 = vmatmul.mubr.msk.f32.vlgmr.msra.gmra.mrb[128].mxu0 %vm539_vm0, %v4397_v52  ;;  %v2034_v43 = vmax.f32 %v2002_v54, 0.0 }
 0x1c0   : > { %v2111_v16 = vrot.slane %v2110_v20, 1  ;;  %v2114_v12 = vrot.slane %v2113_v30, 4  ;;  %v1903_v1 = vrot.slane %v770_v38, 1  ;;  %v2215_v22 = vrot.slane %v1027_v47, 1  ;;  %3840 = vmatprep.mubr.msk.f32.mxu0 %vm539_vm0, %v4406_v61 }
 0x1c1   : > { %v2003_v63 = vadd.f32 %v4877_v18, %v1966_v25 }
 0x1c2   : > { %v2112_v28 = vmax.f32 %v2110_v20, %v2111_v16  ;;  %v2115_v39 = vmax.f32 %v2113_v30, %v2114_v12  ;;  %v1945_v8 = vsel %vm1924_vm3, %v1902_v56, %v1903_v1  ;;  %v2256_v2 = vsel %vm1924_vm3, %v2214_v34, %v2215_v22  ;;  %v774_v58 = vpop.f32.mrb[24].mxu0  ;;  %v1031_v52 = vpop.f32.mrb[24].mxu1 }
 0x1c3   : > { %v2035_v32 = vmax.f32 %v2003_v63, 0.0  ;;  %v1967_v10 = vadd.f32 %v1945_v8, %v762_v45  ;;  %v5012_v6 = vadd.f32 %v2256_v2, %v1019_v4  ;;  %v776_v24 = vpop.f32.mrb[25].mxu0  ;;  %v1033_v61 = vpop.f32.mrb[25].mxu1  ;;  %3841 = vmatmul.mubr.msk.f32.gmra.mrb[130].mxu0 %vm539_vm0, %v4418_v15 }
 0x1c4   : > { %v2116_v20 = vrot.slane %v2115_v39, 2  ;;  %v1904_v30 = vrot.slane %v776_v24, 1  ;;  %v2216_v25 = vrot.slane %v1033_v61, 1  ;;  %3843 = vmatprep.mubr.msk.f32.mxu0 %vm539_vm0, %v4430_v19  ;;  %v3135_v56 = vsel %vm3134_vm6, %v2112_v28, %v3133_v60 }
 0x1c5   : > { %v2069_v34 = vsel %vm2059_vm4, %v2035_v32, 0.0  ;;  %v2004_v16 = vadd.f32 %v4877_v18, %v1967_v10 }
 0x1c6   : > { %v2117_v54 = vmax.f32 %v2115_v39, %v2116_v20  ;;  %v2120_v45 = vmax.f32 %v2034_v43, %v2069_v34  ;;  %v1944_v4 = vsel %vm1924_vm3, %v1903_v1, %v1904_v30  ;;  %v2255_v38 = vsel %vm1924_vm3, %v2215_v22, %v2216_v25  ;;  %v780_v15 = vpop.f32.mrb[26].mxu0  ;;  %v1037_v47 = vpop.f32.mrb[26].mxu1 }
 0x1c7   : > { %v1968_v12 = vadd.f32 %v1944_v4, %v768_v17  ;;  %v5026_v63 = vadd.f32 %v2255_v38, %v1025_v49  ;;  %v782_v19 = vpop.f32.mrb[27].mxu0  ;;  %v1039_v60 = vpop.f32.mrb[27].mxu1  ;;  %3844 = vmatmul.mubr.msk.f32.gmra.mrb[132].mxu0 %vm539_vm0, %v4441_v21  ;;  %v2036_v10 = vmax.f32 %v2004_v16, 0.0 }
 0x1c8   : > { %v2118_v28 = vrot.slane %v2117_v54, 1  ;;  %v2121_v39 = vrot.slane %v2120_v45, 4  ;;  %v1905_v8 = vrot.slane %v782_v19, 1  ;;  %v2217_v2 = vrot.slane %v1039_v60, 1  ;;  %3846 = vmatprep.mubr.msk.f32.mxu0 %vm539_vm0, %v4451_v23 }
 0x1c9   : > { %v2005_v1 = vadd.f32 %v4877_v18, %v1968_v12 }
 0x1ca   : > { %v2119_v22 = vmax.f32 %v2117_v54, %v2118_v28  ;;  %v2122_v43 = vmax.f32 %v2120_v45, %v2121_v39  ;;  %v1943_v17 = vsel %vm1924_vm3, %v1904_v30, %v1905_v8  ;;  %v2254_v49 = vsel %vm1924_vm3, %v2216_v25, %v2217_v2  ;;  %v786_v32 = vpop.f32.mrb[28].mxu0  ;;  %v1043_v21 = vpop.f32.mrb[28].mxu1  ;;  %v3235_v54 = vld [vmem:[%s6112_s3 + $0x80] sm:$0xff]  ;;  %v3236_v30 = vld [vmem:[%s6112_s3 + $0x88] sm:$0xff] }
 0x1cb   : > { %v2037_v24 = vmax.f32 %v2005_v1, 0.0  ;;  %v1969_v61 = vadd.f32 %v1943_v17, %v774_v58  ;;  %v5037_v20 = vadd.f32 %v2254_v49, %v1031_v52  ;;  %v788_v34 = vpop.f32.mrb[29].mxu0  ;;  %v1045_v23 = vpop.f32.mrb[29].mxu1  ;;  %3847 = vmatmul.mubr.msk.f32.gmra.mrb[134].mxu0 %vm539_vm0, %v4461_v27  ;;  %v4000_v58 = vpack.c.bf16 %v3236_v30, %v3235_v54  ;;  %v3219_v52 = vld [vmem:[%s6112_s3] sm:$0xff]  ;;  %v3220_v27 = vld [vmem:[%s6112_s3 + $0x8] sm:$0xff] }
 0x1cc   : > { %v2123_v25 = vrot.slane %v2122_v43, 2  ;;  %v1906_v45 = vrot.slane %v788_v34, 1  ;;  %v2218_v4 = vrot.slane %v1045_v23, 1  ;;  %3849 = vmatprep.mubr.msk.f32.mxu0 %vm539_vm0, %v4471_v29  ;;  %v4002_v16 = vpack.c.bf16 %v3220_v27, %v3219_v52 }
 0x1cd   : > { %v2071_v38 = vsel %vm2059_vm4, %v2037_v24, 0.0  ;;  %v3137_v12 = vsel %vm3136_vm7, %v2119_v22, %v3135_v56  ;;  %4001 = vmatprep.subr.bf16.mxu1 %v4000_v58  ;;  %v2006_v17 = vadd.f32 %v4877_v18, %v1969_v61  ;;  %v3237_v56 = vld [vmem:[%s6112_s3 + $0x90] sm:$0xff] }
 0x1ce   : > { %v2124_v19 = vmax.f32 %v2122_v43, %v2123_v25  ;;  %v2127_v60 = vmax.f32 %v2036_v10, %v2071_v38  ;;  %v1942_v29 = vsel %vm1924_vm3, %v1905_v8, %v1906_v45  ;;  %v2253_v28 = vsel %vm1924_vm3, %v2217_v2, %v2218_v4  ;;  %v792_v39 = vpop.f32.mrb[30].mxu0  ;;  %v1049_v1 = vpop.f32.mrb[30].mxu1  ;;  %4003 = vmatpush3.bf16.msra.mxu1 %v4002_v16  ;;  %v3238_v8 = vld [vmem:[%s6112_s3 + $0x98] sm:$0xff] }
 0x1cf   : > { %v1970_v49 = vadd.f32 %v1942_v29, %v780_v15  ;;  %v5063_v34 = vadd.f32 %v2253_v28, %v1037_v47  ;;  %v794_v24 = vpop.f32.mrb[31].mxu0  ;;  %v1051_v23 = vpop.f32.mrb[31].mxu1  ;;  %3850 = vmatmul.mubr.msk.f32.gmra.mrb[136].mxu0 %vm539_vm0, %v4481_v31  ;;  %v3221_v31 = vld [vmem:[%s6112_s3 + $0x10] sm:$0xff]  ;;  %v3222_v47 = vld [vmem:[%s6112_s3 + $0x18] sm:$0xff]  ;;  %v4004_v61 = vpack.c.bf16 %v3238_v8, %v3237_v56  ;;  %v2038_v38 = vmax.f32 %v2006_v17, 0.0 }
 0x1d0   : > { %v2125_v2 = vrot.slane %v2124_v19, 1  ;;  %v2128_v22 = vrot.slane %v2127_v60, 4  ;;  %v1907_v43 = vrot.slane %v794_v24, 1  ;;  %v2219_v15 = vrot.slane %v1051_v23, 1  ;;  %3852 = vmatprep.mubr.msk.f32.mxu0 %vm539_vm0, %v4491_v33 }
 0x1d1   : > { %v2007_v10 = vadd.f32 %v4877_v18, %v1970_v49  ;;  %v4006_v54 = vpack.c.bf16 %v3222_v47, %v3221_v31  ;;  %4005 = vmatprep.subr.bf16.mxu1 %v4004_v61 }
 0x1d2   : > { %v2129_v30 = vmax.f32 %v2127_v60, %v2128_v22  ;;  %v1941_v25 = vsel %vm1924_vm3, %v1906_v45, %v1907_v43  ;;  %v2252_v33 = vsel %vm1924_vm3, %v2218_v4, %v2219_v15  ;;  %v798_v58 = vpop.f32.mrb[32].mxu0  ;;  %v1055_v52 = vpop.f32.mrb[32].mxu1  ;;  %v2126_v27 = vmax.f32 %v2124_v19, %v2125_v2  ;;  %v3239_v45 = vld [vmem:[%s6112_s3 + $0xa0] sm:$0xff]  ;;  %v3240_v4 = vld [vmem:[%s6112_s3 + $0xa8] sm:$0xff] }
 0x1d3   : > { %v2039_v16 = vmax.f32 %v2007_v10, 0.0  ;;  %v1971_v29 = vadd.f32 %v1941_v25, %v786_v32  ;;  %v5086_v28 = vadd.f32 %v2252_v33, %v1043_v21  ;;  %v800_v24 = vpop.f32.mrb[33].mxu0  ;;  %v1057_v49 = vpop.f32.mrb[33].mxu1  ;;  %3853 = vmatmul.mubr.msk.f32.gmra.mrb[138].mxu0 %vm539_vm0, %v4501_v35  ;;  %4007 = vmatpush3.bf16.msra.mxu1 %v4006_v54  ;;  %v4008_v32 = vpack.c.bf16 %v3240_v4, %v3239_v45  ;;  %v3223_v35 = vld [vmem:[%s6112_s3 + $0x20] sm:$0xff]  ;;  %v3224_v21 = vld [vmem:[%s6112_s3 + $0x28] sm:$0xff] }
 0x1d4   : > { %v2130_v19 = vrot.slane %v2129_v30, 2  ;;  %v1908_v60 = vrot.slane %v800_v24, 1  ;;  %v2220_v17 = vrot.slane %v1057_v49, 1  ;;  %3855 = vmatprep.mubr.msk.f32.mxu0 %vm539_vm0, %v4511_v37  ;;  %v4010_v8 = vpack.c.bf16 %v3224_v21, %v3223_v35 }
 0x1d5   : > { %v2073_v23 = vsel %vm2059_vm4, %v2039_v16, 0.0  ;;  %v2008_v56 = vadd.f32 %v4877_v18, %v1971_v29  ;;  %v3139_v2 = vsel %vm3138_vm8, %v2126_v27, %v3137_v12  ;;  %4009 = vmatprep.subr.bf16.mxu1 %v4008_v32  ;;  %v3241_v12 = vld [vmem:[%s6112_s3 + $0xb0] sm:$0xff] }
 0x1d6   : > { %v2131_v22 = vmax.f32 %v2129_v30, %v2130_v19  ;;  %v2134_v37 = vmax.f32 %v2038_v38, %v2073_v23  ;;  %v1940_v31 = vsel %vm1924_vm3, %v1907_v43, %v1908_v60  ;;  %v2251_v47 = vsel %vm1924_vm3, %v2219_v15, %v2220_v17  ;;  %v804_v10 = vpop.f32.mrb[34].mxu0  ;;  %v1061_v61 = vpop.f32.mrb[34].mxu1  ;;  %v3242_v43 = vld [vmem:[%s6112_s3 + $0xb8] sm:$0xff] }
 0x1d7   : > { %v1972_v54 = vadd.f32 %v1940_v31, %v792_v39  ;;  %v5112_v25 = vadd.f32 %v2251_v47, %v1049_v1  ;;  %v806_v33 = vpop.f32.mrb[35].mxu0  ;;  %v1063_v16 = vpop.f32.mrb[35].mxu1  ;;  %3856 = vmatmul.mubr.msk.f32.gmra.mrb[140].mxu0 %vm539_vm0, %v4521_v40  ;;  %4011 = vmatpush3.bf16.msra.mxu1 %v4010_v8  ;;  %v4012_v39 = vpack.c.bf16 %v3242_v43, %v3241_v12  ;;  %v3225_v40 = vld [vmem:[%s6112_s3 + $0x30] sm:$0xff]  ;;  %v3226_v1 = vld [vmem:[%s6112_s3 + $0x38] sm:$0xff]  ;;  %v2040_v45 = vmax.f32 %v2008_v56, 0.0  ;;  %v3243_v56 = vld [vmem:[%s6112_s3 + $0xc0] sm:$0xff] }
 0x1d8   : > { %v2135_v15 = vrot.slane %v2134_v37, 4  ;;  %v1909_v30 = vrot.slane %v806_v33, 1  ;;  %v2221_v27 = vrot.slane %v1063_v16, 1  ;;  %3858 = vmatprep.mubr.msk.f32.mxu0 %vm539_vm0, %v4531_v42  ;;  %v4014_v29 = vpack.c.bf16 %v3226_v1, %v3225_v40 }
 0x1d9   : > { %v2009_v38 = vadd.f32 %v4877_v18, %v1972_v54  ;;  %v2132_v24 = vrot.slane %v2131_v22, 1  ;;  %4013 = vmatprep.subr.bf16.mxu1 %v4012_v39 }
 0x1da   : > { %v2136_v49 = vmax.f32 %v2134_v37, %v2135_v15  ;;  %v1939_v42 = vsel %vm1924_vm3, %v1908_v60, %v1909_v30  ;;  %v2250_v4 = vsel %vm1924_vm3, %v2220_v17, %v2221_v27  ;;  %v810_v19 = vpop.f32.mrb[36].mxu0  ;;  %v1067_v32 = vpop.f32.mrb[36].mxu1  ;;  %v3244_v60 = vld [vmem:[%s6112_s3 + $0xc8] sm:$0xff] }
 0x1db   : > { %v2041_v35 = vmax.f32 %v2009_v38, 0.0  ;;  %v1973_v21 = vadd.f32 %v1939_v42, %v798_v58  ;;  %v5135_v23 = vadd.f32 %v2250_v4, %v1055_v52  ;;  %v812_v8 = vpop.f32.mrb[37].mxu0  ;;  %v1069_v31 = vpop.f32.mrb[37].mxu1  ;;  %3859 = vmatmul.mubr.msk.f32.gmra.mrb[142].mxu0 %vm539_vm0, %v4541_v44  ;;  %v2133_v17 = vmax.f32 %v2131_v22, %v2132_v24  ;;  %4015 = vmatpush3.bf16.msra.mxu1 %v4014_v29  ;;  %v3227_v44 = vld [vmem:[%s6112_s3 + $0x40] sm:$0xff]  ;;  %v3228_v52 = vld [vmem:[%s6112_s3 + $0x48] sm:$0xff] }
 0x1dc   : > { %v2137_v37 = vrot.slane %v2136_v49, 2  ;;  %v1910_v47 = vrot.slane %v812_v8, 1  ;;  %v2222_v54 = vrot.slane %v1069_v31, 1  ;;  %3861 = vmatprep.mubr.msk.f32.mxu0 %vm539_vm0, %v4551_v46  ;;  %v4016_v58 = vpack.c.bf16 %v3244_v60, %v3243_v56 }
 0x1dd   : > { %v2075_v33 = vsel %vm2059_vm4, %v2041_v35, 0.0  ;;  %v2010_v22 = vadd.f32 %v4877_v18, %v1973_v21  ;;  %v4018_v16 = vpack.c.bf16 %v3228_v52, %v3227_v44  ;;  %v3141_v12 = vsel %vm3140_vm9, %v2133_v17, %v3139_v2  ;;  %v3245_v2 = vld [vmem:[%s6112_s3 + $0xd0] sm:$0xff] }
 0x1de   : > { %v2141_v43 = vmax.f32 %v2040_v45, %v2075_v33  ;;  %v1938_v46 = vsel %vm1924_vm3, %v1909_v30, %v1910_v47  ;;  %v2249_v15 = vsel %vm1924_vm3, %v2221_v27, %v2222_v54  ;;  %v816_v39 = vpop.f32.mrb[38].mxu0  ;;  %v1073_v40 = vpop.f32.mrb[38].mxu1  ;;  %4017 = vmatprep.subr.bf16.mxu1 %v4016_v58  ;;  %v2138_v1 = vmax.f32 %v2136_v49, %v2137_v37  ;;  %v3246_v30 = vld [vmem:[%s6112_s3 + $0xd8] sm:$0xff] }
 0x1df   : > { %v1974_v38 = vadd.f32 %v1938_v46, %v804_v10  ;;  %v5161_v29 = vadd.f32 %v2249_v15, %v1061_v61  ;;  %v818_v24 = vpop.f32.mrb[39].mxu0  ;;  %v1075_v42 = vpop.f32.mrb[39].mxu1  ;;  %3862 = vmatmul.mubr.msk.f32.gmra.mrb[144].mxu0 %vm539_vm0, %v4561_v48  ;;  %4019 = vmatpush3.bf16.msra.mxu1 %v4018_v16  ;;  %v4020_v10 = vpack.c.bf16 %v3246_v30, %v3245_v2  ;;  %v3229_v48 = vld [vmem:[%s6112_s3 + $0x50] sm:$0xff]  ;;  %v3230_v61 = vld [vmem:[%s6112_s3 + $0x58] sm:$0xff]  ;;  %v2042_v31 = vmax.f32 %v2010_v22, 0.0  ;;  %v3247_v22 = vld [vmem:[%s6112_s3 + $0xe0] sm:$0xff] }
 0x1e0   : > { %v2142_v27 = vrot.slane %v2141_v43, 4  ;;  %v1911_v45 = vrot.slane %v818_v24, 1  ;;  %v2223_v4 = vrot.slane %v1075_v42, 1  ;;  %3864 = vmatprep.mubr.msk.f32.mxu0 %vm539_vm0, %v4571_v50  ;;  %v4022_v35 = vpack.c.bf16 %v3230_v61, %v3229_v48 }
 0x1e1   : > { %v2011_v49 = vadd.f32 %v4877_v18, %v1974_v38  ;;  %v2139_v21 = vrot.slane %v2138_v1, 1  ;;  %4021 = vmatprep.subr.bf16.mxu1 %v4020_v10 }
 0x1e2   : > { %v2143_v8 = vmax.f32 %v2141_v43, %v2142_v27  ;;  %v1937_v50 = vsel %vm1924_vm3, %v1910_v47, %v1911_v45  ;;  %v2248_v56 = vsel %vm1924_vm3, %v2222_v54, %v2223_v4  ;;  %v822_v60 = vpop.f32.mrb[40].mxu0  ;;  %v1079_v17 = vpop.f32.mrb[40].mxu1  ;;  %v3248_v47 = vld [vmem:[%s6112_s3 + $0xe8] sm:$0xff] }
 0x1e3   : > { %v2043_v37 = vmax.f32 %v2011_v49, 0.0  ;;  %v1975_v58 = vadd.f32 %v1937_v50, %v810_v19  ;;  %v5184_v44 = vadd.f32 %v2248_v56, %v1067_v32  ;;  %v824_v52 = vpop.f32.mrb[41].mxu0  ;;  %v1081_v33 = vpop.f32.mrb[41].mxu1  ;;  %3865 = vmatmul.mubr.msk.f32.gmra.mrb[146].mxu0 %vm539_vm0, %v4581_v53  ;;  %v2140_v54 = vmax.f32 %v2138_v1, %v2139_v21  ;;  %4023 = vmatpush3.bf16.msra.mxu1 %v4022_v35  ;;  %v3231_v53 = vld [vmem:[%s6112_s3 + $0x60] sm:$0xff]  ;;  %v3232_v32 = vld [vmem:[%s6112_s3 + $0x68] sm:$0xff] }
 0x1e4   : > { %v1912_v16 = vrot.slane %v824_v52, 1  ;;  %v2224_v43 = vrot.slane %v1081_v33, 1  ;;  %3867 = vmatprep.mubr.msk.f32.mxu0 %vm539_vm0, %v4591_v55  ;;  %v4024_v19 = vpack.c.bf16 %v3248_v47, %v3247_v22  ;;  %v2144_v46 = vrot.slane %v2143_v8, 2 }
 0x1e5   : > { %v2077_v15 = vsel %vm2059_vm4, %v2043_v37, 0.0  ;;  %v4026_v1 = vpack.c.bf16 %v3232_v32, %v3231_v53  ;;  %v3143_v38 = vsel %vm3142_vm10, %v2140_v54, %v3141_v12  ;;  %v2012_v10 = vadd.f32 %v4877_v18, %v1975_v58  ;;  %v3249_v12 = vld [vmem:[%s6112_s3 + $0xf0] sm:$0xff] }
 0x1e6   : > { %v2148_v24 = vmax.f32 %v2042_v31, %v2077_v15  ;;  %v1936_v55 = vsel %vm1924_vm3, %v1911_v45, %v1912_v16  ;;  %v2247_v42 = vsel %vm1924_vm3, %v2223_v4, %v2224_v43  ;;  %v828_v2 = vpop.f32.mrb[42].mxu0  ;;  %v1085_v30 = vpop.f32.mrb[42].mxu1  ;;  %4025 = vmatprep.subr.bf16.mxu1 %v4024_v19  ;;  %v2145_v27 = vmax.f32 %v2143_v8, %v2144_v46  ;;  %v3250_v45 = vld [vmem:[%s6112_s3 + $0xf8] sm:$0xff] }
 0x1e7   : > { %v1976_v48 = vadd.f32 %v1936_v55, %v816_v39  ;;  %v5210_v61 = vadd.f32 %v2247_v42, %v1073_v40  ;;  %v830_v49 = vpop.f32.mrb[43].mxu0  ;;  %v1087_v35 = vpop.f32.mrb[43].mxu1  ;;  %3868 = vmatmul.mubr.msk.f32.gmra.mrb[148].mxu0 %vm539_vm0, %v4601_v57  ;;  %4027 = vmatpush3.bf16.msra.mxu1 %v4026_v1  ;;  %v4028_v39 = vpack.c.bf16 %v3250_v45, %v3249_v12  ;;  %v3233_v57 = vld [vmem:[%s6112_s3 + $0x70] sm:$0xff]  ;;  %v3234_v40 = vld [vmem:[%s6112_s3 + $0x78] sm:$0xff]  ;;  %v2044_v46 = vmax.f32 %v2012_v10, 0.0 }
 0x1e8   : > { %v2149_v4 = vrot.slane %v2148_v24, 4  ;;  %v1913_v21 = vrot.slane %v830_v49, 1  ;;  %v2225_v8 = vrot.slane %v1087_v35, 1  ;;  %3870 = vmatprep.mubr.msk.f32.mxu0 %vm539_vm0, %v4611_v59  ;;  %v4030_v50 = vpack.c.bf16 %v3234_v40, %v3233_v57 }
 0x1e9   : > { %v2013_v31 = vadd.f32 %v4877_v18, %v1976_v48  ;;  %v2146_v56 = vrot.slane %v2145_v27, 1  ;;  %4029 = vmatprep.subr.bf16.mxu1 %v4028_v39 }
 0x1ea   : > { %v2150_v37 = vmax.f32 %v2148_v24, %v2149_v4  ;;  %v1935_v58 = vsel %vm1924_vm3, %v1912_v16, %v1913_v21  ;;  %v2246_v59 = vsel %vm1924_vm3, %v2224_v43, %v2225_v8  ;;  %v834_v52 = vpop.f32.mrb[44].mxu0  ;;  %v1091_v33 = vpop.f32.mrb[44].mxu1 }
 0x1eb   : > { %v2045_v22 = vmax.f32 %v2013_v31, 0.0  ;;  %v1977_v47 = vadd.f32 %v1935_v58, %v822_v60  ;;  %v5233_v54 = vadd.f32 %v2246_v59, %v1079_v17  ;;  %v836_v19 = vpop.f32.mrb[45].mxu0  ;;  %v1093_v53 = vpop.f32.mrb[45].mxu1  ;;  %3871 = vmatmul.mubr.msk.f32.gmra.mrb[150].mxu0 %vm539_vm0, %v4621_v62  ;;  %v2147_v32 = vmax.f32 %v2145_v27, %v2146_v56  ;;  %4031 = vmatpush3.bf16.msra.mxu1 %v4030_v50 }
 0x1ec   : > { %v1914_v15 = vrot.slane %v836_v19, 1  ;;  %v2226_v16 = vrot.slane %v1093_v53, 1  ;;  %3873 = vmatprep.mubr.msk.f32.mxu0 %vm539_vm0, %v4631_v0  ;;  %v2151_v43 = vrot.slane %v2150_v37, 2 }
 0x1ed   : > { %v2079_v1 = vsel %vm2059_vm4, %v2045_v22, 0.0  ;;  %v5242_v60 = vsel %vm3144_vm11, %v2147_v32, %v3143_v38  ;;  %v2014_v38 = vadd.f32 %v4877_v18, %v1977_v47 }
 0x1ee   : > { %v2155_v17 = vmax.f32 %v2044_v46, %v2079_v1  ;;  %v1934_v24 = vsel %vm1924_vm3, %v1913_v21, %v1914_v15  ;;  %v2245_v62 = vsel %vm1924_vm3, %v2225_v8, %v2226_v16  ;;  %v840_v55 = vpop.f32.mrb[46].mxu0  ;;  %v1097_v42 = vpop.f32.mrb[46].mxu1  ;;  %v2152_v45 = vmax.f32 %v2150_v37, %v2151_v43 }
 0x1ef   : > { %v1978_v27 = vadd.f32 %v1934_v24, %v828_v2  ;;  %v5248_v10 = vadd.f32 %v2245_v62, %v1085_v30  ;;  %v842_v0 = vpop.f32.mrb[47].mxu0  ;;  %v1099_v48 = vpop.f32.mrb[47].mxu1  ;;  %3874 = vmatmul.mubr.msk.f32.gmra.mrb[152].mxu0 %vm539_vm0, %v4641_v3  ;;  %v2046_v56 = vmax.f32 %v2014_v38, 0.0 }
 0x1f0   : > { %v2156_v49 = vrot.slane %v2155_v17, 4  ;;  %v1915_v35 = vrot.slane %v842_v0, 1  ;;  %v2227_v12 = vrot.slane %v1099_v48, 1  ;;  %3876 = vmatprep.mubr.msk.f32.mxu0 %vm539_vm0, %v4651_v5  ;;  %v2153_v59 = vrot.slane %v2152_v45, 1 }
 0x1f1   : > { %v2015_v4 = vadd.f32 %v4877_v18, %v1978_v27 }
 0x1f2   : > { %v2157_v21 = vmax.f32 %v2155_v17, %v2156_v49  ;;  %v1933_v2 = vsel %vm1924_vm3, %v1914_v15, %v1915_v35  ;;  %v2244_v30 = vsel %vm1924_vm3, %v2226_v16, %v2227_v12  ;;  %v846_v8 = vpop.f32.mrb[48].mxu0  ;;  %v1103_v3 = vpop.f32.mrb[48].mxu1  ;;  %v2154_v62 = vmax.f32 %v2152_v45, %v2153_v59 }
 0x1f3   : > { %v2047_v39 = vmax.f32 %v2015_v4, 0.0  ;;  %v1979_v57 = vadd.f32 %v1933_v2, %v834_v52  ;;  %v5260_v40 = vadd.f32 %v2244_v30, %v1091_v33  ;;  %v848_v31 = vpop.f32.mrb[49].mxu0  ;;  %v1105_v50 = vpop.f32.mrb[49].mxu1  ;;  %3877 = vmatmul.mubr.msk.f32.gmra.mrb[154].mxu0 %vm539_vm0, %v4661_v7 }
 0x1f4   : > { %v2158_v5 = vrot.slane %v2157_v21, 2  ;;  %v1916_v37 = vrot.slane %v848_v31, 1  ;;  %v2228_v58 = vrot.slane %v1105_v50, 1  ;;  %3879 = vmatprep.mubr.msk.f32.mxu0 %vm539_vm0, %v4671_v9 }
 0x1f5   : > { %v2081_v22 = vsel %vm2059_vm4, %v2047_v39, 0.0  ;;  %v2016_v32 = vadd.f32 %v4877_v18, %v1979_v57 }
 0x1f6   : > { %v2159_v47 = vmax.f32 %v2157_v21, %v2158_v5  ;;  %v2162_v52 = vmax.f32 %v2046_v56, %v2081_v22  ;;  %v1932_v33 = vsel %vm1924_vm3, %v1915_v35, %v1916_v37  ;;  %v2243_v19 = vsel %vm1924_vm3, %v2227_v12, %v2228_v58  ;;  %v852_v7 = vpop.f32.mrb[50].mxu0  ;;  %v1109_v53 = vpop.f32.mrb[50].mxu1 }
 0x1f7   : > { %v1980_v46 = vadd.f32 %v1932_v33, %v840_v55  ;;  %v5273_v15 = vadd.f32 %v2243_v19, %v1097_v42  ;;  %v854_v9 = vpop.f32.mrb[51].mxu0  ;;  %v1111_v16 = vpop.f32.mrb[51].mxu1  ;;  %3880 = vmatmul.mubr.msk.f32.gmra.mrb[156].mxu0 %vm539_vm0, %v4681_v11  ;;  %v2048_v38 = vmax.f32 %v2016_v32, 0.0 }
 0x1f8   : > { %v2160_v43 = vrot.slane %v2159_v47, 1  ;;  %v2163_v1 = vrot.slane %v2162_v52, 4  ;;  %v1917_v17 = vrot.slane %v854_v9, 1  ;;  %v2229_v24 = vrot.slane %v1111_v16, 1  ;;  %3882 = vmatprep.mubr.msk.f32.mxu0 %vm539_vm0, %v4691_v13 }
 0x1f9   : > { %v2017_v27 = vadd.f32 %v4877_v18, %v1980_v46 }
 0x1fa   : > { %v2161_v0 = vmax.f32 %v2159_v47, %v2160_v43  ;;  %v2164_v48 = vmax.f32 %v2162_v52, %v2163_v1  ;;  %v1931_v55 = vsel %vm1924_vm3, %v1916_v37, %v1917_v17  ;;  %v2242_v42 = vsel %vm1924_vm3, %v2228_v58, %v2229_v24  ;;  %v858_v49 = vpop.f32.mrb[52].mxu0  ;;  %v1115_v11 = vpop.f32.mrb[52].mxu1 }
 0x1fb   : > { %v2049_v35 = vmax.f32 %v2017_v27, 0.0  ;;  %v1981_v12 = vadd.f32 %v1931_v55, %v846_v8  ;;  %v5284_v4 = vadd.f32 %v2242_v42, %v1103_v3  ;;  %v860_v21 = vpop.f32.mrb[53].mxu0  ;;  %v1117_v13 = vpop.f32.mrb[53].mxu1  ;;  %3883 = vmatmul.mubr.msk.f32.gmra.mrb[158].mxu0 %vm539_vm0, %v4701_v14  ;;  %v5298_v14 = vld [vmem:[%s6111_s2] ss:$0 sm:$0xff]  ;;  %vm2332_vm0 = vcmp.lt.s32.totalorder %v4845_v41, 6 }
 0x1fc   : > { %v2165_v18 = vrot.slane %v2164_v48, 2  ;;  %v1918_v45 = vrot.slane %v860_v21, 1  ;;  %v2230_v2 = vrot.slane %v1117_v13, 1  ;;  %v3146_v30 = vsel %vm3132_vm5, %v2161_v0, %v2154_v62 }
 0x1fd   : > { %v2083_v39 = vsel %vm2059_vm4, %v2049_v35, 0.0  ;;  %v2018_v56 = vadd.f32 %v5298_v14, %v1981_v12 }
 0x1fe   : > { %v2166_v57 = vmax.f32 %v2164_v48, %v2165_v18  ;;  %v2169_v31 = vmax.f32 %v2048_v38, %v2083_v39  ;;  %v1930_v8 = vsel %vm1924_vm3, %v1917_v17, %v1918_v45  ;;  %v2241_v3 = vsel %vm1924_vm3, %v2229_v24, %v2230_v2  ;;  %v864_v50 = vpop.f32.mrb[54].mxu0  ;;  %v1121_v5 = vpop.f32.mrb[54].mxu1 }
 0x1ff   : > { %v1982_v37 = vadd.f32 %v1930_v8, %v852_v7  ;;  %v5301_v58 = vadd.f32 %v2241_v3, %v1109_v53  ;;  %v866_v59 = vpop.f32.mrb[55].mxu0  ;;  %v1123_v22 = vpop.f32.mrb[55].mxu1  ;;  %v2050_v53 = vmax.f32 %v2018_v56, 0.0 }
 0x200   : > { %v2167_v47 = vrot.slane %v2166_v57, 1  ;;  %v2170_v52 = vrot.slane %v2169_v31, 4  ;;  %v1919_v33 = vrot.slane %v866_v59, 1  ;;  %v2231_v19 = vrot.slane %v1123_v22, 1 }
 0x201   : > { %v2019_v32 = vadd.f32 %v5298_v14, %v1982_v37 }
 0x202   : > { %v2171_v46 = vmax.f32 %v2169_v31, %v2170_v52  ;;  %v1929_v9 = vsel %vm1924_vm3, %v1918_v45, %v1919_v33  ;;  %v2240_v16 = vsel %vm1924_vm3, %v2230_v2, %v2231_v19  ;;  %v870_v43 = vpop.f32.mrb[56].mxu0  ;;  %v1127_v1 = vpop.f32.mrb[56].mxu1  ;;  %v2168_v7 = vmax.f32 %v2166_v57, %v2167_v47 }
 0x203   : > { %v2051_v17 = vmax.f32 %v2019_v32, 0.0  ;;  %v1983_v24 = vadd.f32 %v1929_v9, %v858_v49  ;;  %v5308_v62 = vadd.f32 %v2240_v16, %v1115_v11  ;;  %v872_v27 = vpop.f32.mrb[57].mxu0  ;;  %v1129_v0 = vpop.f32.mrb[57].mxu1 }
 0x204   : > { %v2172_v48 = vrot.slane %v2171_v46, 2  ;;  %v1920_v55 = vrot.slane %v872_v27, 1  ;;  %v2232_v42 = vrot.slane %v1129_v0, 1  ;;  %v3147_v38 = vsel %vm3134_vm6, %v2168_v7, %v3146_v30 }
 0x205   : > { %v2085_v35 = vsel %vm2059_vm4, %v2051_v17, 0.0  ;;  %v2020_v45 = vadd.f32 %v5298_v14, %v1983_v24 }
 0x206   : > { %v2173_v12 = vmax.f32 %v2171_v46, %v2172_v48  ;;  %v2176_v21 = vmax.f32 %v2050_v53, %v2085_v35  ;;  %v1928_v13 = vsel %vm1924_vm3, %v1919_v33, %v1920_v55  ;;  %v2239_v49 = vsel %vm1924_vm3, %v2231_v19, %v2232_v42  ;;  %v876_v11 = vpop.f32.mrb[58].mxu0  ;;  %v1133_v18 = vpop.f32.mrb[58].mxu1 }
 0x207   : > { %v1984_v2 = vadd.f32 %v1928_v13, %v864_v50  ;;  %v5318_v39 = vadd.f32 %v2239_v49, %v1121_v5  ;;  %v878_v57 = vpop.f32.mrb[59].mxu0  ;;  %v1135_v30 = vpop.f32.mrb[59].mxu1  ;;  %v2052_v5 = vmax.f32 %v2020_v45, 0.0 }
 0x208   : > { %v2177_v31 = vrot.slane %v2176_v21, 4  ;;  %v1921_v8 = vrot.slane %v878_v57, 1  ;;  %v2233_v3 = vrot.slane %v1135_v30, 1  ;;  %v2174_v56 = vrot.slane %v2173_v12, 1 }
 0x209   : > { %v2021_v37 = vadd.f32 %v5298_v14, %v1984_v2 }
 0x20a   : > { %v2178_v59 = vmax.f32 %v2176_v21, %v2177_v31  ;;  %v1927_v22 = vsel %vm1924_vm3, %v1920_v55, %v1921_v8  ;;  %v2238_v47 = vsel %vm1924_vm3, %v2232_v42, %v2233_v3  ;;  %v882_v52 = vpop.f32.mrb[60].mxu0  ;;  %v1139_v33 = vpop.f32.mrb[60].mxu1  ;;  %v2175_v50 = vmax.f32 %v2173_v12, %v2174_v56 }
 0x20b   : > { %v2053_v19 = vmax.f32 %v2021_v37, 0.0  ;;  %v1985_v32 = vadd.f32 %v1927_v22, %v870_v43  ;;  %v5325_v46 = vadd.f32 %v2238_v47, %v1127_v1  ;;  %v884_v9 = vpop.f32.mrb[61].mxu0  ;;  %v1141_v16 = vpop.f32.mrb[61].mxu1 }
 0x20c   : > { %v2179_v7 = vrot.slane %v2178_v59, 2  ;;  %v1922_v53 = vrot.slane %v884_v9, 1  ;;  %v2234_v17 = vrot.slane %v1141_v16, 1  ;;  %v3148_v24 = vsel %vm3136_vm7, %v2175_v50, %v3147_v38 }
 0x20d   : > { %v2087_v27 = vsel %vm2059_vm4, %v2053_v19, 0.0  ;;  %v2022_v38 = vadd.f32 %v5298_v14, %v1985_v32 }
 0x20e   : > { %v2183_v0 = vmax.f32 %v2052_v5, %v2087_v27  ;;  %v1926_v48 = vsel %vm1924_vm3, %v1921_v8, %v1922_v53  ;;  %v2237_v55 = vsel %vm1924_vm3, %v2233_v3, %v2234_v17  ;;  %v888_v43 = vpop.f32.mrb[62].mxu0  ;;  %v1145_v1 = vpop.f32.mrb[62].mxu1  ;;  %v2180_v42 = vmax.f32 %v2178_v59, %v2179_v7  ;;  %v6145_v3 = vld [vmem:[#allocation8_spill] sm:$0xff]  ;;  %v6147_v5 = vld [vmem:[#allocation9_spill] sm:$0xff] }
 0x20f   : > { %v1986_v35 = vadd.f32 %v1926_v48, %v876_v11  ;;  %v5334_v12 = vadd.f32 %v2237_v55, %v1133_v18  ;;  %v890_v21 = vpop.f32.mrb[63].mxu0  ;;  %v1147_v13 = vpop.f32.mrb[63].mxu1  ;;  %v6146_v11 = vrot.slane %v6145_v3, 1  ;;  %v6148_v19 = vrot.slane %v6147_v5, 1 }
 0x210   : > { %v2184_v49 = vrot.slane %v2183_v0, 4  ;;  %v1923_v45 = vrot.slane %v890_v21, 1  ;;  %v2235_v2 = vrot.slane %v1147_v13, 1  ;;  %v2181_v30 = vrot.slane %v2180_v42, 1 }
 0x211   : > { %v2023_v57 = vadd.f32 %v5298_v14, %v1986_v35  ;;  %v2054_v7 = vmax.f32 %v2022_v38, 0.0 }
 0x212   : > { %v2185_v31 = vmax.f32 %v2183_v0, %v2184_v49  ;;  %v1925_v8 = vsel %vm1924_vm3, %v1922_v53, %v1923_v45  ;;  %v1956_v18 = vsel %vm1924_vm3, %v1923_v45, %v6146_v11  ;;  %v2236_v56 = vsel %vm1924_vm3, %v2234_v17, %v2235_v2  ;;  %v5347_v37 = vpop.f32.mrb[64].mxu0  ;;  %v5349_v59 = vpop.f32.mrb[64].mxu1 }
 0x213   : > { %v2055_v22 = vmax.f32 %v2023_v57, 0.0  ;;  %v1987_v47 = vadd.f32 %v1925_v8, %v882_v52  ;;  %v1988_v50 = vadd.f32 %v1956_v18, %v888_v43  ;;  %v2267_v32 = vsel %vm1924_vm3, %v2235_v2, %v6148_v19  ;;  %v1218_v9 = vpop.f32.mrb[65].mxu0  ;;  %v5355_v16 = vpop.f32.mrb[65].mxu1 }
 0x214   : > { %v5357_v53 = vadd.f32 %v2236_v56, %v1139_v33  ;;  %v5359_v27 = vadd.f32 %v2267_v32, %v1145_v1  ;;  %v6126_v17 = vrot.slane %v5347_v37, 2  ;;  %v6125_v55 = vrot.slane %v5349_v59, 1 }
 0x215   : > { %v2089_v0 = vsel %vm2059_vm4, %v2055_v22, 0.0  ;;  %v2024_v52 = vadd.f32 %v5298_v14, %v1987_v47  ;;  %v2025_v48 = vadd.f32 %v5298_v14, %v1988_v50  ;;  %v6124_v35 = vrot.slane %v5355_v16, 2 }
 0x216   : > { %v2190_v43 = vmax.f32 %v2054_v7, %v2089_v0  ;;  %v1222_v21 = vpop.f32.mrb[66].mxu0  ;;  %v1479_v13 = vpop.f32.mrb[66].mxu1  ;;  %v2182_v33 = vmax.f32 %v2180_v42, %v2181_v30  ;;  %v2186_v49 = vrot.slane %v2185_v31, 2  ;;  %v5378_v30 = vld [vmem:[%s6111_s2 + $0x1] ss:$0 sm:$0xff] }
 0x217   : > { %v2056_v1 = vmax.f32 %v2024_v52, 0.0  ;;  %v2057_v38 = vmax.f32 %v2025_v48, 0.0  ;;  %v2301_v45 = vrot.slane %v1222_v21, 2  ;;  %v2613_v2 = vrot.slane %v1479_v13, 1  ;;  %v1224_v57 = vpop.f32.mrb[67].mxu0  ;;  %v1481_v8 = vpop.f32.mrb[67].mxu1 }
 0x218   : > { %v2191_v3 = vrot.slane %v2190_v43, 4  ;;  %v2709_v11 = vrot.slane %v1481_v8, 2  ;;  %v2187_v18 = vmax.f32 %v2185_v31, %v2186_v49  ;;  %v3149_v14 = vsel %vm3138_vm8, %v2182_v33, %v3148_v24  ;;  %v6149_v24 = vld [vmem:[#allocation10_spill] sm:$0xff] }
 0x219   : > { %v2091_v56 = vsel %vm2059_vm4, %v2057_v38, 0.0  ;;  %v2363_v42 = vsel %vm2332_vm0, %v6126_v17, %v2301_v45  ;;  %v2674_v31 = vsel %vm1924_vm3, %v6125_v55, %v2613_v2 }
 0x21a   : > { %v2197_v22 = vmax.f32 %v2056_v1, %v2091_v56  ;;  %v2365_v47 = vadd.f32 %v2363_v42, %v6149_v24  ;;  %v2676_v50 = vadd.f32 %v2674_v31, %v1218_v9  ;;  %v2770_v5 = vsel %vm2332_vm0, %v6124_v35, %v2709_v11  ;;  %v1228_v19 = vpop.f32.mrb[68].mxu0  ;;  %v1485_v32 = vpop.f32.mrb[68].mxu1  ;;  %v6150_v31 = vld [vmem:[#allocation11_spill] sm:$0xff] }
 0x21b   : > { %v2302_v7 = vrot.slane %v1228_v19, 2  ;;  %v2614_v0 = vrot.slane %v1485_v32, 1  ;;  %v1230_v52 = vpop.f32.mrb[69].mxu0  ;;  %v1487_v48 = vpop.f32.mrb[69].mxu1  ;;  %v2188_v21 = vrot.slane %v2187_v18, 1  ;;  %v2192_v13 = vmax.f32 %v2190_v43, %v2191_v3 }
 0x21c   : > { %v2402_v33 = vadd.f32 %v5378_v30, %v2365_v47  ;;  %v5390_v49 = vadd.f32 %v2770_v5, %v2676_v50  ;;  %v2710_v1 = vrot.slane %v1487_v48, 2  ;;  %v2198_v38 = vrot.slane %v2197_v22, 4 }
 0x21d   : > { %v2362_v9 = vsel %vm2332_vm0, %v2301_v45, %v2302_v7  ;;  %v2673_v8 = vsel %vm1924_vm3, %v2613_v2, %v2614_v0  ;;  %v2189_v56 = vmax.f32 %v2187_v18, %v2188_v21  ;;  %v2193_v42 = vrot.slane %v2192_v13, 2 }
 0x21e   : > { %v2366_v24 = vadd.f32 %v2362_v9, %v6150_v31  ;;  %v2677_v19 = vadd.f32 %v2673_v8, %v1224_v57  ;;  %v2769_v43 = vsel %vm2332_vm0, %v2709_v11, %v2710_v1  ;;  %v1234_v3 = vpop.f32.mrb[70].mxu0  ;;  %v1491_v47 = vpop.f32.mrb[70].mxu1  ;;  %v2434_v50 = vmax.f32 %v2402_v33, 0.0 }
 0x21f   : > { %v2303_v5 = vrot.slane %v1234_v3, 2  ;;  %v2615_v32 = vrot.slane %v1491_v47, 1  ;;  %v1236_v48 = vpop.f32.mrb[71].mxu0  ;;  %v1493_v45 = vpop.f32.mrb[71].mxu1  ;;  %v2194_v35 = vmax.f32 %v2192_v13, %v2193_v42  ;;  %v2199_v9 = vmax.f32 %v2197_v22, %v2198_v38  ;;  %v6151_v3 = vld [vmem:[#allocation12_spill] sm:$0xff] }
 0x220   : > { %v2403_v2 = vadd.f32 %v5378_v30, %v2366_v24  ;;  %v5401_v18 = vadd.f32 %v2769_v43, %v2677_v19  ;;  %v2711_v21 = vrot.slane %v1493_v45, 2  ;;  %v3150_v33 = vsel %vm3140_vm9, %v2189_v56, %v3149_v14 }
 0x221   : > { %v2361_v57 = vsel %vm2332_vm0, %v2302_v7, %v2303_v5  ;;  %v2672_v11 = vsel %vm1924_vm3, %v2614_v0, %v2615_v32  ;;  %v2195_v8 = vrot.slane %v2194_v35, 1  ;;  %v2200_v45 = vrot.slane %v2199_v9, 2 }
 0x222   : > { %v2435_v31 = vmax.f32 %v2403_v2, 0.0  ;;  %v2367_v47 = vadd.f32 %v2361_v57, %v6151_v3  ;;  %v2678_v55 = vadd.f32 %v2672_v11, %v1230_v52  ;;  %v2768_v13 = vsel %vm2332_vm0, %v2710_v1, %v2711_v21  ;;  %v1240_v42 = vpop.f32.mrb[72].mxu0  ;;  %v1497_v24 = vpop.f32.mrb[72].mxu1 }
 0x223   : > { %v2304_v19 = vrot.slane %v1240_v42, 2  ;;  %v2616_v22 = vrot.slane %v1497_v24, 1  ;;  %v1242_v38 = vpop.f32.mrb[73].mxu0  ;;  %v1499_v43 = vpop.f32.mrb[73].mxu1  ;;  %v2196_v7 = vmax.f32 %v2194_v35, %v2195_v8  ;;  %v2201_v11 = vmax.f32 %v2199_v9, %v2200_v45  ;;  %v6153_v42 = vld [vmem:[#allocation13_spill] sm:$0xff] }
 0x224   : > { %v2469_v0 = vsel %vm2467_vm12, %v2435_v31, 0.0  ;;  %v2404_v14 = vadd.f32 %v5378_v30, %v2367_v47  ;;  %v5414_v56 = vadd.f32 %v2768_v13, %v2678_v55  ;;  %v2712_v2 = vrot.slane %v1499_v43, 2 }
 0x225   : > { %v2500_v52 = vmax.f32 %v2434_v50, %v2469_v0  ;;  %v2360_v1 = vsel %vm2332_vm0, %v2303_v5, %v2304_v19  ;;  %v2671_v57 = vsel %vm1924_vm3, %v2615_v32, %v2616_v22  ;;  %v2202_v17 = vrot.slane %v2201_v11, 1 }
 0x226   : > { %6152 = vst [vmem:[#allocation8_spill] sm:$0xff] %v5414_v56  ;;  %v2436_v3 = vmax.f32 %v2404_v14, 0.0  ;;  %v2368_v35 = vadd.f32 %v2360_v1, %v6153_v42  ;;  %v2679_v8 = vadd.f32 %v2671_v57, %v1236_v48  ;;  %v2767_v31 = vsel %vm2332_vm0, %v2711_v21, %v2712_v2  ;;  %v1246_v24 = vpop.f32.mrb[74].mxu0  ;;  %v1503_v47 = vpop.f32.mrb[74].mxu1  ;;  %v6154_v57 = vld [vmem:[#allocation14_spill] sm:$0xff] }
 0x227   : > { %v2501_v55 = vrot.slane %v2500_v52, 4  ;;  %v2305_v13 = vrot.slane %v1246_v24, 2  ;;  %v2617_v43 = vrot.slane %v1503_v47, 1  ;;  %v1248_v50 = vpop.f32.mrb[75].mxu0  ;;  %v1505_v0 = vpop.f32.mrb[75].mxu1  ;;  %v3151_v9 = vsel %vm3142_vm10, %v2196_v7, %v3150_v33 }
 0x228   : > { %v2405_v5 = vadd.f32 %v5378_v30, %v2368_v35  ;;  %v5424_v56 = vadd.f32 %v2767_v31, %v2679_v8  ;;  %v2713_v32 = vrot.slane %v1505_v0, 2  ;;  %v2203_v14 = vmax.f32 %v2201_v11, %v2202_v17 }
 0x229   : > { %v2502_v45 = vmax.f32 %v2500_v52, %v2501_v55  ;;  %v2359_v48 = vsel %vm2332_vm0, %v2304_v19, %v2305_v13  ;;  %v2670_v21 = vsel %vm1924_vm3, %v2616_v22, %v2617_v43 }
 0x22a   : > { %v2437_v1 = vmax.f32 %v2405_v5, 0.0  ;;  %v2369_v42 = vadd.f32 %v2359_v48, %v6154_v57  ;;  %v2680_v24 = vadd.f32 %v2670_v21, %v1242_v38  ;;  %v2766_v35 = vsel %vm2332_vm0, %v2712_v2, %v2713_v32  ;;  %v1252_v8 = vpop.f32.mrb[76].mxu0  ;;  %v1509_v31 = vpop.f32.mrb[76].mxu1  ;;  %v6157_v48 = vld [vmem:[#allocation15_spill] sm:$0xff] }
 0x22b   : > { %v2503_v47 = vrot.slane %v2502_v45, 2  ;;  %v2306_v0 = vrot.slane %v1252_v8, 2  ;;  %v2618_v33 = vrot.slane %v1509_v31, 1  ;;  %v1254_v7 = vpop.f32.mrb[77].mxu0  ;;  %v1511_v52 = vpop.f32.mrb[77].mxu1  ;;  %v5435_v19 = vsel %vm3144_vm11, %v2203_v14, %v3151_v9 }
 0x22c   : > { %6155 = vst [vmem:[#allocation9_spill] sm:$0xff] %v5435_v19  ;;  %v2471_v17 = vsel %vm2467_vm12, %v2437_v1, 0.0  ;;  %v5439_v22 = vadd.f32 %v2766_v35, %v2680_v24  ;;  %v2714_v11 = vrot.slane %v1511_v52, 2  ;;  %v2406_v24 = vadd.f32 %v5378_v30, %v2369_v42 }
 0x22d   : > { %v2504_v38 = vmax.f32 %v2502_v45, %v2503_v47  ;;  %v2507_v55 = vmax.f32 %v2436_v3, %v2471_v17  ;;  %v2358_v2 = vsel %vm2332_vm0, %v2305_v13, %v2306_v0  ;;  %v2669_v5 = vsel %vm1924_vm3, %v2617_v43, %v2618_v33 }
 0x22e   : > { %6156 = vst [vmem:[#allocation10_spill] sm:$0xff] %v5439_v22  ;;  %v2370_v21 = vadd.f32 %v2358_v2, %v6157_v48  ;;  %v2681_v57 = vadd.f32 %v2669_v5, %v1248_v50  ;;  %v2765_v9 = vsel %vm2332_vm0, %v2713_v32, %v2714_v11  ;;  %v1258_v14 = vpop.f32.mrb[78].mxu0  ;;  %v1515_v8 = vpop.f32.mrb[78].mxu1  ;;  %v6159_v5 = vld [vmem:[#allocation16_spill] sm:$0xff] }
 0x22f   : > { %v2508_v1 = vrot.slane %v2507_v55, 4  ;;  %v2307_v35 = vrot.slane %v1258_v14, 2  ;;  %v2619_v45 = vrot.slane %v1515_v8, 1  ;;  %v1260_v3 = vpop.f32.mrb[79].mxu0  ;;  %v1517_v31 = vpop.f32.mrb[79].mxu1  ;;  %v2505_v52 = vrot.slane %v2504_v38, 1 }
 0x230   : > { %v2407_v13 = vadd.f32 %v5378_v30, %v2370_v21  ;;  %v5450_v47 = vadd.f32 %v2765_v9, %v2681_v57  ;;  %v2715_v43 = vrot.slane %v1517_v31, 2  ;;  %v2438_v9 = vmax.f32 %v2406_v24, 0.0 }
 0x231   : > { %v2509_v17 = vmax.f32 %v2507_v55, %v2508_v1  ;;  %v2357_v50 = vsel %vm2332_vm0, %v2306_v0, %v2307_v35  ;;  %v2668_v32 = vsel %vm1924_vm3, %v2618_v33, %v2619_v45 }
 0x232   : > { %6158 = vst [vmem:[#allocation11_spill] sm:$0xff] %v5450_v47  ;;  %v2439_v2 = vmax.f32 %v2407_v13, 0.0  ;;  %v2371_v42 = vadd.f32 %v2357_v50, %v6159_v5  ;;  %v2682_v48 = vadd.f32 %v2668_v32, %v1254_v7  ;;  %v2764_v14 = vsel %vm2332_vm0, %v2714_v11, %v2715_v43  ;;  %v1264_v8 = vpop.f32.mrb[80].mxu0  ;;  %v1521_v21 = vpop.f32.mrb[80].mxu1 }
 0x233   : > { %v2510_v57 = vrot.slane %v2509_v17, 2  ;;  %v2308_v31 = vrot.slane %v1264_v8, 2  ;;  %v2620_v19 = vrot.slane %v1521_v21, 1  ;;  %v1266_v55 = vpop.f32.mrb[81].mxu0  ;;  %v1523_v1 = vpop.f32.mrb[81].mxu1  ;;  %v2506_v5 = vmax.f32 %v2504_v38, %v2505_v52  ;;  %v6161_v8 = vld [vmem:[#allocation17_spill] sm:$0xff] }
 0x234   : > { %v2473_v0 = vsel %vm2467_vm12, %v2439_v2, 0.0  ;;  %v2408_v33 = vadd.f32 %v5378_v30, %v2371_v42  ;;  %v5462_v13 = vadd.f32 %v2764_v14, %v2682_v48  ;;  %v2716_v50 = vrot.slane %v1523_v1, 2 }
 0x235   : > { %v2511_v7 = vmax.f32 %v2509_v17, %v2510_v57  ;;  %v2514_v32 = vmax.f32 %v2438_v9, %v2473_v0  ;;  %v2356_v11 = vsel %vm2332_vm0, %v2307_v35, %v2308_v31  ;;  %v2667_v24 = vsel %vm1924_vm3, %v2619_v45, %v2620_v19 }
 0x236   : > { %6160 = vst [vmem:[#allocation12_spill] sm:$0xff] %v5462_v13  ;;  %v2372_v21 = vadd.f32 %v2356_v11, %v6161_v8  ;;  %v2683_v47 = vadd.f32 %v2667_v24, %v1260_v3  ;;  %v2763_v2 = vsel %vm2332_vm0, %v2715_v43, %v2716_v50  ;;  %v1270_v22 = vpop.f32.mrb[82].mxu0  ;;  %v1527_v42 = vpop.f32.mrb[82].mxu1  ;;  %v2440_v0 = vmax.f32 %v2408_v33, 0.0 }
 0x237   : > { %v2512_v48 = vrot.slane %v2511_v7, 1  ;;  %v2515_v14 = vrot.slane %v2514_v32, 4  ;;  %v2309_v1 = vrot.slane %v1270_v22, 2  ;;  %v2621_v17 = vrot.slane %v1527_v42, 1  ;;  %v1272_v57 = vpop.f32.mrb[83].mxu0  ;;  %v1529_v9 = vpop.f32.mrb[83].mxu1 }
 0x238   : > { %v2409_v35 = vadd.f32 %v5378_v30, %v2372_v21  ;;  %v5472_v13 = vadd.f32 %v2763_v2, %v2683_v47  ;;  %v2717_v38 = vrot.slane %v1529_v9, 2 }
 0x239   : > { %v2513_v45 = vmax.f32 %v2511_v7, %v2512_v48  ;;  %v2516_v52 = vmax.f32 %v2514_v32, %v2515_v14  ;;  %v2355_v3 = vsel %vm2332_vm0, %v2308_v31, %v2309_v1  ;;  %v2666_v43 = vsel %vm1924_vm3, %v2620_v19, %v2621_v17 }
 0x23a   : > { %v2441_v11 = vmax.f32 %v2409_v35, 0.0  ;;  %v2373_v22 = vadd.f32 %v2355_v3, %v4985_v36  ;;  %v2684_v24 = vadd.f32 %v2666_v43, %v1266_v55  ;;  %v2762_v33 = vsel %vm2332_vm0, %v2716_v50, %v2717_v38  ;;  %v1276_v8 = vpop.f32.mrb[84].mxu0  ;;  %v1533_v21 = vpop.f32.mrb[84].mxu1 }
 0x23b   : > { %v2517_v47 = vrot.slane %v2516_v52, 2  ;;  %v2310_v2 = vrot.slane %v1276_v8, 2  ;;  %v2622_v42 = vrot.slane %v1533_v21, 1  ;;  %v1278_v7 = vpop.f32.mrb[85].mxu0  ;;  %v1535_v32 = vpop.f32.mrb[85].mxu1  ;;  %v3171_v48 = vsel %vm3132_vm5, %v2513_v45, %v2506_v5 }
 0x23c   : > { %v2475_v31 = vsel %vm2467_vm12, %v2441_v11, 0.0  ;;  %v2410_v19 = vadd.f32 %v5378_v30, %v2373_v22  ;;  %v5485_v14 = vadd.f32 %v2762_v33, %v2684_v24  ;;  %v2718_v36 = vrot.slane %v1535_v32, 2 }
 0x23d   : > { %v2518_v55 = vmax.f32 %v2516_v52, %v2517_v47  ;;  %v2521_v9 = vmax.f32 %v2440_v0, %v2475_v31  ;;  %v2354_v50 = vsel %vm2332_vm0, %v2309_v1, %v2310_v2  ;;  %v2665_v35 = vsel %vm1924_vm3, %v2621_v17, %v2622_v42 }
 0x23e   : > { %v2374_v3 = vadd.f32 %v2354_v50, %v5001_v51  ;;  %v2685_v43 = vadd.f32 %v2665_v35, %v1272_v57  ;;  %v2761_v5 = vsel %vm2332_vm0, %v2717_v38, %v2718_v36  ;;  %v1282_v45 = vpop.f32.mrb[86].mxu0  ;;  %v1539_v11 = vpop.f32.mrb[86].mxu1  ;;  %v2442_v21 = vmax.f32 %v2410_v19, 0.0 }
 0x23f   : > { %v2519_v22 = vrot.slane %v2518_v55, 1  ;;  %v2522_v24 = vrot.slane %v2521_v9, 4  ;;  %v2311_v33 = vrot.slane %v1282_v45, 2  ;;  %v2623_v8 = vrot.slane %v1539_v11, 1  ;;  %v1284_v52 = vpop.f32.mrb[87].mxu0  ;;  %v1541_v0 = vpop.f32.mrb[87].mxu1 }
 0x240   : > { %v2411_v1 = vadd.f32 %v5378_v30, %v2374_v3  ;;  %v5495_v47 = vadd.f32 %v2761_v5, %v2685_v43  ;;  %v2719_v17 = vrot.slane %v1541_v0, 2 }
 0x241   : > { %v2523_v32 = vmax.f32 %v2521_v9, %v2522_v24  ;;  %v2353_v51 = vsel %vm2332_vm0, %v2310_v2, %v2311_v33  ;;  %v2664_v57 = vsel %vm1924_vm3, %v2622_v42, %v2623_v8  ;;  %v2520_v38 = vmax.f32 %v2518_v55, %v2519_v22 }
 0x242   : > { %v2443_v31 = vmax.f32 %v2411_v1, 0.0  ;;  %v2375_v50 = vadd.f32 %v2353_v51, %v5012_v6  ;;  %v2686_v35 = vadd.f32 %v2664_v57, %v1278_v7  ;;  %v2760_v19 = vsel %vm2332_vm0, %v2718_v36, %v2719_v17  ;;  %v1288_v45 = vpop.f32.mrb[88].mxu0  ;;  %v1545_v3 = vpop.f32.mrb[88].mxu1 }
 0x243   : > { %v2524_v43 = vrot.slane %v2523_v32, 2  ;;  %v2312_v5 = vrot.slane %v1288_v45, 2  ;;  %v2624_v11 = vrot.slane %v1545_v3, 1  ;;  %v1290_v9 = vpop.f32.mrb[89].mxu0  ;;  %v1547_v24 = vpop.f32.mrb[89].mxu1  ;;  %v3172_v2 = vsel %vm3134_vm6, %v2520_v38, %v3171_v48 }
 0x244   : > { %v2477_v42 = vsel %vm2467_vm12, %v2443_v31, 0.0  ;;  %v2412_v55 = vadd.f32 %v5378_v30, %v2375_v50  ;;  %v5508_v22 = vadd.f32 %v2760_v19, %v2686_v35  ;;  %v2720_v6 = vrot.slane %v1547_v24, 2 }
 0x245   : > { %v2525_v7 = vmax.f32 %v2523_v32, %v2524_v43  ;;  %v2528_v0 = vmax.f32 %v2442_v21, %v2477_v42  ;;  %v2352_v36 = vsel %vm2332_vm0, %v2311_v33, %v2312_v5  ;;  %v2663_v1 = vsel %vm1924_vm3, %v2623_v8, %v2624_v11 }
 0x246   : > { %v2376_v51 = vadd.f32 %v2352_v36, %v5026_v63  ;;  %v2687_v57 = vadd.f32 %v2663_v1, %v1284_v52  ;;  %v2759_v48 = vsel %vm2332_vm0, %v2719_v17, %v2720_v6  ;;  %v1294_v38 = vpop.f32.mrb[90].mxu0  ;;  %v1551_v31 = vpop.f32.mrb[90].mxu1  ;;  %v2444_v3 = vmax.f32 %v2412_v55, 0.0 }
 0x247   : > { %v2529_v50 = vrot.slane %v2528_v0, 4  ;;  %v2313_v35 = vrot.slane %v1294_v38, 2  ;;  %v2625_v19 = vrot.slane %v1551_v31, 1  ;;  %v1296_v45 = vpop.f32.mrb[91].mxu0  ;;  %v1553_v32 = vpop.f32.mrb[91].mxu1  ;;  %v2526_v21 = vrot.slane %v2525_v7, 1 }
 0x248   : > { %v2413_v33 = vadd.f32 %v5378_v30, %v2376_v51  ;;  %v5518_v43 = vadd.f32 %v2759_v48, %v2687_v57  ;;  %v2721_v8 = vrot.slane %v1553_v32, 2 }
 0x249   : > { %v2530_v24 = vmax.f32 %v2528_v0, %v2529_v50  ;;  %v2351_v63 = vsel %vm2332_vm0, %v2312_v5, %v2313_v35  ;;  %v2662_v52 = vsel %vm1924_vm3, %v2624_v11, %v2625_v19  ;;  %v2527_v17 = vmax.f32 %v2525_v7, %v2526_v21 }
 0x24a   : > { %v2445_v42 = vmax.f32 %v2413_v33, 0.0  ;;  %v2377_v36 = vadd.f32 %v2351_v63, %v5037_v20  ;;  %v2688_v1 = vadd.f32 %v2662_v52, %v1290_v9  ;;  %v2758_v55 = vsel %vm2332_vm0, %v2720_v6, %v2721_v8  ;;  %v1300_v38 = vpop.f32.mrb[92].mxu0  ;;  %v1557_v51 = vpop.f32.mrb[92].mxu1 }
 0x24b   : > { %v2531_v57 = vrot.slane %v2530_v24, 2  ;;  %v2314_v48 = vrot.slane %v1300_v38, 2  ;;  %v2626_v31 = vrot.slane %v1557_v51, 1  ;;  %v1302_v0 = vpop.f32.mrb[93].mxu0  ;;  %v1559_v50 = vpop.f32.mrb[93].mxu1  ;;  %v3173_v5 = vsel %vm3136_vm7, %v2527_v17, %v3172_v2 }
 0x24c   : > { %v2479_v11 = vsel %vm2467_vm12, %v2445_v42, 0.0  ;;  %v2414_v7 = vadd.f32 %v5378_v30, %v2377_v36  ;;  %v5531_v32 = vadd.f32 %v2758_v55, %v2688_v1  ;;  %v2722_v20 = vrot.slane %v1559_v50, 2 }
 0x24d   : > { %v2535_v9 = vmax.f32 %v2444_v3, %v2479_v11  ;;  %v2350_v6 = vsel %vm2332_vm0, %v2313_v35, %v2314_v48  ;;  %v2661_v21 = vsel %vm1924_vm3, %v2625_v19, %v2626_v31  ;;  %v2532_v33 = vmax.f32 %v2530_v24, %v2531_v57 }
 0x24e   : > { %v2378_v63 = vadd.f32 %v2350_v6, %v5063_v34  ;;  %v2689_v52 = vadd.f32 %v2661_v21, %v1296_v45  ;;  %v2757_v2 = vsel %vm2332_vm0, %v2721_v8, %v2722_v20  ;;  %v1306_v17 = vpop.f32.mrb[94].mxu0  ;;  %v1563_v42 = vpop.f32.mrb[94].mxu1  ;;  %v2446_v50 = vmax.f32 %v2414_v7, 0.0 }
 0x24f   : > { %v2536_v36 = vrot.slane %v2535_v9, 4  ;;  %v2315_v1 = vrot.slane %v1306_v17, 2  ;;  %v2627_v55 = vrot.slane %v1563_v42, 1  ;;  %v1308_v38 = vpop.f32.mrb[95].mxu0  ;;  %v1565_v3 = vpop.f32.mrb[95].mxu1  ;;  %v2533_v51 = vrot.slane %v2532_v33, 1 }
 0x250   : > { %v2415_v35 = vadd.f32 %v5378_v30, %v2378_v63  ;;  %v5541_v11 = vadd.f32 %v2757_v2, %v2689_v52  ;;  %v2723_v19 = vrot.slane %v1565_v3, 2 }
 0x251   : > { %v2537_v24 = vmax.f32 %v2535_v9, %v2536_v36  ;;  %v2349_v34 = vsel %vm2332_vm0, %v2314_v48, %v2315_v1  ;;  %v2660_v45 = vsel %vm1924_vm3, %v2626_v31, %v2627_v55  ;;  %v2534_v8 = vmax.f32 %v2532_v33, %v2533_v51 }
 0x252   : > { %v2447_v57 = vmax.f32 %v2415_v35, 0.0  ;;  %v2379_v6 = vadd.f32 %v2349_v34, %v5086_v28  ;;  %v2690_v21 = vadd.f32 %v2660_v45, %v1302_v0  ;;  %v2756_v7 = vsel %vm2332_vm0, %v2722_v20, %v2723_v19  ;;  %v1312_v17 = vpop.f32.mrb[96].mxu0  ;;  %v1569_v63 = vpop.f32.mrb[96].mxu1  ;;  %v3252_v34 = vld [vmem:[%s6112_s3 + $0x108] sm:$0xff] }
 0x253   : > { %v2316_v52 = vrot.slane %v1312_v17, 2  ;;  %v2628_v2 = vrot.slane %v1569_v63, 1  ;;  %v1314_v42 = vpop.f32.mrb[97].mxu0  ;;  %v1571_v9 = vpop.f32.mrb[97].mxu1  ;;  %v2538_v36 = vrot.slane %v2537_v24, 2  ;;  %v3174_v48 = vsel %vm3138_vm8, %v2534_v8, %v3173_v5  ;;  %v3251_v5 = vld [vmem:[%s6112_s3 + $0x100] sm:$0xff] }
 0x254   : > { %v2481_v31 = vsel %vm2467_vm12, %v2447_v57, 0.0  ;;  %v2416_v33 = vadd.f32 %v5378_v30, %v2379_v6  ;;  %v5554_v3 = vadd.f32 %v2756_v7, %v2690_v21  ;;  %v2724_v28 = vrot.slane %v1571_v9, 2 }
 0x255   : > { %v2542_v0 = vmax.f32 %v2446_v50, %v2481_v31  ;;  %v2348_v20 = vsel %vm2332_vm0, %v2315_v1, %v2316_v52  ;;  %v2659_v51 = vsel %vm1924_vm3, %v2627_v55, %v2628_v2  ;;  %v2539_v35 = vmax.f32 %v2537_v24, %v2538_v36 }
 0x256   : > { %v2448_v45 = vmax.f32 %v2416_v33, 0.0  ;;  %v2380_v8 = vadd.f32 %v2348_v20, %v5112_v25  ;;  %v2691_v57 = vadd.f32 %v2659_v51, %v1308_v38  ;;  %v2755_v50 = vsel %vm2332_vm0, %v2723_v19, %v2724_v28  ;;  %v1318_v1 = vpop.f32.mrb[98].mxu0  ;;  %v1575_v6 = vpop.f32.mrb[98].mxu1 }
 0x257   : > { %v2543_v21 = vrot.slane %v2542_v0, 4  ;;  %v2317_v55 = vrot.slane %v1318_v1, 2  ;;  %v2629_v24 = vrot.slane %v1575_v6, 1  ;;  %v1320_v7 = vpop.f32.mrb[99].mxu0  ;;  %v1577_v17 = vpop.f32.mrb[99].mxu1  ;;  %v2540_v63 = vrot.slane %v2539_v35, 1 }
 0x258   : > { %v2417_v9 = vadd.f32 %v5378_v30, %v2380_v8  ;;  %v5570_v36 = vadd.f32 %v2755_v50, %v2691_v57  ;;  %v2725_v31 = vrot.slane %v1577_v17, 2  ;;  %v5572_v33 = vpack.c.bf16 %v3252_v34, %v3251_v5 }
 0x259   : > { %v2347_v25 = vsel %vm2332_vm0, %v2316_v52, %v2317_v55  ;;  %v2658_v38 = vsel %vm1924_vm3, %v2628_v2, %v2629_v24  ;;  %v2541_v19 = vmax.f32 %v2539_v35, %v2540_v63  ;;  %v2544_v20 = vmax.f32 %v2542_v0, %v2543_v21 }
 0x25a   : > { %6162 = vst [vmem:[#allocation13_spill] sm:$0xff] %v5570_v36  ;;  %v2449_v51 = vmax.f32 %v2417_v9, 0.0  ;;  %v2381_v1 = vadd.f32 %v2347_v25, %v5135_v23  ;;  %v2692_v6 = vadd.f32 %v2658_v38, %v1314_v42  ;;  %v2754_v8 = vsel %vm2332_vm0, %v2724_v28, %v2725_v31  ;;  %v1324_v57 = vpop.f32.mrb[100].mxu0  ;;  %v1581_v50 = vpop.f32.mrb[100].mxu1  ;;  %4033 = vmatprep.subr.bf16.mxu1 %v5572_v33 }
 0x25b   : > { %v2318_v5 = vrot.slane %v1324_v57, 2  ;;  %v2630_v34 = vrot.slane %v1581_v50, 1  ;;  %v1326_v17 = vpop.f32.mrb[101].mxu0  ;;  %v1583_v52 = vpop.f32.mrb[101].mxu1  ;;  %v2545_v36 = vrot.slane %v2544_v20, 2  ;;  %v3175_v2 = vsel %vm3140_vm9, %v2541_v19, %v3174_v48 }
 0x25c   : > { %v2483_v0 = vsel %vm2467_vm12, %v2449_v51, 0.0  ;;  %v2418_v23 = vadd.f32 %v5378_v30, %v2381_v1  ;;  %v5586_v42 = vadd.f32 %v2754_v8, %v2692_v6  ;;  %v2726_v35 = vrot.slane %v1583_v52, 2 }
 0x25d   : > { %v2549_v28 = vmax.f32 %v2448_v45, %v2483_v0  ;;  %v2346_v21 = vsel %vm2332_vm0, %v2317_v55, %v2318_v5  ;;  %v2657_v63 = vsel %vm1924_vm3, %v2629_v24, %v2630_v34  ;;  %v2546_v9 = vmax.f32 %v2544_v20, %v2545_v36 }
 0x25e   : > { %v2382_v25 = vadd.f32 %v2346_v21, %v5161_v29  ;;  %v2693_v38 = vadd.f32 %v2657_v63, %v1320_v7  ;;  %v2753_v48 = vsel %vm2332_vm0, %v2725_v31, %v2726_v35  ;;  %v1330_v19 = vpop.f32.mrb[102].mxu0  ;;  %v1587_v51 = vpop.f32.mrb[102].mxu1  ;;  %v2450_v52 = vmax.f32 %v2418_v23, 0.0 }
 0x25f   : > { %v2319_v1 = vrot.slane %v1330_v19, 2  ;;  %v2631_v6 = vrot.slane %v1587_v51, 1  ;;  %v1332_v8 = vpop.f32.mrb[103].mxu0  ;;  %v1589_v57 = vpop.f32.mrb[103].mxu1  ;;  %v2547_v45 = vrot.slane %v2546_v9, 1  ;;  %v2550_v50 = vrot.slane %v2549_v28, 4 }
 0x260   : > { %v2419_v55 = vadd.f32 %v5378_v30, %v2382_v25  ;;  %v5596_v0 = vadd.f32 %v2753_v48, %v2693_v38  ;;  %v2727_v24 = vrot.slane %v1589_v57, 2 }
 0x261   : > { %v2345_v29 = vsel %vm2332_vm0, %v2318_v5, %v2319_v1  ;;  %v2656_v7 = vsel %vm1924_vm3, %v2630_v34, %v2631_v6  ;;  %v2548_v36 = vmax.f32 %v2546_v9, %v2547_v45  ;;  %v2551_v31 = vmax.f32 %v2549_v28, %v2550_v50 }
 0x262   : > { %6163 = vst [vmem:[#allocation14_spill] sm:$0xff] %v5596_v0  ;;  %v2451_v20 = vmax.f32 %v2419_v55, 0.0  ;;  %v2383_v21 = vadd.f32 %v2345_v29, %v5184_v44  ;;  %v2694_v63 = vadd.f32 %v2656_v7, %v1326_v17  ;;  %v2752_v23 = vsel %vm2332_vm0, %v2726_v35, %v2727_v24  ;;  %v1336_v19 = vpop.f32.mrb[104].mxu0  ;;  %v1593_v25 = vpop.f32.mrb[104].mxu1  ;;  %v3254_v55 = vld [vmem:[%s6112_s3 + $0x118] sm:$0xff] }
 0x263   : > { %v2320_v38 = vrot.slane %v1336_v19, 2  ;;  %v2632_v48 = vrot.slane %v1593_v25, 1  ;;  %v1338_v51 = vpop.f32.mrb[105].mxu0  ;;  %v1595_v57 = vpop.f32.mrb[105].mxu1  ;;  %v2552_v0 = vrot.slane %v2551_v31, 2  ;;  %v3176_v5 = vsel %vm3142_vm10, %v2548_v36, %v3175_v2  ;;  %v3253_v2 = vld [vmem:[%s6112_s3 + $0x110] sm:$0xff] }
 0x264   : > { %v2485_v34 = vsel %vm2467_vm12, %v2451_v20, 0.0  ;;  %v2420_v28 = vadd.f32 %v5378_v30, %v2383_v21  ;;  %v5609_v9 = vadd.f32 %v2752_v23, %v2694_v63  ;;  %v2728_v44 = vrot.slane %v1595_v57, 2 }
 0x265   : > { %v2556_v17 = vmax.f32 %v2450_v52, %v2485_v34  ;;  %v2344_v35 = vsel %vm2332_vm0, %v2319_v1, %v2320_v38  ;;  %v2655_v45 = vsel %vm1924_vm3, %v2631_v6, %v2632_v48  ;;  %v2553_v50 = vmax.f32 %v2551_v31, %v2552_v0 }
 0x266   : > { %v2452_v29 = vmax.f32 %v2420_v28, 0.0  ;;  %v2384_v7 = vadd.f32 %v2344_v35, %v5210_v61  ;;  %v2695_v36 = vadd.f32 %v2655_v45, %v1332_v8  ;;  %v2751_v52 = vsel %vm2332_vm0, %v2727_v24, %v2728_v44  ;;  %v1342_v1 = vpop.f32.mrb[106].mxu0  ;;  %v1599_v20 = vpop.f32.mrb[106].mxu1 }
 0x267   : > { %v2557_v21 = vrot.slane %v2556_v17, 4  ;;  %v2321_v6 = vrot.slane %v1342_v1, 2  ;;  %v2633_v0 = vrot.slane %v1599_v20, 1  ;;  %v1344_v31 = vpop.f32.mrb[107].mxu0  ;;  %v1601_v63 = vpop.f32.mrb[107].mxu1  ;;  %v2554_v23 = vrot.slane %v2553_v50, 1 }
 0x268   : > { %v2421_v19 = vadd.f32 %v5378_v30, %v2384_v7  ;;  %v5625_v25 = vadd.f32 %v2751_v52, %v2695_v36  ;;  %v2729_v57 = vrot.slane %v1601_v63, 2  ;;  %v4036_v34 = vpack.c.bf16 %v3254_v55, %v3253_v2 }
 0x269   : > { %v2558_v28 = vmax.f32 %v2556_v17, %v2557_v21  ;;  %v2343_v61 = vsel %vm2332_vm0, %v2320_v38, %v2321_v6  ;;  %v2654_v8 = vsel %vm1924_vm3, %v2632_v48, %v2633_v0  ;;  %v2555_v24 = vmax.f32 %v2553_v50, %v2554_v23 }
 0x26a   : > { %v2453_v35 = vmax.f32 %v2421_v19, 0.0  ;;  %v2385_v45 = vadd.f32 %v2343_v61, %v5233_v54  ;;  %v2696_v1 = vadd.f32 %v2654_v8, %v1338_v51  ;;  %v2750_v20 = vsel %vm2332_vm0, %v2728_v44, %v2729_v57  ;;  %v1348_v7 = vpop.f32.mrb[108].mxu0  ;;  %v1605_v36 = vpop.f32.mrb[108].mxu1  ;;  %v3256_v61 = vld [vmem:[%s6112_s3 + $0x128] sm:$0xff] }
 0x26b   : > { %v2559_v52 = vrot.slane %v2558_v28, 2  ;;  %v2322_v63 = vrot.slane %v1348_v7, 2  ;;  %v2634_v2 = vrot.slane %v1605_v36, 1  ;;  %v1350_v17 = vpop.f32.mrb[109].mxu0  ;;  %v1607_v55 = vpop.f32.mrb[109].mxu1  ;;  %v3177_v38 = vsel %vm3144_vm11, %v2555_v24, %v3176_v5  ;;  %v3255_v5 = vld [vmem:[%s6112_s3 + $0x120] sm:$0xff] }
 0x26c   : > { %v2487_v48 = vsel %vm2467_vm12, %v2453_v35, 0.0  ;;  %v2422_v50 = vadd.f32 %v5378_v30, %v2385_v45  ;;  %v5638_v21 = vadd.f32 %v2750_v20, %v2696_v1  ;;  %v2730_v54 = vrot.slane %v1607_v55, 2  ;;  %3338 = vmatprep.mubr.f32.mxu1 %v3177_v38 }
 0x26d   : > { %v2560_v51 = vmax.f32 %v2558_v28, %v2559_v52  ;;  %v2563_v44 = vmax.f32 %v2452_v29, %v2487_v48  ;;  %v2342_v23 = vsel %vm2332_vm0, %v2321_v6, %v2322_v63  ;;  %v2653_v19 = vsel %vm1924_vm3, %v2633_v0, %v2634_v2  ;;  %3339 = vmatmul.mubr.f32.vlgmr.msra.gmra.mrb[128].mxu1 %v5242_v60 }
 0x26e   : > { %v2454_v8 = vmax.f32 %v2422_v50, 0.0  ;;  %v2386_v28 = vadd.f32 %v2342_v23, %v5248_v10  ;;  %v2697_v29 = vadd.f32 %v2653_v19, %v1344_v31  ;;  %v2749_v6 = vsel %vm2332_vm0, %v2729_v57, %v2730_v54  ;;  %v1354_v24 = vpop.f32.mrb[110].mxu0  ;;  %v1611_v35 = vpop.f32.mrb[110].mxu1  ;;  %4035 = vmatpush3.bf16.msra.mxu1 %v5572_v33  ;;  %v3257_v57 = vld [vmem:[%s6112_s3 + $0x130] sm:$0xff]  ;;  %v3258_v33 = vld [vmem:[%s6112_s3 + $0x138] sm:$0xff] }
 0x26f   : > { %v2561_v60 = vrot.slane %v2560_v51, 1  ;;  %v2564_v0 = vrot.slane %v2563_v44, 4  ;;  %v2323_v45 = vrot.slane %v1354_v24, 2  ;;  %v2635_v1 = vrot.slane %v1611_v35, 1  ;;  %v1356_v20 = vpop.f32.mrb[111].mxu0  ;;  %v1613_v7 = vpop.f32.mrb[111].mxu1  ;;  %4037 = vmatprep.subr.bf16.mxu1 %v4036_v34 }
 0x270   : > { %v2423_v36 = vadd.f32 %v5378_v30, %v2386_v28  ;;  %v5656_v52 = vadd.f32 %v2749_v6, %v2697_v29  ;;  %v2731_v10 = vrot.slane %v1613_v7, 2  ;;  %v4040_v31 = vpack.c.bf16 %v3256_v61, %v3255_v5 }
 0x271   : > { %v5664_v55 = vmax.f32 %v2560_v51, %v2561_v60  ;;  %v2565_v38 = vmax.f32 %v2563_v44, %v2564_v0  ;;  %v2341_v48 = vsel %vm2332_vm0, %v2322_v63, %v2323_v45  ;;  %v2652_v50 = vsel %vm1924_vm3, %v2634_v2, %v2635_v1 }
 0x272   : > { %v2455_v23 = vmax.f32 %v2423_v36, 0.0  ;;  %v2387_v19 = vadd.f32 %v2341_v48, %v5260_v40  ;;  %v2698_v5 = vadd.f32 %v2652_v50, %v1350_v17  ;;  %v2748_v61 = vsel %vm2332_vm0, %v2730_v54, %v2731_v10  ;;  %v1360_v28 = vpop.f32.mrb[112].mxu0  ;;  %v1617_v29 = vpop.f32.mrb[112].mxu1  ;;  %4039 = vmatpush3.bf16.msra.mxu1 %v4036_v34  ;;  %v3259_v36 = vld [vmem:[%s6112_s3 + $0x140] sm:$0xff] }
 0x273   : > { %v2566_v6 = vrot.slane %v2565_v38, 2  ;;  %v2324_v51 = vrot.slane %v1360_v28, 2  ;;  %v2636_v24 = vrot.slane %v1617_v29, 1  ;;  %v1362_v44 = vpop.f32.mrb[113].mxu0  ;;  %v1619_v35 = vpop.f32.mrb[113].mxu1  ;;  %4041 = vmatprep.subr.bf16.mxu1 %v4040_v31  ;;  %v4044_v63 = vpack.c.bf16 %v3258_v33, %v3257_v57  ;;  %v3260_v57 = vld [vmem:[%s6112_s3 + $0x148] sm:$0xff] }
 0x274   : > { %v2489_v2 = vsel %vm2467_vm12, %v2455_v23, 0.0  ;;  %v2424_v60 = vadd.f32 %v5378_v30, %v2387_v19  ;;  %v5676_v40 = vadd.f32 %v2748_v61, %v2698_v5  ;;  %v2732_v17 = vrot.slane %v1619_v35, 2 }
 0x275   : > { %v2567_v0 = vmax.f32 %v2565_v38, %v2566_v6  ;;  %v2570_v54 = vmax.f32 %v2454_v8, %v2489_v2  ;;  %v2340_v34 = vsel %vm2332_vm0, %v2323_v45, %v2324_v51  ;;  %v2651_v7 = vsel %vm1924_vm3, %v2635_v1, %v2636_v24 }
 0x276   : > { %v2456_v33 = vmax.f32 %v2424_v60, 0.0  ;;  %v2388_v48 = vadd.f32 %v2340_v34, %v5273_v15  ;;  %v2699_v50 = vadd.f32 %v2651_v7, %v1356_v20  ;;  %v2747_v8 = vsel %vm2332_vm0, %v2731_v10, %v2732_v17  ;;  %v1366_v38 = vpop.f32.mrb[114].mxu0  ;;  %v1623_v45 = vpop.f32.mrb[114].mxu1  ;;  %4043 = vmatpush3.bf16.msra.mxu1 %v4040_v31 }
 0x277   : > { %v2568_v23 = vrot.slane %v2567_v0, 1  ;;  %v2571_v1 = vrot.slane %v2570_v54, 4  ;;  %v2325_v19 = vrot.slane %v1366_v38, 2  ;;  %v2637_v5 = vrot.slane %v1623_v45, 1  ;;  %v1368_v61 = vpop.f32.mrb[115].mxu0  ;;  %v1625_v28 = vpop.f32.mrb[115].mxu1  ;;  %4045 = vmatprep.subr.bf16.mxu1 %v4044_v63 }
 0x278   : > { %v2425_v29 = vadd.f32 %v5378_v30, %v2388_v48  ;;  %v5692_v6 = vadd.f32 %v2747_v8, %v2699_v50  ;;  %v2733_v35 = vrot.slane %v1625_v28, 2  ;;  %v4048_v15 = vpack.c.bf16 %v3260_v57, %v3259_v36  ;;  %v3262_v28 = vld [vmem:[%s6112_s3 + $0x158] sm:$0xff] }
 0x279   : > { %v2569_v20 = vmax.f32 %v2567_v0, %v2568_v23  ;;  %v2572_v2 = vmax.f32 %v2570_v54, %v2571_v1  ;;  %v2339_v10 = vsel %vm2332_vm0, %v2324_v51, %v2325_v19  ;;  %v2650_v31 = vsel %vm1924_vm3, %v2636_v24, %v2637_v5 }
 0x27a   : > { %v2457_v60 = vmax.f32 %v2425_v29, 0.0  ;;  %v2389_v34 = vadd.f32 %v2339_v10, %v5284_v4  ;;  %v2700_v7 = vadd.f32 %v2650_v31, %v1362_v44  ;;  %v2746_v38 = vsel %vm2332_vm0, %v2732_v17, %v2733_v35  ;;  %v1372_v48 = vpop.f32.mrb[116].mxu0  ;;  %v1629_v50 = vpop.f32.mrb[116].mxu1  ;;  %4047 = vmatpush3.bf16.msra.mxu1 %v4044_v63 }
 0x27b   : > { %v2573_v8 = vrot.slane %v2572_v2, 2  ;;  %v2326_v36 = vrot.slane %v1372_v48, 2  ;;  %v2638_v0 = vrot.slane %v1629_v50, 1  ;;  %v1374_v54 = vpop.f32.mrb[117].mxu0  ;;  %v1631_v57 = vpop.f32.mrb[117].mxu1  ;;  %v3178_v51 = vsel %vm3132_vm5, %v2569_v20, %v5664_v55  ;;  %4049 = vmatprep.subr.bf16.mxu1 %v4048_v15  ;;  %v3261_v55 = vld [vmem:[%s6112_s3 + $0x150] sm:$0xff] }
 0x27c   : > { %v2491_v24 = vsel %vm2467_vm12, %v2457_v60, 0.0  ;;  %v2426_v4 = vadd.f32 %v5378_v30, %v2389_v34  ;;  %v5706_v44 = vadd.f32 %v2746_v38, %v2700_v7  ;;  %v2734_v17 = vrot.slane %v1631_v57, 2  ;;  %v5724_v38 = vld [vmem:[%s6111_s2 + $0x1] ss:$0 sm:$0xff] }
 0x27d   : > { %v2574_v45 = vmax.f32 %v2572_v2, %v2573_v8  ;;  %v2577_v23 = vmax.f32 %v2456_v33, %v2491_v24  ;;  %v2338_v63 = vsel %vm2332_vm0, %v2325_v19, %v2326_v36  ;;  %v2649_v1 = vsel %vm1924_vm3, %v2637_v5, %v2638_v0 }
 0x27e   : > { %v2458_v30 = vmax.f32 %v2426_v4, 0.0  ;;  %v2390_v29 = vadd.f32 %v2338_v63, %v5301_v58  ;;  %v2701_v20 = vadd.f32 %v2649_v1, %v1368_v61  ;;  %v2745_v33 = vsel %vm2332_vm0, %v2733_v35, %v2734_v17  ;;  %v1378_v2 = vpop.f32.mrb[118].mxu0  ;;  %v1635_v19 = vpop.f32.mrb[118].mxu1  ;;  %4051 = vmatpush3.bf16.msra.mxu1 %v4048_v15 }
 0x27f   : > { %v2575_v10 = vrot.slane %v2574_v45, 1  ;;  %v2578_v5 = vrot.slane %v2577_v23, 4  ;;  %v2327_v31 = vrot.slane %v1378_v2, 2  ;;  %v2639_v60 = vrot.slane %v1635_v19, 1  ;;  %v1380_v34 = vpop.f32.mrb[119].mxu0  ;;  %v1637_v7 = vpop.f32.mrb[119].mxu1 }
 0x280   : > { %v2427_v58 = vadd.f32 %v5724_v38, %v2390_v29  ;;  %v5727_v61 = vadd.f32 %v2745_v33, %v2701_v20  ;;  %v2735_v48 = vrot.slane %v1637_v7, 2  ;;  %v4052_v35 = vpack.c.bf16 %v3262_v28, %v3261_v55  ;;  %v3264_v7 = vld [vmem:[%s6112_s3 + $0x168] sm:$0xff] }
 0x281   : > { %v2579_v50 = vmax.f32 %v2577_v23, %v2578_v5  ;;  %v2337_v15 = vsel %vm2332_vm0, %v2326_v36, %v2327_v31  ;;  %v2648_v8 = vsel %vm1924_vm3, %v2638_v0, %v2639_v60  ;;  %v2576_v57 = vmax.f32 %v2574_v45, %v2575_v10 }
 0x282   : > { %v2459_v24 = vmax.f32 %v2427_v58, 0.0  ;;  %v2391_v4 = vadd.f32 %v2337_v15, %v5308_v62  ;;  %v2702_v63 = vadd.f32 %v2648_v8, %v1374_v54  ;;  %v2744_v1 = vsel %vm2332_vm0, %v2734_v17, %v2735_v48  ;;  %v1384_v29 = vpop.f32.mrb[120].mxu0  ;;  %v1641_v20 = vpop.f32.mrb[120].mxu1  ;;  %4053 = vmatprep.subr.bf16.mxu1 %v4052_v35 }
 0x283   : > { %v2580_v33 = vrot.slane %v2579_v50, 2  ;;  %v2328_v55 = vrot.slane %v1384_v29, 2  ;;  %v2640_v23 = vrot.slane %v1641_v20, 1  ;;  %v1386_v28 = vpop.f32.mrb[121].mxu0  ;;  %v1643_v2 = vpop.f32.mrb[121].mxu1  ;;  %v3179_v36 = vsel %vm3134_vm6, %v2576_v57, %v3178_v51  ;;  %4055 = vmatpush3.bf16.msra.mxu1 %v4052_v35  ;;  %v3263_v51 = vld [vmem:[%s6112_s3 + $0x160] sm:$0xff] }
 0x284   : > { %v2493_v0 = vsel %vm2467_vm12, %v2459_v24, 0.0  ;;  %v2428_v62 = vadd.f32 %v5724_v38, %v2391_v4  ;;  %v5740_v54 = vadd.f32 %v2744_v1, %v2702_v63  ;;  %v2736_v45 = vrot.slane %v1643_v2, 2 }
 0x285   : > { %v2581_v17 = vmax.f32 %v2579_v50, %v2580_v33  ;;  %v2584_v19 = vmax.f32 %v2458_v30, %v2493_v0  ;;  %v2336_v10 = vsel %vm2332_vm0, %v2327_v31, %v2328_v55  ;;  %v2647_v5 = vsel %vm1924_vm3, %v2639_v60, %v2640_v23 }
 0x286   : > { %v2460_v58 = vmax.f32 %v2428_v62, 0.0  ;;  %v2392_v35 = vadd.f32 %v2336_v10, %v5318_v39  ;;  %v2703_v15 = vadd.f32 %v2647_v5, %v1380_v34  ;;  %v2743_v30 = vsel %vm2332_vm0, %v2735_v48, %v2736_v45  ;;  %v1390_v50 = vpop.f32.mrb[122].mxu0  ;;  %v1647_v31 = vpop.f32.mrb[122].mxu1 }
 0x287   : > { %v2585_v8 = vrot.slane %v2584_v19, 4  ;;  %v2329_v57 = vrot.slane %v1390_v50, 2  ;;  %v2641_v60 = vrot.slane %v1647_v31, 1  ;;  %v1392_v24 = vpop.f32.mrb[123].mxu0  ;;  %v1649_v4 = vpop.f32.mrb[123].mxu1  ;;  %v2582_v63 = vrot.slane %v2581_v17, 1 }
 0x288   : > { %v2429_v1 = vadd.f32 %v5724_v38, %v2392_v35  ;;  %v5756_v29 = vadd.f32 %v2743_v30, %v2703_v15  ;;  %v2737_v20 = vrot.slane %v1649_v4, 2  ;;  %v4056_v33 = vpack.c.bf16 %v3264_v7, %v3263_v51  ;;  %v3265_v4 = vld [vmem:[%s6112_s3 + $0x170] sm:$0xff] }
 0x289   : > { %v2586_v2 = vmax.f32 %v2584_v19, %v2585_v8  ;;  %v2335_v39 = vsel %vm2332_vm0, %v2328_v55, %v2329_v57  ;;  %v2646_v34 = vsel %vm1924_vm3, %v2640_v23, %v2641_v60  ;;  %v2583_v48 = vmax.f32 %v2581_v17, %v2582_v63  ;;  %v3266_v63 = vld [vmem:[%s6112_s3 + $0x178] sm:$0xff] }
 0x28a   : > { %v2461_v0 = vmax.f32 %v2429_v1, 0.0  ;;  %v2393_v62 = vadd.f32 %v2335_v39, %v5325_v46  ;;  %v2704_v10 = vadd.f32 %v2646_v34, %v1386_v28  ;;  %v2742_v5 = vsel %vm2332_vm0, %v2736_v45, %v2737_v20  ;;  %v1396_v35 = vpop.f32.mrb[124].mxu0  ;;  %v1653_v15 = vpop.f32.mrb[124].mxu1  ;;  %4057 = vmatprep.subr.bf16.mxu1 %v4056_v33 }
 0x28b   : > { %v2587_v30 = vrot.slane %v2586_v2, 2  ;;  %v2330_v51 = vrot.slane %v1396_v35, 2  ;;  %v2642_v19 = vrot.slane %v1653_v15, 1  ;;  %v1398_v7 = vpop.f32.mrb[125].mxu0  ;;  %v1655_v50 = vpop.f32.mrb[125].mxu1  ;;  %v5766_v55 = vsel %vm3136_vm7, %v2583_v48, %v3179_v36  ;;  %4059 = vmatpush3.bf16.msra.mxu1 %v4056_v33 }
 0x28c   : > { %v2495_v46 = vsel %vm2467_vm12, %v2461_v0, 0.0  ;;  %v2430_v23 = vadd.f32 %v5724_v38, %v2393_v62  ;;  %v5772_v28 = vadd.f32 %v2742_v5, %v2704_v10  ;;  %v2738_v45 = vrot.slane %v1655_v50, 2 }
 0x28d   : > { %v2591_v17 = vmax.f32 %v2460_v58, %v2495_v46  ;;  %v2334_v31 = vsel %vm2332_vm0, %v2329_v57, %v2330_v51  ;;  %v2645_v8 = vsel %vm1924_vm3, %v2641_v60, %v2642_v19  ;;  %v2588_v36 = vmax.f32 %v2586_v2, %v2587_v30 }
 0x28e   : > { %v2462_v1 = vmax.f32 %v2430_v23, 0.0  ;;  %v2394_v33 = vadd.f32 %v2334_v31, %v5334_v12  ;;  %v2705_v39 = vadd.f32 %v2645_v8, %v1392_v24  ;;  %v2741_v58 = vsel %vm2332_vm0, %v2737_v20, %v2738_v45  ;;  %v1402_v57 = vpop.f32.mrb[126].mxu0  ;;  %v1659_v34 = vpop.f32.mrb[126].mxu1 }
 0x28f   : > { %v2592_v48 = vrot.slane %v2591_v17, 4  ;;  %v2331_v60 = vrot.slane %v1402_v57, 2  ;;  %v2643_v2 = vrot.slane %v1659_v34, 1  ;;  %v1404_v0 = vpop.f32.mrb[127].mxu0  ;;  %v1661_v62 = vpop.f32.mrb[127].mxu1  ;;  %v2589_v10 = vrot.slane %v2588_v36, 1 }
 0x290   : > { %v2431_v5 = vadd.f32 %v5724_v38, %v2394_v33  ;;  %v5788_v35 = vadd.f32 %v2741_v58, %v2705_v39  ;;  %v2739_v15 = vrot.slane %v1661_v62, 2  ;;  %v4060_v30 = vpack.c.bf16 %v3266_v63, %v3265_v4 }
 0x291   : > { %v2593_v50 = vmax.f32 %v2591_v17, %v2592_v48  ;;  %v2333_v12 = vsel %vm2332_vm0, %v2330_v51, %v2331_v60  ;;  %v6164_v24 = vrot.slane %v5347_v37, 2  ;;  %v2644_v46 = vsel %vm1924_vm3, %v2642_v19, %v2643_v2 }
 0x292   : > { %v2463_v23 = vmax.f32 %v2431_v5, 0.0  ;;  %v2395_v31 = vadd.f32 %v2333_v12, %v5357_v53  ;;  %v2706_v33 = vadd.f32 %v2644_v46, %v1398_v7  ;;  %v3839_v39 = vpop.f32.mrb[128].mxu0  ;;  %4061 = vmatprep.subr.bf16.mxu1 %v4060_v30  ;;  %v6165_v17 = vrot.slane %v5349_v59, 1  ;;  %v5833_v46 = vld [vmem:[%s6111_s2 + $0x2] ss:$0 sm:$0xff] }
 0x293   : > { %v2364_v20 = vsel %vm2332_vm0, %v2331_v60, %v6164_v24  ;;  %v2740_v37 = vsel %vm2332_vm0, %v2738_v45, %v2739_v15  ;;  %v6166_v4 = vrot.slane %v5355_v16, 2  ;;  %v2805_v63 = vrot.slane %v3839_v39, 3  ;;  %v5810_v53 = vpop.f32.mrb[129].mxu0  ;;  %4063 = vmatpush3.bf16.msra.mxu1 %v4060_v30 }
 0x294   : > { %v2396_v8 = vadd.f32 %v2364_v20, %v5359_v27  ;;  %v2675_v51 = vsel %vm1924_vm3, %v2643_v2, %v6165_v17  ;;  %v2497_v27 = vsel %vm2467_vm12, %v2463_v23, 0.0  ;;  %v2432_v59 = vadd.f32 %v5724_v38, %v2395_v31 }
 0x295   : > { %v2771_v19 = vsel %vm2332_vm0, %v2739_v15, %v6166_v4  ;;  %v2707_v58 = vadd.f32 %v2675_v51, %v1404_v0  ;;  %v2598_v57 = vmax.f32 %v2462_v1, %v2497_v27  ;;  %v5816_v34 = vadd.f32 %v2740_v37, %v2706_v33 }
 0x296   : > { %v2433_v7 = vadd.f32 %v5724_v38, %v2396_v8  ;;  %v2804_v16 = vrot.slane %v5810_v53, 3  ;;  %v2590_v45 = vmax.f32 %v2588_v36, %v2589_v10  ;;  %v2464_v48 = vmax.f32 %v2432_v59, 0.0  ;;  %v3842_v62 = vpop.f32.mrb[130].mxu0 }
 0x297   : > { %v5819_v2 = vadd.f32 %v2771_v19, %v2707_v58  ;;  %v2594_v5 = vrot.slane %v2593_v50, 2  ;;  %v2599_v15 = vrot.slane %v2598_v57, 4  ;;  %v2807_v38 = vrot.slane %v3842_v62, 3  ;;  %v1740_v0 = vpop.f32.mrb[131].mxu0 }
 0x298   : > { %v2465_v60 = vmax.f32 %v2433_v7, 0.0  ;;  %v2867_v30 = vsel %vm2836_vm13, %v2804_v16, %v2805_v63  ;;  %v3181_v1 = vsel %vm3138_vm8, %v2590_v45, %v5766_v55  ;;  %v2806_v12 = vrot.slane %v1740_v0, 3 }
 0x299   : > { %v2869_v10 = vadd.f32 %v2867_v30, %v5390_v49  ;;  %v2595_v24 = vmax.f32 %v2593_v50, %v2594_v5  ;;  %v2600_v23 = vmax.f32 %v2598_v57, %v2599_v15  ;;  %v6167_v49 = vld [vmem:[#allocation8_spill] sm:$0xff]  ;;  %v6168_v15 = vld [vmem:[#allocation10_spill] sm:$0xff] }
 0x29a   : > { %v2499_v36 = vsel %vm2467_vm12, %v2465_v60, 0.0  ;;  %v2865_v31 = vsel %vm2836_vm13, %v2806_v12, %v2807_v38  ;;  %v2866_v55 = vsel %vm2836_vm13, %v2805_v63, %v2806_v12  ;;  %v3845_v8 = vpop.f32.mrb[132].mxu0 }
 0x29b   : > { %v2605_v20 = vmax.f32 %v2464_v48, %v2499_v36  ;;  %v2596_v33 = vrot.slane %v2595_v24, 1  ;;  %v2870_v39 = vadd.f32 %v2866_v55, %v5401_v18  ;;  %v2871_v17 = vadd.f32 %v2865_v31, %v6167_v49  ;;  %v1750_v51 = vpop.f32.mrb[133].mxu0 }
 0x29c   : > { %v2809_v50 = vrot.slane %v3845_v8, 3  ;;  %v2601_v37 = vrot.slane %v2600_v23, 2  ;;  %v2906_v4 = vadd.f32 %v5833_v46, %v2869_v10  ;;  %v2808_v19 = vrot.slane %v1750_v51, 3 }
 0x29d   : > { %v2597_v27 = vmax.f32 %v2595_v24, %v2596_v33  ;;  %v2606_v59 = vrot.slane %v2605_v20, 4  ;;  %v2907_v7 = vadd.f32 %v5833_v46, %v2870_v39  ;;  %v2908_v60 = vadd.f32 %v5833_v46, %v2871_v17  ;;  %v6169_v17 = vld [vmem:[#allocation11_spill] sm:$0xff] }
 0x29e   : > { %v2602_v58 = vmax.f32 %v2600_v23, %v2601_v37  ;;  %v2863_v63 = vsel %vm2836_vm13, %v2808_v19, %v2809_v50  ;;  %v2864_v18 = vsel %vm2836_vm13, %v2807_v38, %v2808_v19  ;;  %v3848_v57 = vpop.f32.mrb[134].mxu0  ;;  %v2938_v36 = vmax.f32 %v2906_v4, 0.0  ;;  %v6170_v37 = vld [vmem:[#allocation12_spill] sm:$0xff] }
 0x29f   : > { %v2607_v45 = vmax.f32 %v2605_v20, %v2606_v59  ;;  %v3182_v48 = vsel %vm3140_vm9, %v2597_v27, %v3181_v1  ;;  %v2939_v62 = vmax.f32 %v2907_v7, 0.0  ;;  %v2872_v5 = vadd.f32 %v2864_v18, %v5424_v56  ;;  %v1760_v0 = vpop.f32.mrb[135].mxu0 }
 0x2a0   : > { %v2873_v30 = vadd.f32 %v2863_v63, %v6168_v15  ;;  %v2811_v10 = vrot.slane %v3848_v57, 3  ;;  %v2810_v12 = vrot.slane %v1760_v0, 3  ;;  %v2603_v24 = vrot.slane %v2602_v58, 1 }
 0x2a1   : > { %v2973_v23 = vsel %vm2971_vm14, %v2939_v62, 0.0  ;;  %v2909_v38 = vadd.f32 %v5833_v46, %v2872_v5  ;;  %v2608_v1 = vrot.slane %v2607_v45, 2  ;;  %v2940_v39 = vmax.f32 %v2908_v60, 0.0 }
 0x2a2   : > { %v2910_v20 = vadd.f32 %v5833_v46, %v2873_v30  ;;  %v3004_v31 = vmax.f32 %v2938_v36, %v2973_v23  ;;  %v2861_v55 = vsel %vm2836_vm13, %v2810_v12, %v2811_v10  ;;  %v2862_v56 = vsel %vm2836_vm13, %v2809_v50, %v2810_v12  ;;  %v3851_v8 = vpop.f32.mrb[136].mxu0 }
 0x2a3   : > { %v2604_v33 = vmax.f32 %v2602_v58, %v2603_v24  ;;  %v2941_v49 = vmax.f32 %v2909_v38, 0.0  ;;  %v2874_v51 = vadd.f32 %v2862_v56, %v6169_v17  ;;  %v2875_v4 = vadd.f32 %v2861_v55, %v6170_v37  ;;  %v1770_v19 = vpop.f32.mrb[137].mxu0 }
 0x2a4   : > { %v3005_v27 = vrot.slane %v3004_v31, 4  ;;  %v2942_v59 = vmax.f32 %v2910_v20, 0.0  ;;  %v2813_v7 = vrot.slane %v3851_v8, 3  ;;  %v2812_v63 = vrot.slane %v1770_v19, 3 }
 0x2a5   : > { %v2975_v18 = vsel %vm2971_vm14, %v2941_v49, 0.0  ;;  %v2911_v57 = vadd.f32 %v5833_v46, %v2874_v51  ;;  %v2609_v62 = vmax.f32 %v2607_v45, %v2608_v1  ;;  %v3183_v50 = vsel %vm3142_vm10, %v2604_v33, %v3182_v48 }
 0x2a6   : > { %v3006_v58 = vmax.f32 %v3004_v31, %v3005_v27  ;;  %v3011_v60 = vmax.f32 %v2940_v39, %v2975_v18  ;;  %v2859_v5 = vsel %vm2836_vm13, %v2812_v63, %v2813_v7  ;;  %v2860_v15 = vsel %vm2836_vm13, %v2811_v10, %v2812_v63  ;;  %v3854_v30 = vpop.f32.mrb[138].mxu0 }
 0x2a7   : > { %v2912_v0 = vadd.f32 %v5833_v46, %v2875_v4  ;;  %v2943_v36 = vmax.f32 %v2911_v57, 0.0  ;;  %v2876_v12 = vadd.f32 %v2860_v15, %v5472_v13  ;;  %v2877_v24 = vadd.f32 %v2859_v5, %v5485_v14  ;;  %v1780_v23 = vpop.f32.mrb[139].mxu0 }
 0x2a8   : > { %v3007_v45 = vrot.slane %v3006_v58, 2  ;;  %v3012_v38 = vrot.slane %v3011_v60, 4  ;;  %v2815_v48 = vrot.slane %v3854_v30, 3  ;;  %v2814_v20 = vrot.slane %v1780_v23, 3 }
 0x2a9   : > { %v2977_v1 = vsel %vm2971_vm14, %v2943_v36, 0.0  ;;  %v2913_v31 = vadd.f32 %v5833_v46, %v2876_v12  ;;  %v2914_v10 = vadd.f32 %v5833_v46, %v2877_v24  ;;  %v2610_v55 = vrot.slane %v2609_v62, 1 }
 0x2aa   : > { %v3008_v56 = vmax.f32 %v3006_v58, %v3007_v45  ;;  %v3013_v8 = vmax.f32 %v3011_v60, %v3012_v38  ;;  %v3018_v33 = vmax.f32 %v2942_v59, %v2977_v1  ;;  %v2857_v13 = vsel %vm2836_vm13, %v2814_v20, %v2815_v48  ;;  %v3857_v14 = vpop.f32.mrb[140].mxu0 }
 0x2ab   : > { %v2944_v39 = vmax.f32 %v2912_v0, 0.0  ;;  %v2945_v49 = vmax.f32 %v2913_v31, 0.0  ;;  %v2858_v17 = vsel %vm2836_vm13, %v2813_v7, %v2814_v20  ;;  %v2879_v51 = vadd.f32 %v2857_v13, %v5508_v22  ;;  %v1790_v37 = vpop.f32.mrb[141].mxu0  ;;  %v6171_v20 = vld [vmem:[#allocation9_spill] sm:$0xff] }
 0x2ac   : > { %v3009_v4 = vrot.slane %v3008_v56, 1  ;;  %v3014_v19 = vrot.slane %v3013_v8, 2  ;;  %v3019_v27 = vrot.slane %v3018_v33, 4  ;;  %v2878_v63 = vadd.f32 %v2858_v17, %v5495_v47 }
 0x2ad   : > { %v2946_v18 = vmax.f32 %v2914_v10, 0.0  ;;  %v2979_v59 = vsel %vm2971_vm14, %v2945_v49, 0.0  ;;  %v2611_v57 = vmax.f32 %v2609_v62, %v2610_v55  ;;  %v2817_v58 = vrot.slane %v3857_v14, 3 }
 0x2ae   : > { %v3015_v60 = vmax.f32 %v3013_v8, %v3014_v19  ;;  %v3020_v5 = vmax.f32 %v3018_v33, %v3019_v27  ;;  %v3025_v15 = vmax.f32 %v2944_v39, %v2979_v59  ;;  %v2916_v30 = vadd.f32 %v5833_v46, %v2879_v51  ;;  %v3860_v7 = vpop.f32.mrb[142].mxu0 }
 0x2af   : > { %v5886_v0 = vmax.f32 %v3008_v56, %v3009_v4  ;;  %v2915_v22 = vadd.f32 %v5833_v46, %v2878_v63  ;;  %v3184_v36 = vsel %vm3144_vm11, %v2611_v57, %v3183_v50  ;;  %v2816_v12 = vrot.slane %v1790_v37, 3  ;;  %v1800_v47 = vpop.f32.mrb[143].mxu0 }
 0x2b0   : > { %v3016_v24 = vrot.slane %v3015_v60, 1  ;;  %v3021_v23 = vrot.slane %v3020_v5, 2  ;;  %v3026_v45 = vrot.slane %v3025_v15, 4  ;;  %3343 = vmatprep.mubr.f32.mxu1 %v3184_v36  ;;  %v2819_v62 = vrot.slane %v3860_v7, 3 }
 0x2b1   : > { %v2947_v38 = vmax.f32 %v2915_v22, 0.0  ;;  %3344 = vmatmul.mubr.f32.gmra.mrb[130].mxu1 %v6171_v20  ;;  %v2855_v1 = vsel %vm2836_vm13, %v2816_v12, %v2817_v58  ;;  %v2856_v31 = vsel %vm2836_vm13, %v2815_v48, %v2816_v12  ;;  %v2818_v10 = vrot.slane %v1800_v47, 3 }
 0x2b2   : > { %v3022_v55 = vmax.f32 %v3020_v5, %v3021_v23  ;;  %v3027_v56 = vmax.f32 %v3025_v15, %v3026_v45  ;;  %v2948_v50 = vmax.f32 %v2916_v30, 0.0  ;;  %v2880_v8 = vadd.f32 %v2856_v31, %v5518_v43  ;;  %v3863_v33 = vpop.f32.mrb[144].mxu0  ;;  %v6172_v23 = vld [vmem:[#allocation13_spill] sm:$0xff] }
 0x2b3   : > { %v2981_v13 = vsel %vm2971_vm14, %v2947_v38, 0.0  ;;  %v2881_v14 = vadd.f32 %v2855_v1, %v5531_v32  ;;  %v2853_v39 = vsel %vm2836_vm13, %v2818_v10, %v2819_v62  ;;  %v2854_v49 = vsel %vm2836_vm13, %v2817_v58, %v2818_v10  ;;  %v1810_v17 = vpop.f32.mrb[145].mxu0 }
 0x2b4   : > { %v5903_v48 = vmax.f32 %v3015_v60, %v3016_v24  ;;  %v3028_v51 = vrot.slane %v3027_v56, 2  ;;  %v3032_v37 = vmax.f32 %v2946_v18, %v2981_v13  ;;  %v2917_v4 = vadd.f32 %v5833_v46, %v2880_v8 }
 0x2b5   : > { %v2918_v43 = vadd.f32 %v5833_v46, %v2881_v14  ;;  %v2882_v19 = vadd.f32 %v2854_v49, %v5541_v11  ;;  %v2883_v27 = vadd.f32 %v2853_v39, %v5554_v3  ;;  %v2821_v32 = vrot.slane %v3863_v33, 3 }
 0x2b6   : > { %v3023_v63 = vrot.slane %v3022_v55, 1  ;;  %v3033_v59 = vrot.slane %v3032_v37, 4  ;;  %v2949_v57 = vmax.f32 %v2917_v4, 0.0  ;;  %v2820_v5 = vrot.slane %v1810_v17, 3  ;;  %v3866_v15 = vpop.f32.mrb[146].mxu0  ;;  %v6173_v17 = vld [vmem:[#allocation14_spill] sm:$0xff] }
 0x2b7   : > { %v5909_v58 = vmax.f32 %v3027_v56, %v3028_v51  ;;  %v2919_v60 = vadd.f32 %v5833_v46, %v2882_v19  ;;  %v2920_v18 = vadd.f32 %v5833_v46, %v2883_v27  ;;  %v2823_v30 = vrot.slane %v3866_v15, 3  ;;  %v1820_v7 = vpop.f32.mrb[147].mxu0 }
 0x2b8   : > { %v3034_v22 = vmax.f32 %v3032_v37, %v3033_v59  ;;  %v2983_v11 = vsel %vm2971_vm14, %v2949_v57, 0.0  ;;  %v2851_v3 = vsel %vm2836_vm13, %v2820_v5, %v2821_v32  ;;  %v2852_v36 = vsel %vm2836_vm13, %v2819_v62, %v2820_v5 }
 0x2b9   : > { %v2950_v12 = vmax.f32 %v2918_v43, 0.0  ;;  %v3039_v47 = vmax.f32 %v2948_v50, %v2983_v11  ;;  %v2951_v24 = vmax.f32 %v2919_v60, 0.0  ;;  %v2884_v45 = vadd.f32 %v2852_v36, %v6172_v23 }
 0x2ba   : > { %v3035_v38 = vrot.slane %v3034_v22, 2  ;;  %v2952_v20 = vmax.f32 %v2920_v18, 0.0  ;;  %v2885_v1 = vadd.f32 %v2851_v3, %v5586_v42  ;;  %v2822_v31 = vrot.slane %v1820_v7, 3  ;;  %v3869_v10 = vpop.f32.mrb[148].mxu0 }
 0x2bb   : > { %v3040_v56 = vrot.slane %v3039_v47, 4  ;;  %v2985_v8 = vsel %vm2971_vm14, %v2951_v24, 0.0  ;;  %v2921_v33 = vadd.f32 %v5833_v46, %v2884_v45  ;;  %v2825_v13 = vrot.slane %v3869_v10, 3  ;;  %v1830_v14 = vpop.f32.mrb[149].mxu0 }
 0x2bc   : > { %v5924_v62 = vmax.f32 %v2950_v12, %v2985_v8  ;;  %v2922_v50 = vadd.f32 %v5833_v46, %v2885_v1  ;;  %v2849_v39 = vsel %vm2836_vm13, %v2822_v31, %v2823_v30  ;;  %v2850_v42 = vsel %vm2836_vm13, %v2821_v32, %v2822_v31 }
 0x2bd   : > { %v2953_v49 = vmax.f32 %v2921_v33, 0.0  ;;  %v2886_v51 = vadd.f32 %v2850_v42, %v6173_v17  ;;  %v2887_v37 = vadd.f32 %v2849_v39, %v5609_v9  ;;  %v5933_v4 = vmax.f32 %v3022_v55, %v3023_v63 }
 0x2be   : > { %v5935_v43 = vmax.f32 %v3039_v47, %v3040_v56  ;;  %v3047_v19 = vrot.slane %v5924_v62, 4  ;;  %v2954_v27 = vmax.f32 %v2922_v50, 0.0  ;;  %v2824_v59 = vrot.slane %v1830_v14, 3  ;;  %v3872_v57 = vpop.f32.mrb[150].mxu0 }
 0x2bf   : > { %v2987_v5 = vsel %vm2971_vm14, %v2953_v49, 0.0  ;;  %v2923_v15 = vadd.f32 %v5833_v46, %v2886_v51  ;;  %v2924_v32 = vadd.f32 %v5833_v46, %v2887_v37  ;;  %v2827_v60 = vrot.slane %v3872_v57, 3  ;;  %v1840_v18 = vpop.f32.mrb[151].mxu0 }
 0x2c0   : > { %v5942_v7 = vmax.f32 %v2952_v20, %v2987_v5  ;;  %v2847_v9 = vsel %vm2836_vm13, %v2824_v59, %v2825_v13  ;;  %v2848_v55 = vsel %vm2836_vm13, %v2823_v30, %v2824_v59  ;;  %v2826_v63 = vrot.slane %v1840_v18, 3 }
 0x2c1   : > { %v2955_v11 = vmax.f32 %v2923_v15, 0.0  ;;  %v2888_v3 = vadd.f32 %v2848_v55, %v5625_v25  ;;  %v2889_v36 = vadd.f32 %v2847_v9, %v5638_v21  ;;  %v3030_v12 = vrot.slane %v5909_v58, 1 }
 0x2c2   : > { %v2956_v47 = vmax.f32 %v2924_v32, 0.0  ;;  %v2845_v24 = vsel %vm2836_vm13, %v2826_v63, %v2827_v60  ;;  %v2846_v23 = vsel %vm2836_vm13, %v2825_v13, %v2826_v63  ;;  %v3875_v45 = vpop.f32.mrb[152].mxu0  ;;  %v3036_v20 = vmax.f32 %v3034_v22, %v3035_v38 }
 0x2c3   : > { %v2989_v30 = vsel %vm2971_vm14, %v2955_v11, 0.0  ;;  %v2925_v1 = vadd.f32 %v5833_v46, %v2888_v3  ;;  %v2926_v25 = vadd.f32 %v5833_v46, %v2889_v36  ;;  %v2890_v21 = vadd.f32 %v2846_v23, %v5656_v52  ;;  %v1850_v31 = vpop.f32.mrb[153].mxu0 }
 0x2c4   : > { %v3060_v10 = vmax.f32 %v2954_v27, %v2989_v30  ;;  %v2891_v56 = vadd.f32 %v2845_v24, %v5676_v40  ;;  %v2829_v8 = vrot.slane %v3875_v45, 3  ;;  %v2828_v33 = vrot.slane %v1850_v31, 3 }
 0x2c5   : > { %v2957_v14 = vmax.f32 %v2925_v1, 0.0  ;;  %v2927_v13 = vadd.f32 %v5833_v46, %v2890_v21  ;;  %v5963_v22 = vmax.f32 %v5909_v58, %v3030_v12  ;;  %v3037_v38 = vrot.slane %v3036_v20, 1 }
 0x2c6   : > { %v3061_v50 = vrot.slane %v3060_v10, 4  ;;  %v2928_v39 = vadd.f32 %v5833_v46, %v2891_v56  ;;  %v2843_v42 = vsel %vm2836_vm13, %v2828_v33, %v2829_v8  ;;  %v2844_v52 = vsel %vm2836_vm13, %v2827_v60, %v2828_v33  ;;  %v3878_v49 = vpop.f32.mrb[154].mxu0 }
 0x2c7   : > { %v2991_v40 = vsel %vm2971_vm14, %v2957_v14, 0.0  ;;  %v2959_v17 = vmax.f32 %v2927_v13, 0.0  ;;  %v2892_v51 = vadd.f32 %v2844_v52, %v5692_v6  ;;  %v2893_v58 = vadd.f32 %v2843_v42, %v5706_v44  ;;  %v1860_v37 = vpop.f32.mrb[155].mxu0 }
 0x2c8   : > { %v3062_v27 = vmax.f32 %v3060_v10, %v3061_v50  ;;  %v2958_v59 = vmax.f32 %v2926_v25, 0.0  ;;  %v3067_v57 = vmax.f32 %v2956_v47, %v2991_v40  ;;  %v2831_v5 = vrot.slane %v3878_v49, 3 }
 0x2c9   : > { %v2960_v15 = vmax.f32 %v2928_v39, 0.0  ;;  %v2993_v32 = vsel %vm2971_vm14, %v2959_v17, 0.0  ;;  %v2929_v60 = vadd.f32 %v5833_v46, %v2892_v51  ;;  %v2830_v18 = vrot.slane %v1860_v37, 3 }
 0x2ca   : > { %v3063_v9 = vrot.slane %v3062_v27, 2  ;;  %v3068_v55 = vrot.slane %v3067_v57, 4  ;;  %v3074_v63 = vmax.f32 %v2958_v59, %v2993_v32  ;;  %v2930_v11 = vadd.f32 %v5833_v46, %v2893_v58  ;;  %v5978_v6 = vpop.f32.mrb[156].mxu0 }
 0x2cb   : > { %v2961_v44 = vmax.f32 %v2929_v60, 0.0  ;;  %v2841_v3 = vsel %vm2836_vm13, %v2830_v18, %v2831_v5  ;;  %v2842_v36 = vsel %vm2836_vm13, %v2829_v8, %v2830_v18  ;;  %v1870_v12 = vpop.f32.mrb[157].mxu0  ;;  %v5984_v47 = vmax.f32 %v3036_v20, %v3037_v38 }
 0x2cc   : > { %v3064_v24 = vmax.f32 %v3062_v27, %v3063_v9  ;;  %v3069_v23 = vmax.f32 %v3067_v57, %v3068_v55  ;;  %v3075_v45 = vrot.slane %v3074_v63, 4  ;;  %v2894_v30 = vadd.f32 %v2842_v36, %v5727_v61 }
 0x2cd   : > { %v2995_v1 = vsel %vm2971_vm14, %v2961_v44, 0.0  ;;  %v2895_v25 = vadd.f32 %v2841_v3, %v5740_v54  ;;  %v2833_v21 = vrot.slane %v5978_v6, 3  ;;  %v2832_v31 = vrot.slane %v1870_v12, 3 }
 0x2ce   : > { %v3065_v10 = vrot.slane %v3064_v24, 1  ;;  %v3070_v56 = vrot.slane %v3069_v23, 2  ;;  %v3076_v33 = vmax.f32 %v3074_v63, %v3075_v45  ;;  %v3081_v8 = vmax.f32 %v2960_v15, %v2995_v1  ;;  %v3884_v14 = vpop.f32.mrb[158].mxu0 }
 0x2cf   : > { %v2931_v20 = vadd.f32 %v5833_v46, %v2894_v30  ;;  %v2932_v13 = vadd.f32 %v5833_v46, %v2895_v25  ;;  %v2839_v61 = vsel %vm2836_vm13, %v2832_v31, %v2833_v21  ;;  %v2840_v54 = vsel %vm2836_vm13, %v2831_v5, %v2832_v31  ;;  %v1880_v38 = vpop.f32.mrb[159].mxu0 }
 0x2d0   : > { %v3071_v50 = vmax.f32 %v3069_v23, %v3070_v56  ;;  %v3077_v39 = vrot.slane %v3076_v33, 2  ;;  %v2962_v42 = vmax.f32 %v2930_v11, 0.0  ;;  %v3082_v52 = vrot.slane %v3081_v8, 4 }
 0x2d1   : > { %v3066_v49 = vmax.f32 %v3064_v24, %v3065_v10  ;;  %v2963_v40 = vmax.f32 %v2931_v20, 0.0  ;;  %v2896_v17 = vadd.f32 %v2840_v54, %v5756_v29  ;;  %v2897_v51 = vadd.f32 %v2839_v61, %v5772_v28 }
 0x2d2   : > { %v3072_v58 = vrot.slane %v3071_v50, 1  ;;  %v3078_v37 = vmax.f32 %v3076_v33, %v3077_v39  ;;  %v3083_v27 = vmax.f32 %v3081_v8, %v3082_v52  ;;  %v3042_v59 = vrot.slane %v5935_v43, 2 }
 0x2d3   : > { %v2964_v57 = vmax.f32 %v2932_v13, 0.0  ;;  %v2997_v5 = vsel %vm2971_vm14, %v2963_v40, 0.0  ;;  %v2933_v15 = vadd.f32 %v5833_v46, %v2896_v17  ;;  %v3048_v32 = vmax.f32 %v5924_v62, %v3047_v19 }
 0x2d4   : > { %v3079_v60 = vrot.slane %v3078_v37, 1  ;;  %v3084_v18 = vrot.slane %v3083_v27, 2  ;;  %v3088_v29 = vmax.f32 %v2962_v42, %v2997_v5  ;;  %v6009_v28 = vadd.f32 %v5833_v46, %v2897_v51 }
 0x2d5   : > { %v3073_v9 = vmax.f32 %v3071_v50, %v3072_v58  ;;  %v2965_v55 = vmax.f32 %v2933_v15, 0.0  ;;  %v3043_v63 = vmax.f32 %v5935_v43, %v3042_v59  ;;  %v3049_v11 = vrot.slane %v3048_v32, 2 }
 0x2d6   : > { %v3080_v44 = vmax.f32 %v3078_v37, %v3079_v60  ;;  %v3085_v3 = vmax.f32 %v3083_v27, %v3084_v18  ;;  %v3089_v36 = vrot.slane %v3088_v29, 4  ;;  %v3054_v12 = vrot.slane %v5942_v7, 4 }
 0x2d7   : > { %v2999_v24 = vsel %vm2971_vm14, %v2965_v55, 0.0  ;;  %v3044_v62 = vrot.slane %v3043_v63, 1  ;;  %v3050_v19 = vmax.f32 %v3048_v32, %v3049_v11  ;;  %v3203_v23 = vsel %vm3132_vm5, %v5903_v48, %v5886_v0 }
 0x2d8   : > { %v3086_v45 = vrot.slane %v3085_v3, 1  ;;  %v3090_v30 = vmax.f32 %v3088_v29, %v3089_v36  ;;  %v3095_v1 = vmax.f32 %v2964_v57, %v2999_v24  ;;  %v3055_v43 = vmax.f32 %v5942_v7, %v3054_v12 }
 0x2d9   : > { %v3045_v25 = vmax.f32 %v3043_v63, %v3044_v62  ;;  %v3051_v31 = vrot.slane %v3050_v19, 1  ;;  %v3204_v10 = vsel %vm3134_vm6, %v5933_v4, %v3203_v23  ;;  %v2835_v56 = vrot.slane %v3884_v14, 3 }
 0x2da   : > { %v3087_v33 = vmax.f32 %v3085_v3, %v3086_v45  ;;  %v3091_v8 = vrot.slane %v3090_v30, 2  ;;  %v3096_v20 = vrot.slane %v3095_v1, 4  ;;  %v3056_v13 = vrot.slane %v3055_v43, 2 }
 0x2db   : > { %v3052_v61 = vmax.f32 %v3050_v19, %v3051_v31  ;;  %v3205_v54 = vsel %vm3136_vm7, %v5963_v22, %v3204_v10  ;;  %v2868_v0 = vsel %vm2836_vm13, %v2835_v56, %v2804_v16  ;;  %v2834_v48 = vrot.slane %v1880_v38, 3 }
 0x2dc   : > { %v3092_v7 = vmax.f32 %v3090_v30, %v3091_v8  ;;  %v3097_v50 = vmax.f32 %v3095_v1, %v3096_v20  ;;  %v3057_v39 = vmax.f32 %v3055_v43, %v3056_v13  ;;  %v3206_v4 = vsel %vm3138_vm8, %v5984_v47, %v3205_v54 }
 0x2dd   : > { %v3207_v14 = vsel %vm3140_vm9, %v3045_v25, %v3206_v4  ;;  %v2900_v42 = vadd.f32 %v2868_v0, %v5819_v2  ;;  %v2837_v52 = vsel %vm2836_vm13, %v2834_v48, %v2835_v56  ;;  %v2838_v53 = vsel %vm2836_vm13, %v2833_v21, %v2834_v48 }
 0x2de   : > { %v3093_v16 = vrot.slane %v3092_v7, 1  ;;  %v3098_v22 = vrot.slane %v3097_v50, 2  ;;  %v3058_v38 = vrot.slane %v3057_v39, 1  ;;  %v3208_v40 = vsel %vm3142_vm10, %v3052_v61, %v3207_v14 }
 0x2df   : > { %v2937_v17 = vadd.f32 %v5833_v46, %v2900_v42  ;;  %v2898_v47 = vadd.f32 %v2838_v53, %v5788_v35  ;;  %v2899_v51 = vadd.f32 %v2837_v52, %v5816_v34  ;;  %v3210_v2 = vsel %vm3132_vm5, %v3073_v9, %v3066_v49 }
 0x2e0   : > { %v3099_v58 = vmax.f32 %v3097_v50, %v3098_v22  ;;  %v3059_v37 = vmax.f32 %v3057_v39, %v3058_v38  ;;  %v3094_v27 = vmax.f32 %v3092_v7, %v3093_v16  ;;  %v3211_v6 = vsel %vm3134_vm6, %v3080_v44, %v3210_v2 }
 0x2e1   : > { %v2969_v41 = vmax.f32 %v2937_v17, 0.0  ;;  %v2935_v21 = vadd.f32 %v5833_v46, %v2898_v47  ;;  %v2936_v59 = vadd.f32 %v5833_v46, %v2899_v51  ;;  %v3212_v57 = vsel %vm3136_vm7, %v3087_v33, %v3211_v6  ;;  %v3718_v33 = vld [vmem:[%s6113_s4] ss:$0 sm:$0xff] }
 0x2e2   : > { %v3209_v5 = vsel %vm3144_vm11, %v3059_v37, %v3208_v40  ;;  %v3100_v15 = vrot.slane %v3099_v58, 1  ;;  %v3213_v35 = vsel %vm3138_vm8, %v3094_v27, %v3212_v57  ;;  %v2966_v60 = vmax.f32 %v6009_v28, 0.0 }
 0x2e3   : > { %3917 = vmatprep.mubr.f32.mxu1 %v3209_v5  ;;  %v3003_v34 = vsel %vm2971_vm14, %v2969_v41, 0.0  ;;  %v2967_v49 = vmax.f32 %v2935_v21, 0.0  ;;  %v2968_v32 = vmax.f32 %v2936_v59, 0.0 }
 0x2e4   : > { %v3101_v18 = vmax.f32 %v3099_v58, %v3100_v15 }
 0x2e5   : > { %v3001_v29 = vsel %vm2971_vm14, %v2967_v49, 0.0  ;;  %v3109_v46 = vmax.f32 %v2968_v32, %v3003_v34 }
 0x2e6   : > { %v3102_v9 = vmax.f32 %v2966_v60, %v3001_v29  ;;  %v3214_v55 = vsel %vm3140_vm9, %v3101_v18, %v3213_v35 }
 0x2e7   : > { %v3110_v63 = vrot.slane %v3109_v46, 4 }
 0x2e8   : > { %v3103_v11 = vrot.slane %v3102_v9, 4 }
 0x2e9   : > { %v3111_v44 = vmax.f32 %v3109_v46, %v3110_v63 }
 0x2ea   : > { %v3104_v3 = vmax.f32 %v3102_v9, %v3103_v11 }
 0x2eb   : > { %v3112_v36 = vrot.slane %v3111_v44, 2 }
 0x2ec   : > { %v3105_v12 = vrot.slane %v3104_v3, 2 }
 0x2ed   : > { %v3113_v24 = vmax.f32 %v3111_v44, %v3112_v36 }
 0x2ee   : > { %v3106_v62 = vmax.f32 %v3104_v3, %v3105_v12 }
 0x2ef   : > { %v3114_v19 = vrot.slane %v3113_v24, 1 }
 0x2f0   : > { %v3107_v23 = vrot.slane %v3106_v62, 1 }
 0x2f1   : > { %v3115_v45 = vmax.f32 %v3113_v24, %v3114_v19 }
 0x2f2   : > { %v3108_v28 = vmax.f32 %v3106_v62, %v3107_v23 }
 0x2f4   : > { %v3215_v26 = vsel %vm3142_vm10, %v3108_v28, %v3214_v55 }
 0x2f5   : > { %v3216_v30 = vsel %vm3144_vm11, %v3115_v45, %v3215_v26 }
 0x2f6   : > { %3918 = vmatmul.mubr.f32.vlgmr.msra.gmra.mrb[132].mxu1 %v3216_v30 }
 0x340   : > { %v3797_v1 = vpop.f32.mrb[128].mxu1 }
 0x341   : > { %v3798_v43 = vpop.f32.mrb[129].mxu1 }
 0x342   : > { %v3799_v25 = vadd.f32 %v3798_v43, %v3797_v1 }
 0x344   : > { %v3341_v13 = vadd.f32 %v3799_v25, %v3718_v33 }
 0x384   : > { %v3800_v31 = vpop.f32.mrb[130].mxu1 }
 0x385   : > { %v3801_v10 = vpop.f32.mrb[131].mxu1 }
 0x386   : > { %v3802_v56 = vadd.f32 %v3801_v10, %v3800_v31 }
 0x388   : > { %v3346_v8 = vadd.f32 %v3802_v56, %v3718_v33 }
 0x3c9   : > { %v3919_v20 = vpop.f32.mrb[132].mxu1 }
 0x3ca   : > { %v3421_v61 = vadd.f32 %v3919_v20, %v3346_v8  ;;  %v3415_v54 = vpop.f32.mrb[133].mxu1 }
 0x3cb   : > { %v3416_v0 = vadd.f32 %v3415_v54, %v3341_v13 }
 0x3cc   : > { %3425 = vst [vmem:[%s233_s8 + $0x8] sm:$0xff] %v3421_v61 }
 0x3cd   : > { %3424 = vst [vmem:[%s233_s8] sm:$0xff] %v3416_v0 }
 0x3ce   : > { %4165 = shalt.err (!%p4162_p7)
}
 0x3cf   : > { %s4166_s23 = scalar_lea.hbm %s6066_s13, 256  ;;  %s4170_s6 = scalar_lea.hbm %s6114_s5, 512 }
 0x3d0   : > { %p4167_p8 = scmp.ne.s32.totalorder %s6066_s13, %s4166_s23  ;;  %p4171_p1 = scmp.lt.u32.totalorder %s6066_s13, %s6114_s5 }
 0x3d1   : > { %p4172_p0 = scmp.lt.u32.totalorder %s4170_s6, %s4166_s23  ;;  %p4174_p6 = scmp.lt.u32.totalorder %s4166_s23, %s6066_s13 }
 0x3d2   : > { %p4168_p11 = pnand %p4167_p8, %p6174_p9 }
 0x3d3   : > { %p4173_p5 = por %p4172_p0, %p4171_p1 }
 0x3d4   : > { %p4169_p13 = pneg %p4168_p11 }
 0x3d5   : > { %p4175_p10 = por %p4174_p6, %p4173_p5 }
 0x3d7   : > { %p4176_p12 = pnand %p4175_p10, %p4169_p13 }
 0x3d9   : > { %4179 = shalt.err (!%p4176_p12)
}
 0x3da   : > { %s4226_s8 = smov 128   ;;  %s4227_s10 = smov 8  }
 0x3db   : > { %4068 = dma.vmem_to_hbm [thread:$0]  (%p6174_p9), %s6061_s9, 256, %s6066_s13, %s6068_s14, %s4226_s8, %s4226_s8, %s4227_s10  }
 0x3dc PF: > { %p4080_p2 = scmp.ge.s32.totalorder %s4218_s21, 2  ;;  %s3455_s11 = sand.u32 1, %s4206_s18  }
 0x3dd   : > { %p6175_p3 = scmp.ne.s32.totalorder %s6128_s29, 0  ;;  %s3456_s12 = scalar_lea.sflag [#allocation4], %s3455_s11 }
 0x3df   : > { %p4075_p4 = pnand %p4080_p2, %p6175_p3 }
 0x3e1   : > { %4201 = dma.done.wait (!%p4075_p4), %s3456_s12, 256  }
 0x3e2   : > { %4203 = vsyncadd (!%p4075_p4), %s3456_s12, 4294967040  ;;  %p16_p7 = scmp.ge.s32.totalorder %s4283_s24, 4   ;;  %s6176_s18 = smov %s4210_s19 }
 0x3e3   : > { %s6177_s19 = smov %s4214_s20  ;;  %s6178_s20 = smov %s4294_s27 }
 0x3e4   : > { %s6179_s21 = smov %s4283_s24  ;;  %18 = sbr.rel (!%p16_p7) target bundleno = 4 (0x4), region = 80 }
 0x3eb   :  { %3461 = vsyncpa [#allocation3], 1 }
 0x3ec   :  { %3463 = vsyncpa [#allocation3 + $0x1], 1 }
 0x3ed   :  { %3464 = vsyncpa [#allocation4], 1 }
 0x3ee   :  { %3466 = vsyncpa [#allocation4 + $0x1], 1 }

</bundles_post_ra>
